<compile_context>
chip_gen: v6e
topology: v6e:2x2x1
jax: 0.10.0
libtpu: 0.0.40
codegen_flags: <defaults>
</compile_context>

<pallas_src>
import functools
import math

import jax
import jax.numpy as jnp
from jax import lax
from jax.experimental import pallas as pl
from jax.experimental.pallas import tpu as pltpu


# --------------------------------------------------------------------------
# helpers
# --------------------------------------------------------------------------
def _round_up(v, m):
    return (v + m - 1) // m * m


def _vmem_capacity_bytes():
    """Per-core VMEM capacity (generation aware); conservative fallback."""
    try:
        info = pltpu.get_tpu_info()
        cap = getattr(info, "vmem_capacity_bytes", None)
        if cap:
            return int(cap)
    except Exception:
        pass
    return 64 * 1024 * 1024          # v7x per-core size == safe lower bound


def _vmem_array_bytes(shape, itemsize):
    """VMEM footprint of an array, accounting for (8,128) tile padding."""
    if len(shape) == 1:
        return _round_up(shape[0] * itemsize, 512)
    lead = 1
    for d in shape[:-2]:
        lead *= int(d)
    return lead * _round_up(shape[-2], 8) * _round_up(shape[-1], 128) * itemsize


def _fused_vmem_bytes(hw, k_dim, init_c, new_c, oup, kh, kw, h, w,
                      in_it, out_it):
    ph, pw = kh // 2, kw // 2
    b = 2 * _vmem_array_bytes((hw, k_dim), in_it)          # patches (dbl buf)
    b += 2 * _vmem_array_bytes((hw, oup), out_it)          # output  (dbl buf)
    b += 2 * (_vmem_array_bytes((k_dim, init_c), in_it)    # weights (dbl buf)
              + _vmem_array_bytes((1, init_c), 4)
              + _vmem_array_bytes((init_c, new_c), 4)
              + _vmem_array_bytes((kh * kw, new_c), 4)
              + _vmem_array_bytes((1, new_c), 4))
    b += _vmem_array_bytes((h + 2 * ph, w + 2 * pw, new_c), 4)   # pad slab
    b += 4 * _vmem_array_bytes((hw, max(init_c, new_c)), 4)      # live f32 tmps
    return b


# --------------------------------------------------------------------------
# fused kernel: primary conv (MXU) + cheap depthwise (VPU) + concat + slice
# --------------------------------------------------------------------------
def _ghost_fused_kernel(p_ref, w1_ref, b1_ref, e_ref, wdw_ref, b2_ref,
                        o_ref, xpad_ref, *, h, w, kh, kw, init_c, new_c,
                        oup, relu, use_expand):
    ph, pw = kh // 2, kw // 2

    # ---- primary conv as one MXU matmul (BN scale folded into the weight) --
    x1 = jnp.dot(p_ref[0], w1_ref[...], preferred_element_type=jnp.float32)
    x1 = x1 + b1_ref[...]                                   # (hw, init) f32
    if relu:
        x1 = jnp.maximum(x1, 0.0)

    n1 = min(init_c, oup)
    o_ref[0, :, 0:n1] = x1[:, 0:n1].astype(o_ref.dtype)

    if oup > init_c:
        # ---- grouped-conv channel-multiplier expansion (identity skipped
        #      for the default ratio=2) as a tiny 0/1 matmul ----------------
        if use_expand:
            xdw = jnp.dot(x1, e_ref[...], preferred_element_type=jnp.float32)
        else:
            xdw = x1                                         # (hw, new) f32

        # ---- zero-filled spatial slab in VMEM (no XLA halo pad, no HBM) ---
        xpad_ref[...] = jnp.zeros(xpad_ref.shape, jnp.float32)
        for i in range(h):                                   # static unroll
            xpad_ref[ph + i, pw:pw + w, :] = xdw[i * w:(i + 1) * w, :]
        xp = xpad_ref[...]                                   # (h+2ph, w+2pw, new)

        # ---- depthwise taps on the VPU, BN folded into the taps -----------
        wdw = wdw_ref[...]                                   # (kh*kw, new) f32
        acc = jnp.zeros((h, w, new_c), jnp.float32)
        for dy in range(kh):
            for dx in range(kw):
                acc = acc + xp[dy:dy + h, dx:dx + w, :] * wdw[dy * kw + dx, :]
        x2 = acc + b2_ref[...][0, :]
        if relu:
            x2 = jnp.maximum(x2, 0.0)

        # ---- concat([x1, x2])[:, :oup] written straight to the output -----
        c2 = oup - init_c
        for i in range(h):                                   # static unroll
            o_ref[0, i * w:(i + 1) * w, init_c:oup] = (
                x2[i, :, 0:c2].astype(o_ref.dtype))


# --------------------------------------------------------------------------
# GhostModule forward
# --------------------------------------------------------------------------
def ghost_module(x_nchw, primary_weight, primary_bn, cheap_weight, cheap_bn, *,
                 oup, ratio=2, stride=1, relu=True, eps=1e-5,
                 compute_dtype=jnp.bfloat16):
    """GhostModule forward (eval-mode BatchNorm), fused into one Pallas kernel.

    x_nchw        : [N, C_in, H, W]
    primary_weight: [init_channels, C_in, k, k]
    cheap_weight  : [new_channels, 1, dw, dw]   (depthwise, groups=init_channels)
    primary_bn / cheap_bn : (gamma, beta, running_mean, running_var)
    compute_dtype : bf16 by default (HBM streams + MXU inputs); accumulation
                    and the depthwise VPU math stay f32 (v5e-safe).  Pass
                    jnp.float32 for exact f32 end-to-end.
    """
    n, c_in, _, _ = x_nchw.shape
    init_c = primary_weight.shape[0]
    new_c = cheap_weight.shape[0]
    mult = max(new_c // max(init_c, 1), 1)
    assert new_c == init_c * (ratio - 1) == init_c * mult
    kh1, kw1 = primary_weight.shape[2], primary_weight.shape[3]
    kh2, kw2 = cheap_weight.shape[2], cheap_weight.shape[3]
    assert kh1 == kw1 and kh2 == kw2, "module uses pad = k // 2 (square kernels)"

    g1, b1, m1, v1 = primary_bn
    g2, b2, m2, v2 = cheap_bn

    # ---- fold eval-mode BN into the conv weights + bias rows --------------
    s1 = g1 / jnp.sqrt(v1 + eps)
    w1_mat = primary_weight.reshape(init_c, c_in * kh1 * kw1).T * s1  # (K, init)
    b1_row = (b1 - m1 * s1).reshape(1, init_c).astype(jnp.float32)
    s2 = g2 / jnp.sqrt(v2 + eps)
    w_taps = (cheap_weight.reshape(new_c, kh2 * kw2).T * s2).astype(jnp.float32)
    b2_row = (b2 - m2 * s2).reshape(1, new_c).astype(jnp.float32)

    # grouped conv channel-multiplier expansion as a 0/1 matrix (unused for
    # the default ratio=2 where it is the identity).
    expand = jnp.repeat(jnp.eye(init_c, dtype=jnp.float32), mult, axis=1)

    # ---- patch extraction (a free reshape for the default 1x1 conv) -------
    pad1 = kh1 // 2
    if kh1 == 1:
        xs = x_nchw[:, :, ::stride, ::stride] if stride != 1 else x_nchw
        h_out, w_out = xs.shape[2], xs.shape[3]
        patches = jnp.transpose(xs, (0, 2, 3, 1)).reshape(
            n, h_out * w_out, c_in)
        k_dim = c_in
    else:
        # TODO(synk): assumes conv_general_dilated_patches orders the feature
        # dim as (c_in, kh, kw) to match weight.reshape(c_out, c_in*kh*kw);
        # GhostModule's default primary conv is 1x1 so this is off-path.
        p = lax.conv_general_dilated_patches(
            x_nchw, filter_shape=(kh1, kw1), window_strides=(stride, stride),
            padding=[(pad1, pad1), (pad1, pad1)])
        k_dim, h_out, w_out = p.shape[1], p.shape[2], p.shape[3]
        patches = jnp.transpose(p, (0, 2, 3, 1)).reshape(
            n, h_out * w_out, k_dim)

    hw = h_out * w_out
    patches = patches.astype(compute_dtype)
    w1_mat = w1_mat.astype(compute_dtype)
    in_it = jnp.dtype(compute_dtype).itemsize
    out_dtype = compute_dtype
    out_it = jnp.dtype(out_dtype).itemsize

    # ---- generation-aware VMEM budgeting ----------------------------------
    vmem_cap = _vmem_capacity_bytes()
    est = _fused_vmem_bytes(hw, k_dim, init_c, new_c, oup, kh2, kw2,
                            h_out, w_out, in_it, out_it)
    if est > int(0.6 * vmem_cap):
        # TODO(synk): tile H with a +/- (dw//2) halo for very large images.
        raise NotImplementedError(
            f"per-image working set {est / 2**20:.1f} MiB exceeds the VMEM "
            f"budget ({vmem_cap / 2**20:.0f} MiB); H-halo tiling needed")
    vmem_limit = int(min(0.8 * vmem_cap, max(32 * 2**20, 2 * est)))

    ph2, pw2 = kh2 // 2, kw2 // 2
    kernel = functools.partial(
        _ghost_fused_kernel, h=h_out, w=w_out, kh=kh2, kw=kw2,
        init_c=init_c, new_c=new_c, oup=oup, relu=relu,
        use_expand=(mult > 1))

    flops = 2 * n * hw * (k_dim * init_c + new_c * kh2 * kw2
                          + (init_c * new_c if mult > 1 else 0))
    bytes_accessed = (patches.size * in_it + n * hw * oup * out_it
                      + w1_mat.size * in_it
                      + (b1_row.size + b2_row.size + w_taps.size
                         + expand.size) * 4)

    out_flat = pl.pallas_call(
        kernel,
        out_shape=jax.ShapeDtypeStruct((n, hw, oup), out_dtype),
        grid=(n,),
        in_specs=[
            pl.BlockSpec((1, hw, k_dim), lambda b: (b, 0, 0)),      # patches
            pl.BlockSpec((k_dim, init_c), lambda b: (0, 0)),        # W1 (BN folded)
            pl.BlockSpec((1, init_c), lambda b: (0, 0)),            # bias1
            pl.BlockSpec((init_c, new_c), lambda b: (0, 0)),        # expand
            pl.BlockSpec((kh2 * kw2, new_c), lambda b: (0, 0)),     # dw taps
            pl.BlockSpec((1, new_c), lambda b: (0, 0)),             # bias2
        ],
        out_specs=pl.BlockSpec((1, hw, oup), lambda b: (b, 0, 0)),
        scratch_shapes=[pltpu.VMEM(
            (h_out + 2 * ph2, w_out + 2 * pw2, new_c), jnp.float32)],
        compiler_params=pltpu.CompilerParams(
            dimension_semantics=("parallel",),
            vmem_limit_bytes=vmem_limit),
        cost_estimate=pl.CostEstimate(
            flops=flops, transcendentals=0, bytes_accessed=bytes_accessed),
    )(patches, w1_mat, b1_row, expand, w_taps, b2_row)

    out = out_flat.reshape(n, h_out, w_out, oup)
    return jnp.transpose(out, (0, 3, 1, 2))                 # back to NCHW


# --------------------------------------------------------------------------
# pure-JAX reference (eval-mode BN)
# --------------------------------------------------------------------------
def _ghost_module_reference(x, w1, bn1, w2, bn2, *, oup, stride=1, eps=1e-5,
                            relu=True):
    g1, b1, m1, v1 = bn1
    g2, b2, m2, v2 = bn2
    k = w1.shape[2]
    pad = k // 2
    y1 = lax.conv_general_dilated(
        x, w1, (stride, stride), [(pad, pad), (pad, pad)],
        dimension_numbers=("NCHW", "OIHW", "NCHW"))
    s1 = g1 / jnp.sqrt(v1 + eps)
    y1 = y1 * s1.reshape(1, -1, 1, 1) + (b1 - m1 * s1).reshape(1, -1, 1, 1)
    if relu:
        y1 = jnp.maximum(y1, 0.0)

    dwk = w2.shape[2]
    pad2 = dwk // 2
    init_channels = w1.shape[0]
    y2 = lax.conv_general_dilated(
        y1, w2, (1, 1), [(pad2, pad2), (pad2, pad2)],
        dimension_numbers=("NCHW", "OIHW", "NCHW"),
        feature_group_count=init_channels)
    s2 = g2 / jnp.sqrt(v2 + eps)
    y2 = y2 * s2.reshape(1, -1, 1, 1) + (b2 - m2 * s2).reshape(1, -1, 1, 1)
    if relu:
        y2 = jnp.maximum(y2, 0.0)
    return jnp.concatenate([y1, y2], axis=1)[:, :oup]


if __name__ == "__main__":
    # GhostModule(inp=4, oup=8, kernel_size=1, ratio=2, dw_size=3, stride=1)
    N, C_IN, OUP, HW = 2, 4, 8, 16
    KERNEL_SIZE, RATIO, DW_SIZE, STRIDE = 1, 2, 3, 1
    init_channels = math.ceil(OUP / RATIO)            # 4
    new_channels = init_channels * (RATIO - 1)        # 4

    key = jax.random.PRNGKey(0)
    kx, kw1, kw2 = jax.random.split(key, 3)
    x = jax.random.normal(kx, (N, C_IN, HW, HW), dtype=jnp.float32)
    w1 = jax.random.normal(
        kw1, (init_channels, C_IN, KERNEL_SIZE, KERNEL_SIZE),
        dtype=jnp.float32) * 0.3
    w2 = jax.random.normal(
        kw2, (new_channels, 1, DW_SIZE, DW_SIZE), dtype=jnp.float32) * 0.3

    def bn_params(c, base):
        g = 1.0 + 0.1 * jnp.arange(c, dtype=jnp.float32)
        b = 0.05 * jnp.arange(c, dtype=jnp.float32) + base
        mean = 0.01 * jnp.arange(c, dtype=jnp.float32)
        var = 1.0 + 0.02 * jnp.arange(c, dtype=jnp.float32)
        return (g, b, mean, var)

    bn1 = bn_params(init_channels, 0.0)
    bn2 = bn_params(new_channels, 0.1)

    ref = _ghost_module_reference(x, w1, bn1, w2, bn2, oup=OUP, stride=STRIDE)

    # exact check: f32 I/O path
    fn_f32 = jax.jit(functools.partial(
        ghost_module, oup=OUP, ratio=RATIO, stride=STRIDE, relu=True,
        compute_dtype=jnp.float32))
    out_f32 = fn_f32(x, w1, bn1, w2, bn2)
    jax.block_until_ready(out_f32)
    assert out_f32.shape == (N, OUP, HW, HW), out_f32.shape
    err_f32 = float(jnp.max(jnp.abs(out_f32 - ref)))
    assert jnp.allclose(out_f32, ref, atol=1e-4, rtol=1e-4), err_f32

    # default fast path: bf16 HBM streams / MXU inputs, f32 accumulation
    fn_bf16 = jax.jit(functools.partial(
        ghost_module, oup=OUP, ratio=RATIO, stride=STRIDE, relu=True))
    out_bf16 = fn_bf16(x, w1, bn1, w2, bn2)
    jax.block_until_ready(out_bf16)
    assert out_bf16.shape == (N, OUP, HW, HW), out_bf16.shape
    assert jnp.allclose(out_bf16.astype(jnp.float32), ref,
                        atol=1e-1, rtol=5e-2), float(
        jnp.max(jnp.abs(out_bf16.astype(jnp.float32) - ref)))

    print("KERNEL_OK")
</pallas_src>

<mosaic_0001>
module attributes {stable_mosaic.version = 11 : i64} {
  func.func @_ghost_fused_kernel(%arg0: i32, %arg1: memref<1x256x4xf32, #tpu.memory_space<vmem>>, %arg2: memref<4x4xf32, #tpu.memory_space<vmem>>, %arg3: memref<1x4xf32, #tpu.memory_space<vmem>>, %arg4: memref<4x4xf32, #tpu.memory_space<vmem>>, %arg5: memref<9x4xf32, #tpu.memory_space<vmem>>, %arg6: memref<1x4xf32, #tpu.memory_space<vmem>>, %arg7: memref<1x256x8xf32, #tpu.memory_space<vmem>>, %arg8: memref<18x18x4xf32, #tpu.memory_space<vmem>>) attributes {dimension_semantics = [#tpu.dimension_semantics<parallel>], iteration_bounds = array<i64: 2>, scalar_prefetch = 0 : i64, scratch_operands = 1 : i64, tpu.core_type = #tpu.core_type<tc>, window_params = [{transform_indices = @transform_0, window_bounds = array<i64: 1, 256, 4>}, {pipeline_mode = #tpu.pipeline_mode<synchronous>, transform_indices = @transform_1, window_bounds = array<i64: 4, 4>}, {pipeline_mode = #tpu.pipeline_mode<synchronous>, transform_indices = @transform_2, window_bounds = array<i64: 1, 4>}, {pipeline_mode = #tpu.pipeline_mode<synchronous>, transform_indices = @transform_3, window_bounds = array<i64: 4, 4>}, {pipeline_mode = #tpu.pipeline_mode<synchronous>, transform_indices = @transform_4, window_bounds = array<i64: 9, 4>}, {pipeline_mode = #tpu.pipeline_mode<synchronous>, transform_indices = @transform_5, window_bounds = array<i64: 1, 4>}, {transform_indices = @transform_6, window_bounds = array<i64: 1, 256, 8>}]} {
    %c0 = arith.constant 0 : index
    %c0_0 = arith.constant 0 : index
    %c0_1 = arith.constant 0 : index
    %0 = vector.load %arg1[%c0, %c0_0, %c0_1] : memref<1x256x4xf32, #tpu.memory_space<vmem>>, vector<1x256x4xf32>
    %1 = vector.shape_cast %0 : vector<1x256x4xf32> to vector<256x4xf32>
    %c0_2 = arith.constant 0 : index
    %c0_3 = arith.constant 0 : index
    %2 = vector.load %arg2[%c0_2, %c0_3] : memref<4x4xf32, #tpu.memory_space<vmem>>, vector<4x4xf32>
    %cst = arith.constant dense<0.000000e+00> : vector<256x4xf32>
    %3 = tpu.matmul %1, %2, %cst {dimension_numbers = #tpu.dot_dimension_numbers<[1], [0], [0], [1], [0, 0, 1, 1], [], []>} : vector<256x4xf32>, vector<4x4xf32>, vector<256x4xf32> -> vector<256x4xf32>
    %c0_4 = arith.constant 0 : index
    %c0_5 = arith.constant 0 : index
    %4 = vector.load %arg3[%c0_4, %c0_5] : memref<1x4xf32, #tpu.memory_space<vmem>>, vector<1x4xf32>
    %5 = vector.broadcast %4 : vector<1x4xf32> to vector<256x4xf32>
    %6 = arith.addf %3, %5 : vector<256x4xf32>
    %cst_6 = arith.constant 0.000000e+00 : f32
    %7 = vector.broadcast %cst_6 : f32 to vector<256x4xf32>
    %8 = arith.maximumf %6, %7 : vector<256x4xf32>
    %c0_7 = arith.constant 0 : index
    %c0_8 = arith.constant 0 : index
    %c0_9 = arith.constant 0 : index
    %9 = vector.load %arg7[%c0_7, %c0_8, %c0_9] : memref<1x256x8xf32, #tpu.memory_space<vmem>>, vector<1x256x4xf32>
    %10 = vector.shape_cast %9 : vector<1x256x4xf32> to vector<256x4xf32>
    %11 = vector.shape_cast %8 : vector<256x4xf32> to vector<1x256x4xf32>
    tpu.vector_store %arg7[%c0_7, %c0_8, %c0_9], %11 {strides = array<i32>} : memref<1x256x8xf32, #tpu.memory_space<vmem>>, vector<1x256x4xf32>,
    %cst_10 = arith.constant 0.000000e+00 : f32
    %12 = vector.broadcast %cst_10 : f32 to vector<18x18x4xf32>
    %c0_11 = arith.constant 0 : index
    %c0_12 = arith.constant 0 : index
    %c0_13 = arith.constant 0 : index
    %13 = vector.load %arg8[%c0_11, %c0_12, %c0_13] : memref<18x18x4xf32, #tpu.memory_space<vmem>>, vector<18x18x4xf32>
    tpu.vector_store %arg8[%c0_11, %c0_12, %c0_13], %12 {strides = array<i32>} : memref<18x18x4xf32, #tpu.memory_space<vmem>>, vector<18x18x4xf32>,
    %14 = vector.extract_strided_slice %8 {offsets = [0, 0], sizes = [16, 4], strides = [1, 1]} : vector<256x4xf32> to vector<16x4xf32>
    %c1 = arith.constant 1 : index
    %c1_14 = arith.constant 1 : index
    %c0_15 = arith.constant 0 : index
    %15 = vector.load %arg8[%c1, %c1_14, %c0_15] : memref<18x18x4xf32, #tpu.memory_space<vmem>>, vector<1x16x4xf32>
    %16 = vector.shape_cast %15 : vector<1x16x4xf32> to vector<16x4xf32>
    %17 = vector.shape_cast %14 : vector<16x4xf32> to vector<1x16x4xf32>
    tpu.vector_store %arg8[%c1, %c1_14, %c0_15], %17 {strides = array<i32>} : memref<18x18x4xf32, #tpu.memory_space<vmem>>, vector<1x16x4xf32>,
    %18 = vector.extract_strided_slice %8 {offsets = [16, 0], sizes = [16, 4], strides = [1, 1]} : vector<256x4xf32> to vector<16x4xf32>
    %c2 = arith.constant 2 : index
    %c1_16 = arith.constant 1 : index
    %c0_17 = arith.constant 0 : index
    %19 = vector.load %arg8[%c2, %c1_16, %c0_17] : memref<18x18x4xf32, #tpu.memory_space<vmem>>, vector<1x16x4xf32>
    %20 = vector.shape_cast %19 : vector<1x16x4xf32> to vector<16x4xf32>
    %21 = vector.shape_cast %18 : vector<16x4xf32> to vector<1x16x4xf32>
    tpu.vector_store %arg8[%c2, %c1_16, %c0_17], %21 {strides = array<i32>} : memref<18x18x4xf32, #tpu.memory_space<vmem>>, vector<1x16x4xf32>,
    %22 = vector.extract_strided_slice %8 {offsets = [32, 0], sizes = [16, 4], strides = [1, 1]} : vector<256x4xf32> to vector<16x4xf32>
    %c3 = arith.constant 3 : index
    %c1_18 = arith.constant 1 : index
    %c0_19 = arith.constant 0 : index
    %23 = vector.load %arg8[%c3, %c1_18, %c0_19] : memref<18x18x4xf32, #tpu.memory_space<vmem>>, vector<1x16x4xf32>
    %24 = vector.shape_cast %23 : vector<1x16x4xf32> to vector<16x4xf32>
    %25 = vector.shape_cast %22 : vector<16x4xf32> to vector<1x16x4xf32>
    tpu.vector_store %arg8[%c3, %c1_18, %c0_19], %25 {strides = array<i32>} : memref<18x18x4xf32, #tpu.memory_space<vmem>>, vector<1x16x4xf32>,
    %26 = vector.extract_strided_slice %8 {offsets = [48, 0], sizes = [16, 4], strides = [1, 1]} : vector<256x4xf32> to vector<16x4xf32>
    %c4 = arith.constant 4 : index
    %c1_20 = arith.constant 1 : index
    %c0_21 = arith.constant 0 : index
    %27 = vector.load %arg8[%c4, %c1_20, %c0_21] : memref<18x18x4xf32, #tpu.memory_space<vmem>>, vector<1x16x4xf32>
    %28 = vector.shape_cast %27 : vector<1x16x4xf32> to vector<16x4xf32>
    %29 = vector.shape_cast %26 : vector<16x4xf32> to vector<1x16x4xf32>
    tpu.vector_store %arg8[%c4, %c1_20, %c0_21], %29 {strides = array<i32>} : memref<18x18x4xf32, #tpu.memory_space<vmem>>, vector<1x16x4xf32>,
    %30 = vector.extract_strided_slice %8 {offsets = [64, 0], sizes = [16, 4], strides = [1, 1]} : vector<256x4xf32> to vector<16x4xf32>
    %c5 = arith.constant 5 : index
    %c1_22 = arith.constant 1 : index
    %c0_23 = arith.constant 0 : index
    %31 = vector.load %arg8[%c5, %c1_22, %c0_23] : memref<18x18x4xf32, #tpu.memory_space<vmem>>, vector<1x16x4xf32>
    %32 = vector.shape_cast %31 : vector<1x16x4xf32> to vector<16x4xf32>
    %33 = vector.shape_cast %30 : vector<16x4xf32> to vector<1x16x4xf32>
    tpu.vector_store %arg8[%c5, %c1_22, %c0_23], %33 {strides = array<i32>} : memref<18x18x4xf32, #tpu.memory_space<vmem>>, vector<1x16x4xf32>,
    %34 = vector.extract_strided_slice %8 {offsets = [80, 0], sizes = [16, 4], strides = [1, 1]} : vector<256x4xf32> to vector<16x4xf32>
    %c6 = arith.constant 6 : index
    %c1_24 = arith.constant 1 : index
    %c0_25 = arith.constant 0 : index
    %35 = vector.load %arg8[%c6, %c1_24, %c0_25] : memref<18x18x4xf32, #tpu.memory_space<vmem>>, vector<1x16x4xf32>
    %36 = vector.shape_cast %35 : vector<1x16x4xf32> to vector<16x4xf32>
    %37 = vector.shape_cast %34 : vector<16x4xf32> to vector<1x16x4xf32>
    tpu.vector_store %arg8[%c6, %c1_24, %c0_25], %37 {strides = array<i32>} : memref<18x18x4xf32, #tpu.memory_space<vmem>>, vector<1x16x4xf32>,
    %38 = vector.extract_strided_slice %8 {offsets = [96, 0], sizes = [16, 4], strides = [1, 1]} : vector<256x4xf32> to vector<16x4xf32>
    %c7 = arith.constant 7 : index
    %c1_26 = arith.constant 1 : index
    %c0_27 = arith.constant 0 : index
    %39 = vector.load %arg8[%c7, %c1_26, %c0_27] : memref<18x18x4xf32, #tpu.memory_space<vmem>>, vector<1x16x4xf32>
    %40 = vector.shape_cast %39 : vector<1x16x4xf32> to vector<16x4xf32>
    %41 = vector.shape_cast %38 : vector<16x4xf32> to vector<1x16x4xf32>
    tpu.vector_store %arg8[%c7, %c1_26, %c0_27], %41 {strides = array<i32>} : memref<18x18x4xf32, #tpu.memory_space<vmem>>, vector<1x16x4xf32>,
    %42 = vector.extract_strided_slice %8 {offsets = [112, 0], sizes = [16, 4], strides = [1, 1]} : vector<256x4xf32> to vector<16x4xf32>
    %c8 = arith.constant 8 : index
    %c1_28 = arith.constant 1 : index
    %c0_29 = arith.constant 0 : index
    %43 = vector.load %arg8[%c8, %c1_28, %c0_29] : memref<18x18x4xf32, #tpu.memory_space<vmem>>, vector<1x16x4xf32>
    %44 = vector.shape_cast %43 : vector<1x16x4xf32> to vector<16x4xf32>
    %45 = vector.shape_cast %42 : vector<16x4xf32> to vector<1x16x4xf32>
    tpu.vector_store %arg8[%c8, %c1_28, %c0_29], %45 {strides = array<i32>} : memref<18x18x4xf32, #tpu.memory_space<vmem>>, vector<1x16x4xf32>,
    %46 = vector.extract_strided_slice %8 {offsets = [128, 0], sizes = [16, 4], strides = [1, 1]} : vector<256x4xf32> to vector<16x4xf32>
    %c9 = arith.constant 9 : index
    %c1_30 = arith.constant 1 : index
    %c0_31 = arith.constant 0 : index
    %47 = vector.load %arg8[%c9, %c1_30, %c0_31] : memref<18x18x4xf32, #tpu.memory_space<vmem>>, vector<1x16x4xf32>
    %48 = vector.shape_cast %47 : vector<1x16x4xf32> to vector<16x4xf32>
    %49 = vector.shape_cast %46 : vector<16x4xf32> to vector<1x16x4xf32>
    tpu.vector_store %arg8[%c9, %c1_30, %c0_31], %49 {strides = array<i32>} : memref<18x18x4xf32, #tpu.memory_space<vmem>>, vector<1x16x4xf32>,
    %50 = vector.extract_strided_slice %8 {offsets = [144, 0], sizes = [16, 4], strides = [1, 1]} : vector<256x4xf32> to vector<16x4xf32>
    %c10 = arith.constant 10 : index
    %c1_32 = arith.constant 1 : index
    %c0_33 = arith.constant 0 : index
    %51 = vector.load %arg8[%c10, %c1_32, %c0_33] : memref<18x18x4xf32, #tpu.memory_space<vmem>>, vector<1x16x4xf32>
    %52 = vector.shape_cast %51 : vector<1x16x4xf32> to vector<16x4xf32>
    %53 = vector.shape_cast %50 : vector<16x4xf32> to vector<1x16x4xf32>
    tpu.vector_store %arg8[%c10, %c1_32, %c0_33], %53 {strides = array<i32>} : memref<18x18x4xf32, #tpu.memory_space<vmem>>, vector<1x16x4xf32>,
    %54 = vector.extract_strided_slice %8 {offsets = [160, 0], sizes = [16, 4], strides = [1, 1]} : vector<256x4xf32> to vector<16x4xf32>
    %c11 = arith.constant 11 : index
    %c1_34 = arith.constant 1 : index
    %c0_35 = arith.constant 0 : index
    %55 = vector.load %arg8[%c11, %c1_34, %c0_35] : memref<18x18x4xf32, #tpu.memory_space<vmem>>, vector<1x16x4xf32>
    %56 = vector.shape_cast %55 : vector<1x16x4xf32> to vector<16x4xf32>
    %57 = vector.shape_cast %54 : vector<16x4xf32> to vector<1x16x4xf32>
    tpu.vector_store %arg8[%c11, %c1_34, %c0_35], %57 {strides = array<i32>} : memref<18x18x4xf32, #tpu.memory_space<vmem>>, vector<1x16x4xf32>,
    %58 = vector.extract_strided_slice %8 {offsets = [176, 0], sizes = [16, 4], strides = [1, 1]} : vector<256x4xf32> to vector<16x4xf32>
    %c12 = arith.constant 12 : index
    %c1_36 = arith.constant 1 : index
    %c0_37 = arith.constant 0 : index
    %59 = vector.load %arg8[%c12, %c1_36, %c0_37] : memref<18x18x4xf32, #tpu.memory_space<vmem>>, vector<1x16x4xf32>
    %60 = vector.shape_cast %59 : vector<1x16x4xf32> to vector<16x4xf32>
    %61 = vector.shape_cast %58 : vector<16x4xf32> to vector<1x16x4xf32>
    tpu.vector_store %arg8[%c12, %c1_36, %c0_37], %61 {strides = array<i32>} : memref<18x18x4xf32, #tpu.memory_space<vmem>>, vector<1x16x4xf32>,
    %62 = vector.extract_strided_slice %8 {offsets = [192, 0], sizes = [16, 4], strides = [1, 1]} : vector<256x4xf32> to vector<16x4xf32>
    %c13 = arith.constant 13 : index
    %c1_38 = arith.constant 1 : index
    %c0_39 = arith.constant 0 : index
    %63 = vector.load %arg8[%c13, %c1_38, %c0_39] : memref<18x18x4xf32, #tpu.memory_space<vmem>>, vector<1x16x4xf32>
    %64 = vector.shape_cast %63 : vector<1x16x4xf32> to vector<16x4xf32>
    %65 = vector.shape_cast %62 : vector<16x4xf32> to vector<1x16x4xf32>
    tpu.vector_store %arg8[%c13, %c1_38, %c0_39], %65 {strides = array<i32>} : memref<18x18x4xf32, #tpu.memory_space<vmem>>, vector<1x16x4xf32>,
    %66 = vector.extract_strided_slice %8 {offsets = [208, 0], sizes = [16, 4], strides = [1, 1]} : vector<256x4xf32> to vector<16x4xf32>
    %c14 = arith.constant 14 : index
    %c1_40 = arith.constant 1 : index
    %c0_41 = arith.constant 0 : index
    %67 = vector.load %arg8[%c14, %c1_40, %c0_41] : memref<18x18x4xf32, #tpu.memory_space<vmem>>, vector<1x16x4xf32>
    %68 = vector.shape_cast %67 : vector<1x16x4xf32> to vector<16x4xf32>
    %69 = vector.shape_cast %66 : vector<16x4xf32> to vector<1x16x4xf32>
    tpu.vector_store %arg8[%c14, %c1_40, %c0_41], %69 {strides = array<i32>} : memref<18x18x4xf32, #tpu.memory_space<vmem>>, vector<1x16x4xf32>,
    %70 = vector.extract_strided_slice %8 {offsets = [224, 0], sizes = [16, 4], strides = [1, 1]} : vector<256x4xf32> to vector<16x4xf32>
    %c15 = arith.constant 15 : index
    %c1_42 = arith.constant 1 : index
    %c0_43 = arith.constant 0 : index
    %71 = vector.load %arg8[%c15, %c1_42, %c0_43] : memref<18x18x4xf32, #tpu.memory_space<vmem>>, vector<1x16x4xf32>
    %72 = vector.shape_cast %71 : vector<1x16x4xf32> to vector<16x4xf32>
    %73 = vector.shape_cast %70 : vector<16x4xf32> to vector<1x16x4xf32>
    tpu.vector_store %arg8[%c15, %c1_42, %c0_43], %73 {strides = array<i32>} : memref<18x18x4xf32, #tpu.memory_space<vmem>>, vector<1x16x4xf32>,
    %74 = vector.extract_strided_slice %8 {offsets = [240, 0], sizes = [16, 4], strides = [1, 1]} : vector<256x4xf32> to vector<16x4xf32>
    %c16 = arith.constant 16 : index
    %c1_44 = arith.constant 1 : index
    %c0_45 = arith.constant 0 : index
    %75 = vector.load %arg8[%c16, %c1_44, %c0_45] : memref<18x18x4xf32, #tpu.memory_space<vmem>>, vector<1x16x4xf32>
    %76 = vector.shape_cast %75 : vector<1x16x4xf32> to vector<16x4xf32>
    %77 = vector.shape_cast %74 : vector<16x4xf32> to vector<1x16x4xf32>
    tpu.vector_store %arg8[%c16, %c1_44, %c0_45], %77 {strides = array<i32>} : memref<18x18x4xf32, #tpu.memory_space<vmem>>, vector<1x16x4xf32>,
    %c0_46 = arith.constant 0 : index
    %c0_47 = arith.constant 0 : index
    %c0_48 = arith.constant 0 : index
    %78 = vector.load %arg8[%c0_46, %c0_47, %c0_48] : memref<18x18x4xf32, #tpu.memory_space<vmem>>, vector<18x18x4xf32>
    %c0_49 = arith.constant 0 : index
    %c0_50 = arith.constant 0 : index
    %79 = vector.load %arg5[%c0_49, %c0_50] : memref<9x4xf32, #tpu.memory_space<vmem>>, vector<9x4xf32>
    %cst_51 = arith.constant 0.000000e+00 : f32
    %80 = vector.broadcast %cst_51 : f32 to vector<16x16x4xf32>
    %81 = vector.extract_strided_slice %78 {offsets = [0, 0, 0], sizes = [16, 16, 4], strides = [1, 1, 1]} : vector<18x18x4xf32> to vector<16x16x4xf32>
    %82 = vector.extract_strided_slice %79 {offsets = [0, 0], sizes = [1, 4], strides = [1, 1]} : vector<9x4xf32> to vector<1x4xf32>
    %83 = vector.shape_cast %82 : vector<1x4xf32> to vector<4xf32>
    %84 = vector.shape_cast %83 : vector<4xf32> to vector<1x1x4xf32>
    %85 = vector.broadcast %84 : vector<1x1x4xf32> to vector<16x16x4xf32>
    %86 = arith.mulf %81, %85 : vector<16x16x4xf32>
    %87 = arith.addf %80, %86 : vector<16x16x4xf32>
    %88 = vector.extract_strided_slice %78 {offsets = [0, 1, 0], sizes = [16, 16, 4], strides = [1, 1, 1]} : vector<18x18x4xf32> to vector<16x16x4xf32>
    %89 = vector.extract_strided_slice %79 {offsets = [1, 0], sizes = [1, 4], strides = [1, 1]} : vector<9x4xf32> to vector<1x4xf32>
    %90 = vector.shape_cast %89 : vector<1x4xf32> to vector<4xf32>
    %91 = vector.shape_cast %90 : vector<4xf32> to vector<1x1x4xf32>
    %92 = vector.broadcast %91 : vector<1x1x4xf32> to vector<16x16x4xf32>
    %93 = arith.mulf %88, %92 : vector<16x16x4xf32>
    %94 = arith.addf %87, %93 : vector<16x16x4xf32>
    %95 = vector.extract_strided_slice %78 {offsets = [0, 2, 0], sizes = [16, 16, 4], strides = [1, 1, 1]} : vector<18x18x4xf32> to vector<16x16x4xf32>
    %96 = vector.extract_strided_slice %79 {offsets = [2, 0], sizes = [1, 4], strides = [1, 1]} : vector<9x4xf32> to vector<1x4xf32>
    %97 = vector.shape_cast %96 : vector<1x4xf32> to vector<4xf32>
    %98 = vector.shape_cast %97 : vector<4xf32> to vector<1x1x4xf32>
    %99 = vector.broadcast %98 : vector<1x1x4xf32> to vector<16x16x4xf32>
    %100 = arith.mulf %95, %99 : vector<16x16x4xf32>
    %101 = arith.addf %94, %100 : vector<16x16x4xf32>
    %102 = vector.extract_strided_slice %78 {offsets = [1, 0, 0], sizes = [16, 16, 4], strides = [1, 1, 1]} : vector<18x18x4xf32> to vector<16x16x4xf32>
    %103 = vector.extract_strided_slice %79 {offsets = [3, 0], sizes = [1, 4], strides = [1, 1]} : vector<9x4xf32> to vector<1x4xf32>
    %104 = vector.shape_cast %103 : vector<1x4xf32> to vector<4xf32>
    %105 = vector.shape_cast %104 : vector<4xf32> to vector<1x1x4xf32>
    %106 = vector.broadcast %105 : vector<1x1x4xf32> to vector<16x16x4xf32>
    %107 = arith.mulf %102, %106 : vector<16x16x4xf32>
    %108 = arith.addf %101, %107 : vector<16x16x4xf32>
    %109 = vector.extract_strided_slice %78 {offsets = [1, 1, 0], sizes = [16, 16, 4], strides = [1, 1, 1]} : vector<18x18x4xf32> to vector<16x16x4xf32>
    %110 = vector.extract_strided_slice %79 {offsets = [4, 0], sizes = [1, 4], strides = [1, 1]} : vector<9x4xf32> to vector<1x4xf32>
    %111 = vector.shape_cast %110 : vector<1x4xf32> to vector<4xf32>
    %112 = vector.shape_cast %111 : vector<4xf32> to vector<1x1x4xf32>
    %113 = vector.broadcast %112 : vector<1x1x4xf32> to vector<16x16x4xf32>
    %114 = arith.mulf %109, %113 : vector<16x16x4xf32>
    %115 = arith.addf %108, %114 : vector<16x16x4xf32>
    %116 = vector.extract_strided_slice %78 {offsets = [1, 2, 0], sizes = [16, 16, 4], strides = [1, 1, 1]} : vector<18x18x4xf32> to vector<16x16x4xf32>
    %117 = vector.extract_strided_slice %79 {offsets = [5, 0], sizes = [1, 4], strides = [1, 1]} : vector<9x4xf32> to vector<1x4xf32>
    %118 = vector.shape_cast %117 : vector<1x4xf32> to vector<4xf32>
    %119 = vector.shape_cast %118 : vector<4xf32> to vector<1x1x4xf32>
    %120 = vector.broadcast %119 : vector<1x1x4xf32> to vector<16x16x4xf32>
    %121 = arith.mulf %116, %120 : vector<16x16x4xf32>
    %122 = arith.addf %115, %121 : vector<16x16x4xf32>
    %123 = vector.extract_strided_slice %78 {offsets = [2, 0, 0], sizes = [16, 16, 4], strides = [1, 1, 1]} : vector<18x18x4xf32> to vector<16x16x4xf32>
    %124 = vector.extract_strided_slice %79 {offsets = [6, 0], sizes = [1, 4], strides = [1, 1]} : vector<9x4xf32> to vector<1x4xf32>
    %125 = vector.shape_cast %124 : vector<1x4xf32> to vector<4xf32>
    %126 = vector.shape_cast %125 : vector<4xf32> to vector<1x1x4xf32>
    %127 = vector.broadcast %126 : vector<1x1x4xf32> to vector<16x16x4xf32>
    %128 = arith.mulf %123, %127 : vector<16x16x4xf32>
    %129 = arith.addf %122, %128 : vector<16x16x4xf32>
    %130 = vector.extract_strided_slice %78 {offsets = [2, 1, 0], sizes = [16, 16, 4], strides = [1, 1, 1]} : vector<18x18x4xf32> to vector<16x16x4xf32>
    %131 = vector.extract_strided_slice %79 {offsets = [7, 0], sizes = [1, 4], strides = [1, 1]} : vector<9x4xf32> to vector<1x4xf32>
    %132 = vector.shape_cast %131 : vector<1x4xf32> to vector<4xf32>
    %133 = vector.shape_cast %132 : vector<4xf32> to vector<1x1x4xf32>
    %134 = vector.broadcast %133 : vector<1x1x4xf32> to vector<16x16x4xf32>
    %135 = arith.mulf %130, %134 : vector<16x16x4xf32>
    %136 = arith.addf %129, %135 : vector<16x16x4xf32>
    %137 = vector.extract_strided_slice %78 {offsets = [2, 2, 0], sizes = [16, 16, 4], strides = [1, 1, 1]} : vector<18x18x4xf32> to vector<16x16x4xf32>
    %138 = vector.extract_strided_slice %79 {offsets = [8, 0], sizes = [1, 4], strides = [1, 1]} : vector<9x4xf32> to vector<1x4xf32>
    %139 = vector.shape_cast %138 : vector<1x4xf32> to vector<4xf32>
    %140 = vector.shape_cast %139 : vector<4xf32> to vector<1x1x4xf32>
    %141 = vector.broadcast %140 : vector<1x1x4xf32> to vector<16x16x4xf32>
    %142 = arith.mulf %137, %141 : vector<16x16x4xf32>
    %143 = arith.addf %136, %142 : vector<16x16x4xf32>
    %c0_52 = arith.constant 0 : index
    %c0_53 = arith.constant 0 : index
    %144 = vector.load %arg6[%c0_52, %c0_53] : memref<1x4xf32, #tpu.memory_space<vmem>>, vector<1x4xf32>
    %145 = vector.shape_cast %144 : vector<1x4xf32> to vector<4xf32>
    %146 = vector.shape_cast %145 : vector<4xf32> to vector<1x1x4xf32>
    %147 = vector.broadcast %146 : vector<1x1x4xf32> to vector<16x16x4xf32>
    %148 = arith.addf %143, %147 : vector<16x16x4xf32>
    %cst_54 = arith.constant 0.000000e+00 : f32
    %149 = vector.broadcast %cst_54 : f32 to vector<16x16x4xf32>
    %150 = arith.maximumf %148, %149 : vector<16x16x4xf32>
    %151 = vector.extract_strided_slice %150 {offsets = [0, 0, 0], sizes = [1, 16, 4], strides = [1, 1, 1]} : vector<16x16x4xf32> to vector<1x16x4xf32>
    %152 = vector.shape_cast %151 : vector<1x16x4xf32> to vector<16x4xf32>
    %c0_55 = arith.constant 0 : index
    %c0_56 = arith.constant 0 : index
    %c4_57 = arith.constant 4 : index
    %153 = vector.load %arg7[%c0_55, %c0_56, %c4_57] : memref<1x256x8xf32, #tpu.memory_space<vmem>>, vector<1x16x4xf32>
    %154 = vector.shape_cast %153 : vector<1x16x4xf32> to vector<16x4xf32>
    %155 = vector.shape_cast %152 : vector<16x4xf32> to vector<1x16x4xf32>
    tpu.vector_store %arg7[%c0_55, %c0_56, %c4_57], %155 {strides = array<i32>} : memref<1x256x8xf32, #tpu.memory_space<vmem>>, vector<1x16x4xf32>,
    %156 = vector.extract_strided_slice %150 {offsets = [1, 0, 0], sizes = [1, 16, 4], strides = [1, 1, 1]} : vector<16x16x4xf32> to vector<1x16x4xf32>
    %157 = vector.shape_cast %156 : vector<1x16x4xf32> to vector<16x4xf32>
    %c0_58 = arith.constant 0 : index
    %c16_59 = arith.constant 16 : index
    %c4_60 = arith.constant 4 : index
    %158 = vector.load %arg7[%c0_58, %c16_59, %c4_60] : memref<1x256x8xf32, #tpu.memory_space<vmem>>, vector<1x16x4xf32>
    %159 = vector.shape_cast %158 : vector<1x16x4xf32> to vector<16x4xf32>
    %160 = vector.shape_cast %157 : vector<16x4xf32> to vector<1x16x4xf32>
    tpu.vector_store %arg7[%c0_58, %c16_59, %c4_60], %160 {strides = array<i32>} : memref<1x256x8xf32, #tpu.memory_space<vmem>>, vector<1x16x4xf32>,
    %161 = vector.extract_strided_slice %150 {offsets = [2, 0, 0], sizes = [1, 16, 4], strides = [1, 1, 1]} : vector<16x16x4xf32> to vector<1x16x4xf32>
    %162 = vector.shape_cast %161 : vector<1x16x4xf32> to vector<16x4xf32>
    %c0_61 = arith.constant 0 : index
    %c32 = arith.constant 32 : index
    %c4_62 = arith.constant 4 : index
    %163 = vector.load %arg7[%c0_61, %c32, %c4_62] : memref<1x256x8xf32, #tpu.memory_space<vmem>>, vector<1x16x4xf32>
    %164 = vector.shape_cast %163 : vector<1x16x4xf32> to vector<16x4xf32>
    %165 = vector.shape_cast %162 : vector<16x4xf32> to vector<1x16x4xf32>
    tpu.vector_store %arg7[%c0_61, %c32, %c4_62], %165 {strides = array<i32>} : memref<1x256x8xf32, #tpu.memory_space<vmem>>, vector<1x16x4xf32>,
    %166 = vector.extract_strided_slice %150 {offsets = [3, 0, 0], sizes = [1, 16, 4], strides = [1, 1, 1]} : vector<16x16x4xf32> to vector<1x16x4xf32>
    %167 = vector.shape_cast %166 : vector<1x16x4xf32> to vector<16x4xf32>
    %c0_63 = arith.constant 0 : index
    %c48 = arith.constant 48 : index
    %c4_64 = arith.constant 4 : index
    %168 = vector.load %arg7[%c0_63, %c48, %c4_64] : memref<1x256x8xf32, #tpu.memory_space<vmem>>, vector<1x16x4xf32>
    %169 = vector.shape_cast %168 : vector<1x16x4xf32> to vector<16x4xf32>
    %170 = vector.shape_cast %167 : vector<16x4xf32> to vector<1x16x4xf32>
    tpu.vector_store %arg7[%c0_63, %c48, %c4_64], %170 {strides = array<i32>} : memref<1x256x8xf32, #tpu.memory_space<vmem>>, vector<1x16x4xf32>,
    %171 = vector.extract_strided_slice %150 {offsets = [4, 0, 0], sizes = [1, 16, 4], strides = [1, 1, 1]} : vector<16x16x4xf32> to vector<1x16x4xf32>
    %172 = vector.shape_cast %171 : vector<1x16x4xf32> to vector<16x4xf32>
    %c0_65 = arith.constant 0 : index
    %c64 = arith.constant 64 : index
    %c4_66 = arith.constant 4 : index
    %173 = vector.load %arg7[%c0_65, %c64, %c4_66] : memref<1x256x8xf32, #tpu.memory_space<vmem>>, vector<1x16x4xf32>
    %174 = vector.shape_cast %173 : vector<1x16x4xf32> to vector<16x4xf32>
    %175 = vector.shape_cast %172 : vector<16x4xf32> to vector<1x16x4xf32>
    tpu.vector_store %arg7[%c0_65, %c64, %c4_66], %175 {strides = array<i32>} : memref<1x256x8xf32, #tpu.memory_space<vmem>>, vector<1x16x4xf32>,
    %176 = vector.extract_strided_slice %150 {offsets = [5, 0, 0], sizes = [1, 16, 4], strides = [1, 1, 1]} : vector<16x16x4xf32> to vector<1x16x4xf32>
    %177 = vector.shape_cast %176 : vector<1x16x4xf32> to vector<16x4xf32>
    %c0_67 = arith.constant 0 : index
    %c80 = arith.constant 80 : index
    %c4_68 = arith.constant 4 : index
    %178 = vector.load %arg7[%c0_67, %c80, %c4_68] : memref<1x256x8xf32, #tpu.memory_space<vmem>>, vector<1x16x4xf32>
    %179 = vector.shape_cast %178 : vector<1x16x4xf32> to vector<16x4xf32>
    %180 = vector.shape_cast %177 : vector<16x4xf32> to vector<1x16x4xf32>
    tpu.vector_store %arg7[%c0_67, %c80, %c4_68], %180 {strides = array<i32>} : memref<1x256x8xf32, #tpu.memory_space<vmem>>, vector<1x16x4xf32>,
    %181 = vector.extract_strided_slice %150 {offsets = [6, 0, 0], sizes = [1, 16, 4], strides = [1, 1, 1]} : vector<16x16x4xf32> to vector<1x16x4xf32>
    %182 = vector.shape_cast %181 : vector<1x16x4xf32> to vector<16x4xf32>
    %c0_69 = arith.constant 0 : index
    %c96 = arith.constant 96 : index
    %c4_70 = arith.constant 4 : index
    %183 = vector.load %arg7[%c0_69, %c96, %c4_70] : memref<1x256x8xf32, #tpu.memory_space<vmem>>, vector<1x16x4xf32>
    %184 = vector.shape_cast %183 : vector<1x16x4xf32> to vector<16x4xf32>
    %185 = vector.shape_cast %182 : vector<16x4xf32> to vector<1x16x4xf32>
    tpu.vector_store %arg7[%c0_69, %c96, %c4_70], %185 {strides = array<i32>} : memref<1x256x8xf32, #tpu.memory_space<vmem>>, vector<1x16x4xf32>,
    %186 = vector.extract_strided_slice %150 {offsets = [7, 0, 0], sizes = [1, 16, 4], strides = [1, 1, 1]} : vector<16x16x4xf32> to vector<1x16x4xf32>
    %187 = vector.shape_cast %186 : vector<1x16x4xf32> to vector<16x4xf32>
    %c0_71 = arith.constant 0 : index
    %c112 = arith.constant 112 : index
    %c4_72 = arith.constant 4 : index
    %188 = vector.load %arg7[%c0_71, %c112, %c4_72] : memref<1x256x8xf32, #tpu.memory_space<vmem>>, vector<1x16x4xf32>
    %189 = vector.shape_cast %188 : vector<1x16x4xf32> to vector<16x4xf32>
    %190 = vector.shape_cast %187 : vector<16x4xf32> to vector<1x16x4xf32>
    tpu.vector_store %arg7[%c0_71, %c112, %c4_72], %190 {strides = array<i32>} : memref<1x256x8xf32, #tpu.memory_space<vmem>>, vector<1x16x4xf32>,
    %191 = vector.extract_strided_slice %150 {offsets = [8, 0, 0], sizes = [1, 16, 4], strides = [1, 1, 1]} : vector<16x16x4xf32> to vector<1x16x4xf32>
    %192 = vector.shape_cast %191 : vector<1x16x4xf32> to vector<16x4xf32>
    %c0_73 = arith.constant 0 : index
    %c128 = arith.constant 128 : index
    %c4_74 = arith.constant 4 : index
    %193 = vector.load %arg7[%c0_73, %c128, %c4_74] : memref<1x256x8xf32, #tpu.memory_space<vmem>>, vector<1x16x4xf32>
    %194 = vector.shape_cast %193 : vector<1x16x4xf32> to vector<16x4xf32>
    %195 = vector.shape_cast %192 : vector<16x4xf32> to vector<1x16x4xf32>
    tpu.vector_store %arg7[%c0_73, %c128, %c4_74], %195 {strides = array<i32>} : memref<1x256x8xf32, #tpu.memory_space<vmem>>, vector<1x16x4xf32>,
    %196 = vector.extract_strided_slice %150 {offsets = [9, 0, 0], sizes = [1, 16, 4], strides = [1, 1, 1]} : vector<16x16x4xf32> to vector<1x16x4xf32>
    %197 = vector.shape_cast %196 : vector<1x16x4xf32> to vector<16x4xf32>
    %c0_75 = arith.constant 0 : index
    %c144 = arith.constant 144 : index
    %c4_76 = arith.constant 4 : index
    %198 = vector.load %arg7[%c0_75, %c144, %c4_76] : memref<1x256x8xf32, #tpu.memory_space<vmem>>, vector<1x16x4xf32>
    %199 = vector.shape_cast %198 : vector<1x16x4xf32> to vector<16x4xf32>
    %200 = vector.shape_cast %197 : vector<16x4xf32> to vector<1x16x4xf32>
    tpu.vector_store %arg7[%c0_75, %c144, %c4_76], %200 {strides = array<i32>} : memref<1x256x8xf32, #tpu.memory_space<vmem>>, vector<1x16x4xf32>,
    %201 = vector.extract_strided_slice %150 {offsets = [10, 0, 0], sizes = [1, 16, 4], strides = [1, 1, 1]} : vector<16x16x4xf32> to vector<1x16x4xf32>
    %202 = vector.shape_cast %201 : vector<1x16x4xf32> to vector<16x4xf32>
    %c0_77 = arith.constant 0 : index
    %c160 = arith.constant 160 : index
    %c4_78 = arith.constant 4 : index
    %203 = vector.load %arg7[%c0_77, %c160, %c4_78] : memref<1x256x8xf32, #tpu.memory_space<vmem>>, vector<1x16x4xf32>
    %204 = vector.shape_cast %203 : vector<1x16x4xf32> to vector<16x4xf32>
    %205 = vector.shape_cast %202 : vector<16x4xf32> to vector<1x16x4xf32>
    tpu.vector_store %arg7[%c0_77, %c160, %c4_78], %205 {strides = array<i32>} : memref<1x256x8xf32, #tpu.memory_space<vmem>>, vector<1x16x4xf32>,
    %206 = vector.extract_strided_slice %150 {offsets = [11, 0, 0], sizes = [1, 16, 4], strides = [1, 1, 1]} : vector<16x16x4xf32> to vector<1x16x4xf32>
    %207 = vector.shape_cast %206 : vector<1x16x4xf32> to vector<16x4xf32>
    %c0_79 = arith.constant 0 : index
    %c176 = arith.constant 176 : index
    %c4_80 = arith.constant 4 : index
    %208 = vector.load %arg7[%c0_79, %c176, %c4_80] : memref<1x256x8xf32, #tpu.memory_space<vmem>>, vector<1x16x4xf32>
    %209 = vector.shape_cast %208 : vector<1x16x4xf32> to vector<16x4xf32>
    %210 = vector.shape_cast %207 : vector<16x4xf32> to vector<1x16x4xf32>
    tpu.vector_store %arg7[%c0_79, %c176, %c4_80], %210 {strides = array<i32>} : memref<1x256x8xf32, #tpu.memory_space<vmem>>, vector<1x16x4xf32>,
    %211 = vector.extract_strided_slice %150 {offsets = [12, 0, 0], sizes = [1, 16, 4], strides = [1, 1, 1]} : vector<16x16x4xf32> to vector<1x16x4xf32>
    %212 = vector.shape_cast %211 : vector<1x16x4xf32> to vector<16x4xf32>
    %c0_81 = arith.constant 0 : index
    %c192 = arith.constant 192 : index
    %c4_82 = arith.constant 4 : index
    %213 = vector.load %arg7[%c0_81, %c192, %c4_82] : memref<1x256x8xf32, #tpu.memory_space<vmem>>, vector<1x16x4xf32>
    %214 = vector.shape_cast %213 : vector<1x16x4xf32> to vector<16x4xf32>
    %215 = vector.shape_cast %212 : vector<16x4xf32> to vector<1x16x4xf32>
    tpu.vector_store %arg7[%c0_81, %c192, %c4_82], %215 {strides = array<i32>} : memref<1x256x8xf32, #tpu.memory_space<vmem>>, vector<1x16x4xf32>,
    %216 = vector.extract_strided_slice %150 {offsets = [13, 0, 0], sizes = [1, 16, 4], strides = [1, 1, 1]} : vector<16x16x4xf32> to vector<1x16x4xf32>
    %217 = vector.shape_cast %216 : vector<1x16x4xf32> to vector<16x4xf32>
    %c0_83 = arith.constant 0 : index
    %c208 = arith.constant 208 : index
    %c4_84 = arith.constant 4 : index
    %218 = vector.load %arg7[%c0_83, %c208, %c4_84] : memref<1x256x8xf32, #tpu.memory_space<vmem>>, vector<1x16x4xf32>
    %219 = vector.shape_cast %218 : vector<1x16x4xf32> to vector<16x4xf32>
    %220 = vector.shape_cast %217 : vector<16x4xf32> to vector<1x16x4xf32>
    tpu.vector_store %arg7[%c0_83, %c208, %c4_84], %220 {strides = array<i32>} : memref<1x256x8xf32, #tpu.memory_space<vmem>>, vector<1x16x4xf32>,
    %221 = vector.extract_strided_slice %150 {offsets = [14, 0, 0], sizes = [1, 16, 4], strides = [1, 1, 1]} : vector<16x16x4xf32> to vector<1x16x4xf32>
    %222 = vector.shape_cast %221 : vector<1x16x4xf32> to vector<16x4xf32>
    %c0_85 = arith.constant 0 : index
    %c224 = arith.constant 224 : index
    %c4_86 = arith.constant 4 : index
    %223 = vector.load %arg7[%c0_85, %c224, %c4_86] : memref<1x256x8xf32, #tpu.memory_space<vmem>>, vector<1x16x4xf32>
    %224 = vector.shape_cast %223 : vector<1x16x4xf32> to vector<16x4xf32>
    %225 = vector.shape_cast %222 : vector<16x4xf32> to vector<1x16x4xf32>
    tpu.vector_store %arg7[%c0_85, %c224, %c4_86], %225 {strides = array<i32>} : memref<1x256x8xf32, #tpu.memory_space<vmem>>, vector<1x16x4xf32>,
    %226 = vector.extract_strided_slice %150 {offsets = [15, 0, 0], sizes = [1, 16, 4], strides = [1, 1, 1]} : vector<16x16x4xf32> to vector<1x16x4xf32>
    %227 = vector.shape_cast %226 : vector<1x16x4xf32> to vector<16x4xf32>
    %c0_87 = arith.constant 0 : index
    %c240 = arith.constant 240 : index
    %c4_88 = arith.constant 4 : index
    %228 = vector.load %arg7[%c0_87, %c240, %c4_88] : memref<1x256x8xf32, #tpu.memory_space<vmem>>, vector<1x16x4xf32>
    %229 = vector.shape_cast %228 : vector<1x16x4xf32> to vector<16x4xf32>
    %230 = vector.shape_cast %227 : vector<16x4xf32> to vector<1x16x4xf32>
    tpu.vector_store %arg7[%c0_87, %c240, %c4_88], %230 {strides = array<i32>} : memref<1x256x8xf32, #tpu.memory_space<vmem>>, vector<1x16x4xf32>,
    return
  }
  func.func @transform_0(%arg0: i32) -> (i32, i32, i32) {
    %c0_i32 = arith.constant 0 : i32
    %c0_i32_0 = arith.constant 0 : i32
    %c0_i32_1 = arith.constant 0 : i32
    return %arg0, %c0_i32, %c0_i32_0 : i32, i32, i32
  }
  func.func @transform_1(%arg0: i32) -> (i32, i32) {
    %c0_i32 = arith.constant 0 : i32
    %c0_i32_0 = arith.constant 0 : i32
    %c0_i32_1 = arith.constant 0 : i32
    return %c0_i32, %c0_i32_0 : i32, i32
  }
  func.func @transform_2(%arg0: i32) -> (i32, i32) {
    %c0_i32 = arith.constant 0 : i32
    %c0_i32_0 = arith.constant 0 : i32
    %c0_i32_1 = arith.constant 0 : i32
    return %c0_i32, %c0_i32_0 : i32, i32
  }
  func.func @transform_3(%arg0: i32) -> (i32, i32) {
    %c0_i32 = arith.constant 0 : i32
    %c0_i32_0 = arith.constant 0 : i32
    %c0_i32_1 = arith.constant 0 : i32
    return %c0_i32, %c0_i32_0 : i32, i32
  }
  func.func @transform_4(%arg0: i32) -> (i32, i32) {
    %c0_i32 = arith.constant 0 : i32
    %c0_i32_0 = arith.constant 0 : i32
    %c0_i32_1 = arith.constant 0 : i32
    return %c0_i32, %c0_i32_0 : i32, i32
  }
  func.func @transform_5(%arg0: i32) -> (i32, i32) {
    %c0_i32 = arith.constant 0 : i32
    %c0_i32_0 = arith.constant 0 : i32
    %c0_i32_1 = arith.constant 0 : i32
    return %c0_i32, %c0_i32_0 : i32, i32
  }
  func.func @transform_6(%arg0: i32) -> (i32, i32, i32) {
    %c0_i32 = arith.constant 0 : i32
    %c0_i32_0 = arith.constant 0 : i32
    %c0_i32_1 = arith.constant 0 : i32
    return %arg0, %c0_i32, %c0_i32_0 : i32, i32, i32
  }
}

</mosaic_0001>

<bundles_post_ra>
// kernel: ghost_module.1
= control target key start
LH: loop header
LB: loop body
LE: loop exit
PB: predicated region body
PF: predicated region fallthrough
CT: control target
= control target key end

     0   :  { %s2998_s21 = smov 0   ;;  %s5225_s0 = inlined_call_operand.vmem [shape: f32[2,256,4], index: 0, kind: input, shape index: {}]   ;;  %s5226_s1 = inlined_call_operand.vmem [shape: f32[4,4], index: 1, kind: input, shape index: {}]   ;;  %s5227_s2 = inlined_call_operand.vmem [shape: f32[1,4], index: 2, kind: input, shape index: {}]   ;;  %s5228_s3 = inlined_call_operand.vmem [shape: f32[4,4], index: 3, kind: input, shape index: {}]   ;;  %s5229_s4 = inlined_call_operand.vmem [shape: f32[9,4], index: 4, kind: input, shape index: {}]   ;;  %s5230_s5 = inlined_call_operand.vmem [shape: f32[1,4], index: 5, kind: input, shape index: {}]   ;;  %s5231_s6 = inlined_call_operand.vmem [shape: f32[2,256,8], index: 6, kind: output, shape index: {}]  }
   0x1 LB: > { %s2798_s3 = sadd.s32 4294967295, %s2959_s21   ;;  %p2802_p0 = scmp.ge.s32.totalorder %s2959_s21, 1  ;;  %s2959_s21 = sphi %s2998_s21, %s16_s21  }
   0x2   : > { %p212_p1 = scmp.lt.s32.totalorder %s2959_s21, 3 }
   0x4   : > { %p213_p2 = pnand %p2802_p0, %p212_p1 }
   0x6   : > { %216 = sbr.rel (%p213_p2) target bundleno = 661 (0x295), region = 44 }
   0xb   : > { %v284_v0 = vld [vmem:[%s5226_s1] sm:$0xf]  ;;  %vm389_vm0 = vcmask 1043456   ;;  %p242_p3 = scmp.lt.s32.totalorder %s2798_s3, 1  ;;  %vm292_vm1 = vcmask 31744   ;;  %vm684_vm2 = vcmask 25600   ;;  %v841_v34 = vlaneseq }
   0xc   : > { %2880 = vmatprep.subr.msk.mxu0 %vm389_vm0, %v284_v0  ;;  %2930 = vmatprep.subr.msk.mxu1 %vm389_vm0, %v284_v0  ;;  %v2961_v33 = vmov 0.0   ;;  %v3143_v37 = vld [vmem:[%s5229_s4] sm:$0xff]  ;;  %vm1009_vm3 = vcmask 1046528   ;;  %vm1254_vm4 = vcmask 1045504   ;;  %s2962_s15 = smov 4   ;;  %vm2590_vm5 = vcmask 64544  }
   0xd   : > { %2881 = vmatpush3.msk.msra.mxu0 %vm389_vm0, %v284_v0  ;;  %s5308_s3 = smov (!%p242_p3, %s2798_s3), 1  ;;  %2931 = vmatpush3.msk.msra.mxu1 %vm389_vm0, %v284_v0  ;;  %687 = vst.msk [vmem:[#allocation2 + $0x20] sm:$0xff] %vm292_vm1, %v2961_v33  ;;  %682 = vst.msk [vmem:[#allocation2] sm:$0xff] %vm292_vm1, %v2961_v33  ;;  %v3137_v35 = vshrl.u32 %v841_v34, 7  ;;  %v3158_v47 = vld [vmem:[%s5227_s2] ss:$0 sm:$0xff] }
   0xe   : > { %s2845_s24 = sshll.u32 %s5308_s3, 8  ;;  %688 = vst.msk [vmem:[#allocation2 + $0x28] sm:$0x3] %vm684_vm2, %v2961_v33  ;;  %685 = vst.msk [vmem:[#allocation2 + $0x10] sm:$0x3] %vm684_vm2, %v2961_v33 }
   0xf   : > { %s3017_s27 = scalar_lea.vmem %s5225_s0, %s2845_s24  ;;  %683 = vst.msk [vmem:[#allocation2 + $0x8] sm:$0xff] %vm292_vm1, %v2961_v33  ;;  %686 = vst.msk [vmem:[#allocation2 + $0x18] sm:$0xff] %vm292_vm1, %v2961_v33  ;;  %v911_v36 = vsub.s32 1, %v3137_v35  ;;  %v1156_v39 = vsub.s32 2, %v3137_v35  ;;  %v843_v42 = vsub.s32 0, %v3137_v35  ;;  %v1469_v58 = vsub.s32 4, %v3137_v35  ;;  %s3176_s10 = scalar_lea.vmem %s5231_s6, %s2845_s24 }
  0x10   : > { %v252_v1 = vld [vmem:[%s3017_s27] sm:$0xff]  ;;  %v253_v2 = vld [vmem:[%s3017_s27 + $0x8] sm:$0xff]  ;;  %v254_v5 = vld [vmem:[%s3017_s27 + $0x10] sm:$0xff]  ;;  %689 = vst.msk [vmem:[#allocation2 + $0x30] sm:$0xff] %vm292_vm1, %v2961_v33  ;;  %v1713_v62 = vsub.s32 5, %v3137_v35 }
  0x11   : > { %v268_v3 = vld [vmem:[%s3017_s27 + $0x80] sm:$0xff]  ;;  %2882 = vmatprep.mubr.msk.f32.mxu0 %vm292_vm1, %v252_v1  ;;  %v269_v4 = vld [vmem:[%s3017_s27 + $0x88] sm:$0xff]  ;;  %v270_v6 = vld [vmem:[%s3017_s27 + $0x90] sm:$0xff]  ;;  %690 = vst.msk [vmem:[#allocation2 + $0x38] sm:$0xff] %vm292_vm1, %v2961_v33  ;;  %v3146_v38 = vrot.slane %v3143_v37, %v911_v36  ;;  %v3153_v46 = vrot.slane %v3143_v37, %v1156_v39  ;;  %v3161_v48 = vrot.slane %v3143_v37, %v843_v42 }
  0x12   : > { %2906 = vmatprep.mubr.msk.f32.mxu1 %vm292_vm1, %v268_v3  ;;  %2883 = vmatmul.mubr.msk.f32.vlgmr.msra.gmra.mxu0 %vm292_vm1, %v253_v2  ;;  %v255_v7 = vld [vmem:[%s3017_s27 + $0x18] sm:$0xff]  ;;  %v256_v9 = vld [vmem:[%s3017_s27 + $0x20] sm:$0xff]  ;;  %v257_v11 = vld [vmem:[%s3017_s27 + $0x28] sm:$0xff]  ;;  %691 = vst.msk [vmem:[#allocation2 + $0x40] sm:$0x3] %vm684_vm2, %v2961_v33  ;;  %v3216_v39 = vrot.slane %v3143_v37, %v1469_v58 }
  0x13   : > { %2907 = vmatmul.mubr.msk.f32.vlgmr.msra.gmra.mxu1 %vm292_vm1, %v269_v4  ;;  %2885 = vmatprep.mubr.msk.f32.mxu0 %vm292_vm1, %v254_v5  ;;  %v271_v8 = vld [vmem:[%s3017_s27 + $0x98] sm:$0xff]  ;;  %v272_v10 = vld [vmem:[%s3017_s27 + $0xa0] sm:$0xff]  ;;  %v273_v12 = vld [vmem:[%s3017_s27 + $0xa8] sm:$0xff]  ;;  %692 = vst.msk [vmem:[#allocation2 + $0x48] sm:$0xff] %vm292_vm1, %v2961_v33 }
  0x14   : > { %2909 = vmatprep.mubr.msk.f32.mxu1 %vm292_vm1, %v270_v6  ;;  %v258_v13 = vld [vmem:[%s3017_s27 + $0x30] sm:$0xff]  ;;  %v259_v15 = vld [vmem:[%s3017_s27 + $0x38] sm:$0xff]  ;;  %v260_v17 = vld [vmem:[%s3017_s27 + $0x40] sm:$0xff]  ;;  %693 = vst.msk [vmem:[#allocation2 + $0x50] sm:$0xff] %vm292_vm1, %v2961_v33 }
  0x15   : > { %v274_v14 = vld [vmem:[%s3017_s27 + $0xb0] sm:$0xff]  ;;  %v275_v16 = vld [vmem:[%s3017_s27 + $0xb8] sm:$0xff]  ;;  %v276_v18 = vld [vmem:[%s3017_s27 + $0xc0] sm:$0xff]  ;;  %694 = vst.msk [vmem:[#allocation2 + $0x58] sm:$0x3] %vm684_vm2, %v2961_v33 }
  0x16   : > { %2886 = vmatmul.mubr.msk.f32.gmra.mxu0 %vm292_vm1, %v255_v7  ;;  %v261_v19 = vld [vmem:[%s3017_s27 + $0x48] sm:$0xff]  ;;  %v262_v21 = vld [vmem:[%s3017_s27 + $0x50] sm:$0xff]  ;;  %v263_v23 = vld [vmem:[%s3017_s27 + $0x58] sm:$0xff]  ;;  %695 = vst.msk [vmem:[#allocation2 + $0x60] sm:$0xff] %vm292_vm1, %v2961_v33 }
  0x17   : > { %2910 = vmatmul.mubr.msk.f32.gmra.mxu1 %vm292_vm1, %v271_v8  ;;  %2888 = vmatprep.mubr.msk.f32.mxu0 %vm292_vm1, %v256_v9  ;;  %v277_v20 = vld [vmem:[%s3017_s27 + $0xc8] sm:$0xff]  ;;  %v278_v22 = vld [vmem:[%s3017_s27 + $0xd0] sm:$0xff]  ;;  %v279_v24 = vld [vmem:[%s3017_s27 + $0xd8] sm:$0xff]  ;;  %696 = vst.msk [vmem:[#allocation2 + $0x68] sm:$0xff] %vm292_vm1, %v2961_v33 }
  0x18   : > { %2912 = vmatprep.mubr.msk.f32.mxu1 %vm292_vm1, %v272_v10  ;;  %v264_v25 = vld [vmem:[%s3017_s27 + $0x60] sm:$0xff]  ;;  %v265_v27 = vld [vmem:[%s3017_s27 + $0x68] sm:$0xff]  ;;  %v266_v29 = vld [vmem:[%s3017_s27 + $0x70] sm:$0xff]  ;;  %697 = vst.msk [vmem:[#allocation2 + $0x70] sm:$0x3] %vm684_vm2, %v2961_v33 }
  0x19   : > { %v280_v26 = vld [vmem:[%s3017_s27 + $0xe0] sm:$0xff]  ;;  %v281_v28 = vld [vmem:[%s3017_s27 + $0xe8] sm:$0xff]  ;;  %v282_v30 = vld [vmem:[%s3017_s27 + $0xf0] sm:$0xff]  ;;  %698 = vst.msk [vmem:[#allocation2 + $0x78] sm:$0xff] %vm292_vm1, %v2961_v33 }
  0x1a   : > { %2889 = vmatmul.mubr.msk.f32.gmra.mxu0 %vm292_vm1, %v257_v11  ;;  %v267_v31 = vld [vmem:[%s3017_s27 + $0x78] sm:$0xff]  ;;  %699 = vst.msk [vmem:[#allocation2 + $0x80] sm:$0xff] %vm292_vm1, %v2961_v33  ;;  %701 = vst.msk [vmem:[#allocation2 + $0x90] sm:$0xff] %vm292_vm1, %v2961_v33  ;;  %v785_v40 = vld [vmem:[#allocation2] sm:$0xff] }
  0x1b   : > { %2913 = vmatmul.mubr.msk.f32.gmra.mxu1 %vm292_vm1, %v273_v12  ;;  %2891 = vmatprep.mubr.msk.f32.mxu0 %vm292_vm1, %v258_v13  ;;  %v283_v32 = vld [vmem:[%s3017_s27 + $0xf8] sm:$0xff]  ;;  %700 = vst.msk [vmem:[#allocation2 + $0x88] sm:$0x3] %vm684_vm2, %v2961_v33  ;;  %703 = vst.msk [vmem:[#allocation2 + $0xa0] sm:$0x3] %vm684_vm2, %v2961_v33  ;;  %v786_v41 = vld [vmem:[#allocation2 + $0x8] sm:$0xff]  ;;  %v913_v44 = vmul.f32 %v3146_v38, %v785_v40  ;;  %v1158_v54 = vmul.f32 %v3153_v46, %v785_v40 }
  0x1c   : > { %2915 = vmatprep.mubr.msk.f32.mxu1 %vm292_vm1, %v274_v14  ;;  %702 = vst.msk [vmem:[#allocation2 + $0x98] sm:$0xff] %vm292_vm1, %v2961_v33  ;;  %704 = vst.msk [vmem:[#allocation2 + $0xa8] sm:$0xff] %vm292_vm1, %v2961_v33  ;;  %v787_v43 = vld [vmem:[#allocation2 + $0x10] sm:$0x3]  ;;  %v914_v45 = vmul.f32 %v3146_v38, %v786_v41  ;;  %v3166_v55 = vmul.f32 %v3153_v46, %v786_v41  ;;  %v845_v61 = vmul.f32 %v3161_v48, %v785_v40 }
  0x1d   : > { %705 = vst.msk [vmem:[#allocation2 + $0xb0] sm:$0xff] %vm292_vm1, %v2961_v33  ;;  %707 = vst.msk [vmem:[#allocation2 + $0xc0] sm:$0xff] %vm292_vm1, %v2961_v33  ;;  %v915_v49 = vmul.f32 %v3146_v38, %v787_v43  ;;  %v1010_v52 = vrot.slane %v913_v44, 1  ;;  %v1160_v0 = vmul.f32 %v3153_v46, %v787_v43  ;;  %v1255_v8 = vrot.slane %v1158_v54, 2 }
  0x1e   : > { %2892 = vmatmul.mubr.msk.f32.gmra.mxu0 %vm292_vm1, %v259_v15  ;;  %706 = vst.msk [vmem:[#allocation2 + $0xb8] sm:$0x3] %vm684_vm2, %v2961_v33  ;;  %709 = vst.msk [vmem:[#allocation2 + $0xd0] sm:$0x3] %vm684_vm2, %v2961_v33  ;;  %v1011_v53 = vrot.slane %v914_v45, 1  ;;  %v1256_v9 = vrot.slane %v3166_v55, 2 }
  0x1f   : > { %2916 = vmatmul.mubr.msk.f32.gmra.mxu1 %vm292_vm1, %v275_v16  ;;  %2894 = vmatprep.mubr.msk.f32.mxu0 %vm292_vm1, %v260_v17  ;;  %708 = vst.msk [vmem:[#allocation2 + $0xc8] sm:$0xff] %vm292_vm1, %v2961_v33  ;;  %710 = vst.msk [vmem:[#allocation2 + $0xd8] sm:$0xff] %vm292_vm1, %v2961_v33  ;;  %v1013_v63 = vrot.slane %v915_v49, 1  ;;  %v1401_v16 = vsub.s32 3, %v3137_v35  ;;  %v846_v17 = vmul.f32 %v3161_v48, %v786_v41 }
  0x20   : > { %2918 = vmatprep.mubr.msk.f32.mxu1 %vm292_vm1, %v276_v18  ;;  %711 = vst.msk [vmem:[#allocation2 + $0xe0] sm:$0xff] %vm292_vm1, %v2961_v33  ;;  %713 = vst.msk [vmem:[#allocation2 + $0xf0] sm:$0xff] %vm292_vm1, %v2961_v33  ;;  %v1012_v7 = vsel %vm1009_vm3, %v1010_v52, %v1011_v53 }
  0x21   : > { %712 = vst.msk [vmem:[#allocation2 + $0xe8] sm:$0x3] %vm684_vm2, %v2961_v33  ;;  %715 = vst.msk [vmem:[#allocation2 + $0x100] sm:$0x3] %vm684_vm2, %v2961_v33  ;;  %v1014_v18 = vsel %vm1009_vm3, %v1011_v53, %v1013_v63  ;;  %v3231_v52 = vrot.slane %v3143_v37, %v1401_v16 }
  0x22   : > { %2895 = vmatmul.mubr.msk.f32.gmra.mxu0 %vm292_vm1, %v261_v19  ;;  %714 = vst.msk [vmem:[#allocation2 + $0xf8] sm:$0xff] %vm292_vm1, %v2961_v33  ;;  %716 = vst.msk [vmem:[#allocation2 + $0x108] sm:$0xff] %vm292_vm1, %v2961_v33  ;;  %v1258_v19 = vrot.slane %v1160_v0, 2  ;;  %v1123_v40 = vadd.f32 %v1014_v18, %v846_v17 }
  0x23   : > { %2919 = vmatmul.mubr.msk.f32.gmra.mxu1 %vm292_vm1, %v277_v20  ;;  %2897 = vmatprep.mubr.msk.f32.mxu0 %vm292_vm1, %v262_v21  ;;  %717 = vst.msk [vmem:[#allocation2 + $0x110] sm:$0xff] %vm292_vm1, %v2961_v33  ;;  %719 = vst.msk [vmem:[#allocation2 + $0x120] sm:$0xff] %vm292_vm1, %v2961_v33 }
  0x24   : > { %2921 = vmatprep.mubr.msk.f32.mxu1 %vm292_vm1, %v278_v22  ;;  %718 = vst.msk [vmem:[#allocation2 + $0x118] sm:$0x3] %vm684_vm2, %v2961_v33  ;;  %721 = vst.msk [vmem:[#allocation2 + $0x130] sm:$0x3] %vm684_vm2, %v2961_v33  ;;  %v1259_v41 = vsel %vm1254_vm4, %v1256_v9, %v1258_v19 }
  0x25   : > { %720 = vst.msk [vmem:[#allocation2 + $0x128] sm:$0xff] %vm292_vm1, %v2961_v33  ;;  %722 = vst.msk [vmem:[#allocation2 + $0x138] sm:$0xff] %vm292_vm1, %v2961_v33 }
  0x26   : > { %2898 = vmatmul.mubr.msk.f32.gmra.mxu0 %vm292_vm1, %v263_v23  ;;  %723 = vst.msk [vmem:[#allocation2 + $0x140] sm:$0xff] %vm292_vm1, %v2961_v33  ;;  %725 = vst.msk [vmem:[#allocation2 + $0x150] sm:$0xff] %vm292_vm1, %v2961_v33 }
  0x27   : > { %2922 = vmatmul.mubr.msk.f32.gmra.mxu1 %vm292_vm1, %v279_v24  ;;  %2900 = vmatprep.mubr.msk.f32.mxu0 %vm292_vm1, %v264_v25  ;;  %724 = vst.msk [vmem:[#allocation2 + $0x148] sm:$0x3] %vm684_vm2, %v2961_v33  ;;  %727 = vst.msk [vmem:[#allocation2 + $0x160] sm:$0x3] %vm684_vm2, %v2961_v33 }
  0x28   : > { %2924 = vmatprep.mubr.msk.f32.mxu1 %vm292_vm1, %v280_v26  ;;  %726 = vst.msk [vmem:[#allocation2 + $0x158] sm:$0xff] %vm292_vm1, %v2961_v33  ;;  %728 = vst.msk [vmem:[#allocation2 + $0x168] sm:$0xff] %vm292_vm1, %v2961_v33  ;;  %v1122_v26 = vadd.f32 %v1012_v7, %v845_v61 }
  0x29   : > { %729 = vst.msk [vmem:[#allocation2 + $0x170] sm:$0xff] %vm292_vm1, %v2961_v33  ;;  %731 = vst.msk [vmem:[#allocation2 + $0x180] sm:$0xff] %vm292_vm1, %v2961_v33 }
  0x2a   : > { %2901 = vmatmul.mubr.msk.f32.gmra.mxu0 %vm292_vm1, %v265_v27  ;;  %730 = vst.msk [vmem:[#allocation2 + $0x178] sm:$0x3] %vm684_vm2, %v2961_v33  ;;  %733 = vst.msk [vmem:[#allocation2 + $0x190] sm:$0x3] %vm684_vm2, %v2961_v33  ;;  %v1257_v27 = vsel %vm1254_vm4, %v1255_v8, %v1256_v9 }
  0x2b   : > { %2925 = vmatmul.mubr.msk.f32.gmra.mxu1 %vm292_vm1, %v281_v28  ;;  %2903 = vmatprep.mubr.msk.f32.mxu0 %vm292_vm1, %v266_v29  ;;  %732 = vst.msk [vmem:[#allocation2 + $0x188] sm:$0xff] %vm292_vm1, %v2961_v33  ;;  %734 = vst.msk [vmem:[#allocation2 + $0x198] sm:$0xff] %vm292_vm1, %v2961_v33  ;;  %v1957_v28 = vsub.s32 6, %v3137_v35  ;;  %v2025_v29 = vsub.s32 7, %v3137_v35  ;;  %v3219_v35 = vrot.slane %v3143_v37, %v1713_v62 }
  0x2c   : > { %2927 = vmatprep.mubr.msk.f32.mxu1 %vm292_vm1, %v282_v30  ;;  %735 = vst.msk [vmem:[#allocation2 + $0x1a0] sm:$0xff] %vm292_vm1, %v2961_v33  ;;  %v3251_v62 = vadd.f32 %v1259_v41, %v1123_v40 }
  0x2d   : > { %736 = vst.msk [vmem:[#allocation2 + $0x1a8] sm:$0x3] %vm684_vm2, %v2961_v33  ;;  %v3234_v53 = vrot.slane %v3143_v37, %v1957_v28  ;;  %v3237_v54 = vrot.slane %v3143_v37, %v2025_v29  ;;  %v3313_v29 = vld [vmem:[%s5229_s4 + $0x8] ss:$0 sm:$0xff] }
  0x2e   : > { %2904 = vmatmul.mubr.msk.f32.gmra.mxu0 %vm292_vm1, %v267_v31 }
  0x2f   : > { %2928 = vmatmul.mubr.msk.f32.gmra.mxu1 %vm292_vm1, %v283_v32 }
  0xd2   : > { %v2884_v50 = vpop.f32.mrf.mxu0 }
  0xd3   : > { %v2908_v51 = vpop.f32.mrf.mxu1  ;;  %v465_v56 = vadd.f32 %v2884_v50, %v3158_v47 }
  0xd4   : > { %v545_v57 = vadd.f32 %v2908_v51, %v3158_v47  ;;  %v459_v59 = vpop.f32.mrf.mxu0  ;;  %v1367_v51 = vadd.f32 %v1257_v27, %v1122_v26 }
  0xd5   : > { %v539_v60 = vpop.f32.mrf.mxu1  ;;  %v619_v1 = vmax.f32 %v465_v56, 0.0  ;;  %v460_v2 = vadd.f32 %v3158_v47, %v459_v59 }
  0xd6   : > { %v635_v3 = vmax.f32 %v545_v57, 0.0  ;;  %v540_v4 = vadd.f32 %v3158_v47, %v539_v60  ;;  %v2887_v5 = vpop.f32.mrf.mxu0 }
  0xd7   : > { %v2911_v6 = vpop.f32.mrf.mxu1  ;;  %651 = vst.msk [vmem:[%s3176_s10 + $0x8] sm:$0xff] %vm292_vm1, %v619_v1  ;;  %739 = vst.msk [vmem:[#allocation2 + $0x21] sm:$0xff] %vm292_vm1, %v619_v1  ;;  %v618_v10 = vmax.f32 %v460_v2, 0.0  ;;  %v475_v11 = vadd.f32 %v2887_v5, %v3158_v47 }
  0xd8   : > { %667 = vst.msk [vmem:[%s3176_s10 + $0x88] sm:$0xff] %vm292_vm1, %v635_v3  ;;  %763 = vst.msk [vmem:[#allocation2 + $0xe1] sm:$0xff] %vm292_vm1, %v635_v3  ;;  %v634_v12 = vmax.f32 %v540_v4, 0.0  ;;  %v555_v13 = vadd.f32 %v2911_v6, %v3158_v47  ;;  %v469_v14 = vpop.f32.mrf.mxu0 }
  0xd9   : > { %v549_v15 = vpop.f32.mrf.mxu1  ;;  %650 = vst.msk [vmem:[%s3176_s10] sm:$0xff] %vm292_vm1, %v618_v10  ;;  %738 = vst.msk [vmem:[#allocation2 + $0x19] sm:$0xff] %vm292_vm1, %v618_v10  ;;  %v621_v20 = vmax.f32 %v475_v11, 0.0  ;;  %v470_v21 = vadd.f32 %v3158_v47, %v469_v14 }
  0xda   : > { %666 = vst.msk [vmem:[%s3176_s10 + $0x80] sm:$0xff] %vm292_vm1, %v634_v12  ;;  %762 = vst.msk [vmem:[#allocation2 + $0xd9] sm:$0xff] %vm292_vm1, %v634_v12  ;;  %v637_v22 = vmax.f32 %v555_v13, 0.0  ;;  %v550_v23 = vadd.f32 %v3158_v47, %v549_v15  ;;  %v2890_v24 = vpop.f32.mrf.mxu0 }
  0xdb   : > { %v2914_v25 = vpop.f32.mrf.mxu1  ;;  %653 = vst.msk [vmem:[%s3176_s10 + $0x18] sm:$0xff] %vm292_vm1, %v621_v20  ;;  %742 = vst.msk [vmem:[#allocation2 + $0x39] sm:$0xff] %vm292_vm1, %v621_v20  ;;  %v620_v30 = vmax.f32 %v470_v21, 0.0  ;;  %v485_v31 = vadd.f32 %v2890_v24, %v3158_v47 }
  0xdc   : > { %669 = vst.msk [vmem:[%s3176_s10 + $0x98] sm:$0xff] %vm292_vm1, %v637_v22  ;;  %766 = vst.msk [vmem:[#allocation2 + $0xf9] sm:$0xff] %vm292_vm1, %v637_v22  ;;  %v636_v32 = vmax.f32 %v550_v23, 0.0  ;;  %v565_v33 = vadd.f32 %v2914_v25, %v3158_v47  ;;  %v479_v34 = vpop.f32.mrf.mxu0 }
  0xdd   : > { %v559_v36 = vpop.f32.mrf.mxu1  ;;  %652 = vst.msk [vmem:[%s3176_s10 + $0x10] sm:$0xff] %vm292_vm1, %v620_v30  ;;  %741 = vst.msk [vmem:[#allocation2 + $0x31] sm:$0xff] %vm292_vm1, %v620_v30  ;;  %v623_v42 = vmax.f32 %v485_v31, 0.0  ;;  %v480_v43 = vadd.f32 %v3158_v47, %v479_v34 }
  0xde   : > { %668 = vst.msk [vmem:[%s3176_s10 + $0x90] sm:$0xff] %vm292_vm1, %v636_v32  ;;  %765 = vst.msk [vmem:[#allocation2 + $0xf1] sm:$0xff] %vm292_vm1, %v636_v32  ;;  %v639_v44 = vmax.f32 %v565_v33, 0.0  ;;  %v560_v45 = vadd.f32 %v3158_v47, %v559_v36  ;;  %v2893_v49 = vpop.f32.mrf.mxu0  ;;  %v3239_v55 = vld [vmem:[#allocation2 + $0x28] sm:$0x3] }
  0xdf   : > { %v2917_v50 = vpop.f32.mrf.mxu1  ;;  %655 = vst.msk [vmem:[%s3176_s10 + $0x28] sm:$0xff] %vm292_vm1, %v623_v42  ;;  %745 = vst.msk [vmem:[#allocation2 + $0x51] sm:$0xff] %vm292_vm1, %v623_v42  ;;  %v622_v56 = vmax.f32 %v480_v43, 0.0  ;;  %v495_v57 = vadd.f32 %v2893_v49, %v3158_v47  ;;  %v3255_v63 = vmul.f32 %v3216_v39, %v3239_v55  ;;  %v3259_v0 = vmul.f32 %v3219_v35, %v3239_v55 }
  0xe0   : > { %671 = vst.msk [vmem:[%s3176_s10 + $0xa8] sm:$0xff] %vm292_vm1, %v639_v44  ;;  %769 = vst.msk [vmem:[#allocation2 + $0x111] sm:$0xff] %vm292_vm1, %v639_v44  ;;  %v638_v58 = vmax.f32 %v560_v45, 0.0  ;;  %v575_v59 = vadd.f32 %v2917_v50, %v3158_v47  ;;  %v489_v37 = vpop.f32.mrf.mxu0  ;;  %v3249_v61 = vld [vmem:[#allocation2 + $0x18] sm:$0xff]  ;;  %v3263_v1 = vmul.f32 %v3146_v38, %v3239_v55  ;;  %v3273_v6 = vld [vmem:[#allocation2 + $0x20] sm:$0xff] }
  0xe1   : > { %v569_v60 = vpop.f32.mrf.mxu1  ;;  %654 = vst.msk [vmem:[%s3176_s10 + $0x20] sm:$0xff] %vm292_vm1, %v622_v56  ;;  %744 = vst.msk [vmem:[#allocation2 + $0x49] sm:$0xff] %vm292_vm1, %v622_v56  ;;  %v625_v2 = vmax.f32 %v495_v57, 0.0  ;;  %v490_v3 = vadd.f32 %v3158_v47, %v489_v37  ;;  %v1403_v9 = vmul.f32 %v3231_v52, %v3249_v61  ;;  %v1471_v10 = vmul.f32 %v3216_v39, %v3249_v61 }
  0xe2   : > { %670 = vst.msk [vmem:[%s3176_s10 + $0xa0] sm:$0xff] %vm292_vm1, %v638_v58  ;;  %768 = vst.msk [vmem:[#allocation2 + $0x109] sm:$0xff] %vm292_vm1, %v638_v58  ;;  %v641_v4 = vmax.f32 %v575_v59, 0.0  ;;  %v570_v5 = vadd.f32 %v3158_v47, %v569_v60  ;;  %v2896_v7 = vpop.f32.mrf.mxu0  ;;  %v3281_v11 = vmul.f32 %v3216_v39, %v3273_v6  ;;  %v1715_v12 = vmul.f32 %v3219_v35, %v3249_v61 }
  0xe3   : > { %v2920_v8 = vpop.f32.mrf.mxu1  ;;  %657 = vst.msk [vmem:[%s3176_s10 + $0x38] sm:$0xff] %vm292_vm1, %v625_v2  ;;  %748 = vst.msk [vmem:[#allocation2 + $0x69] sm:$0xff] %vm292_vm1, %v625_v2  ;;  %v624_v13 = vmax.f32 %v490_v3, 0.0  ;;  %v505_v14 = vadd.f32 %v2896_v7, %v3158_v47  ;;  %v1435_v20 = vadd.f32 %v1403_v9, %v1367_v51  ;;  %v1567_v21 = vrot.slane %v1471_v10, 1 }
  0xe4   : > { %673 = vst.msk [vmem:[%s3176_s10 + $0xb8] sm:$0xff] %vm292_vm1, %v641_v4  ;;  %772 = vst.msk [vmem:[#allocation2 + $0x129] sm:$0xff] %vm292_vm1, %v641_v4  ;;  %v640_v15 = vmax.f32 %v570_v5, 0.0  ;;  %v585_v16 = vadd.f32 %v2920_v8, %v3158_v47  ;;  %v499_v17 = vpop.f32.mrf.mxu0  ;;  %v3293_v19 = vld [vmem:[#allocation2 + $0x30] sm:$0xff]  ;;  %v1568_v22 = vrot.slane %v3281_v11, 1  ;;  %v3298_v23 = vmul.f32 %v3219_v35, %v3273_v6  ;;  %v3308_v28 = vld [vmem:[#allocation2 + $0x38] sm:$0xff] }
  0xe5   : > { %v579_v18 = vpop.f32.mrf.mxu1  ;;  %656 = vst.msk [vmem:[%s3176_s10 + $0x30] sm:$0xff] %vm292_vm1, %v624_v13  ;;  %747 = vst.msk [vmem:[#allocation2 + $0x61] sm:$0xff] %vm292_vm1, %v624_v13  ;;  %v627_v24 = vmax.f32 %v505_v14, 0.0  ;;  %v500_v25 = vadd.f32 %v3158_v47, %v499_v17  ;;  %v1811_v32 = vrot.slane %v1715_v12, 2  ;;  %v1959_v34 = vmul.f32 %v3234_v53, %v3293_v19 }
  0xe6   : > { %672 = vst.msk [vmem:[%s3176_s10 + $0xb0] sm:$0xff] %vm292_vm1, %v640_v15  ;;  %771 = vst.msk [vmem:[#allocation2 + $0x121] sm:$0xff] %vm292_vm1, %v640_v15  ;;  %v643_v26 = vmax.f32 %v585_v16, 0.0  ;;  %v580_v27 = vadd.f32 %v3158_v47, %v579_v18  ;;  %v2899_v30 = vpop.f32.mrf.mxu0  ;;  %v1569_v31 = vsel %vm1009_vm3, %v1567_v21, %v1568_v22  ;;  %v1812_v33 = vrot.slane %v3298_v23, 2  ;;  %v3365_v21 = vld [vmem:[#allocation2 + $0x40] sm:$0x3] }
  0xe7   : > { %v2923_v36 = vpop.f32.mrf.mxu1  ;;  %659 = vst.msk [vmem:[%s3176_s10 + $0x48] sm:$0xff] %vm292_vm1, %v627_v24  ;;  %751 = vst.msk [vmem:[#allocation2 + $0x81] sm:$0xff] %vm292_vm1, %v627_v24  ;;  %v626_v40 = vmax.f32 %v500_v25, 0.0  ;;  %v515_v41 = vadd.f32 %v2899_v30, %v3158_v47  ;;  %v1679_v43 = vadd.f32 %v1569_v31, %v1435_v20  ;;  %v2027_v49 = vmul.f32 %v3237_v54, %v3293_v19 }
  0xe8   : > { %675 = vst.msk [vmem:[%s3176_s10 + $0xc8] sm:$0xff] %vm292_vm1, %v643_v26  ;;  %775 = vst.msk [vmem:[#allocation2 + $0x141] sm:$0xff] %vm292_vm1, %v643_v26  ;;  %v642_v42 = vmax.f32 %v580_v27, 0.0  ;;  %v509_v44 = vpop.f32.mrf.mxu0  ;;  %v1813_v45 = vsel %vm1254_vm4, %v1811_v32, %v1812_v33  ;;  %v3335_v50 = vmul.f32 %v3237_v54, %v3308_v28  ;;  %v2271_v51 = vmul.f32 %v3313_v29, %v3293_v19  ;;  %v3375_v27 = vld [vmem:[%s5230_s5] ss:$0 sm:$0xff] }
  0xe9   : > { %658 = vst.msk [vmem:[%s3176_s10 + $0x40] sm:$0xff] %vm292_vm1, %v626_v40  ;;  %750 = vst.msk [vmem:[#allocation2 + $0x79] sm:$0xff] %vm292_vm1, %v626_v40  ;;  %v629_v56 = vmax.f32 %v515_v41, 0.0  ;;  %v510_v57 = vadd.f32 %v3158_v47, %v509_v44  ;;  %v1923_v58 = vadd.f32 %v1813_v45, %v1679_v43  ;;  %v3348_v59 = vmul.f32 %v3313_v29, %v3308_v28  ;;  %v589_v37 = vpop.f32.mrf.mxu1 }
  0xea   : > { %674 = vst.msk [vmem:[%s3176_s10 + $0xc0] sm:$0xff] %vm292_vm1, %v642_v42  ;;  %774 = vst.msk [vmem:[#allocation2 + $0x139] sm:$0xff] %vm292_vm1, %v642_v42  ;;  %v2902_v60 = vpop.f32.mrf.mxu0  ;;  %v2123_v2 = vrot.slane %v2027_v49, 1  ;;  %v2124_v3 = vrot.slane %v3335_v50, 1  ;;  %v2367_v4 = vrot.slane %v2271_v51, 2  ;;  %v595_v5 = vadd.f32 %v2923_v36, %v3158_v47 }
  0xeb   : > { %661 = vst.msk [vmem:[%s3176_s10 + $0x58] sm:$0xff] %vm292_vm1, %v629_v56  ;;  %754 = vst.msk [vmem:[#allocation2 + $0x99] sm:$0xff] %vm292_vm1, %v629_v56  ;;  %v628_v7 = vmax.f32 %v510_v57, 0.0  ;;  %v525_v8 = vadd.f32 %v2902_v60, %v3158_v47  ;;  %v1991_v9 = vadd.f32 %v1959_v34, %v1923_v58  ;;  %v2368_v10 = vrot.slane %v3348_v59, 2 }
  0xec   : > { %v519_v12 = vpop.f32.mrf.mxu0  ;;  %v2125_v13 = vsel %vm1009_vm3, %v2123_v2, %v2124_v3  ;;  %v645_v14 = vmax.f32 %v595_v5, 0.0  ;;  %v590_v15 = vadd.f32 %v3158_v47, %v589_v37  ;;  %v1404_v16 = vmul.f32 %v3231_v52, %v3273_v6 }
  0xed   : > { %660 = vst.msk [vmem:[%s3176_s10 + $0x50] sm:$0xff] %vm292_vm1, %v628_v7  ;;  %753 = vst.msk [vmem:[#allocation2 + $0x91] sm:$0xff] %vm292_vm1, %v628_v7  ;;  %v631_v17 = vmax.f32 %v525_v8, 0.0  ;;  %v520_v18 = vadd.f32 %v3158_v47, %v519_v12  ;;  %v2235_v20 = vadd.f32 %v2125_v13, %v1991_v9  ;;  %v3369_v24 = vmul.f32 %v3153_v46, %v3239_v55 }
  0xee   : > { %v2905_v25 = vpop.f32.mrf.mxu0  ;;  %v2369_v26 = vsel %vm1254_vm4, %v2367_v4, %v2368_v10  ;;  %677 = vst.msk [vmem:[%s3176_s10 + $0xd8] sm:$0xff] %vm292_vm1, %v645_v14  ;;  %778 = vst.msk [vmem:[#allocation2 + $0x159] sm:$0xff] %vm292_vm1, %v645_v14  ;;  %v644_v30 = vmax.f32 %v590_v15, 0.0  ;;  %v1436_v31 = vadd.f32 %v1404_v16, %v3251_v62  ;;  %v1570_v55 = vrot.slane %v3255_v63, 1 }
  0xef   : > { %663 = vst.msk [vmem:[%s3176_s10 + $0x68] sm:$0xff] %vm292_vm1, %v631_v17  ;;  %757 = vst.msk [vmem:[#allocation2 + $0xb1] sm:$0xff] %vm292_vm1, %v631_v17  ;;  %v630_v32 = vmax.f32 %v520_v18, 0.0  ;;  %v535_v34 = vadd.f32 %v2905_v25, %v3158_v47  ;;  %v2479_v36 = vadd.f32 %v2369_v26, %v2235_v20  ;;  %v1814_v40 = vrot.slane %v3259_v0, 2  ;;  %v3448_v25 = vld [vmem:[#allocation2 + $0x48] sm:$0xff]  ;;  %v3450_v26 = vld [vmem:[#allocation2 + $0x50] sm:$0xff] }
  0xf0   : > { %v529_v41 = vpop.f32.mrf.mxu0  ;;  %676 = vst.msk [vmem:[%s3176_s10 + $0xd0] sm:$0xff] %vm292_vm1, %v644_v30  ;;  %777 = vst.msk [vmem:[#allocation2 + $0x151] sm:$0xff] %vm292_vm1, %v644_v30  ;;  %v1571_v62 = vsel %vm1009_vm3, %v1568_v22, %v1570_v55  ;;  %v1960_v63 = vmul.f32 %v3234_v53, %v3308_v28  ;;  %v2029_v42 = vmul.f32 %v3237_v54, %v3365_v21 }
  0xf1   : > { %v2273_v43 = vmul.f32 %v3313_v29, %v3365_v21  ;;  %662 = vst.msk [vmem:[%s3176_s10 + $0x60] sm:$0xff] %vm292_vm1, %v630_v32  ;;  %756 = vst.msk [vmem:[#allocation2 + $0xa9] sm:$0xff] %vm292_vm1, %v630_v32  ;;  %v633_v0 = vmax.f32 %v535_v34, 0.0  ;;  %v530_v44 = vadd.f32 %v3158_v47, %v529_v41  ;;  %v2518_v11 = vadd.f32 %v3375_v27, %v2479_v36  ;;  %v812_v32 = vld [vmem:[#allocation2 + $0xd8] sm:$0xff] }
  0xf2   : > { %v1680_v22 = vadd.f32 %v1571_v62, %v1436_v31  ;;  %v1815_v45 = vsel %vm1254_vm4, %v1812_v33, %v1814_v40  ;;  %v2126_v49 = vrot.slane %v2029_v42, 1  ;;  %v916_v51 = vmul.f32 %v3146_v38, %v3249_v61  ;;  %v3466_v62 = vld [vmem:[#allocation2 + $0xe0] sm:$0xff] }
  0xf3   : > { %v2370_v50 = vrot.slane %v2273_v43, 2  ;;  %665 = vst.msk [vmem:[%s3176_s10 + $0x78] sm:$0xff] %vm292_vm1, %v633_v0  ;;  %760 = vst.msk [vmem:[#allocation2 + $0xc9] sm:$0xff] %vm292_vm1, %v633_v0  ;;  %v632_v56 = vmax.f32 %v530_v44, 0.0  ;;  %v2550_v57 = vmax.f32 %v2518_v11, 0.0  ;;  %v3414_v59 = vmul.f32 %v3146_v38, %v3273_v6 }
  0xf4   : > { %v1924_v58 = vadd.f32 %v1815_v45, %v1680_v22  ;;  %v2127_v23 = vsel %vm1009_vm3, %v2124_v3, %v2126_v49  ;;  %v847_v33 = vmul.f32 %v3161_v48, %v3249_v61  ;;  %v1015_v37 = vrot.slane %v916_v51, 1 }
  0xf5   : > { %v1161_v60 = vmul.f32 %v3153_v46, %v3249_v61  ;;  %664 = vst.msk [vmem:[%s3176_s10 + $0x70] sm:$0xff] %vm292_vm1, %v632_v56  ;;  %759 = vst.msk [vmem:[#allocation2 + $0xc1] sm:$0xff] %vm292_vm1, %v632_v56  ;;  %2584 = vrot.lane.b32.xlu0 %v2550_v57, %s2962_s15  ;;  %v2371_v4 = vsel %vm1254_vm4, %v2368_v10, %v2370_v50  ;;  %v1016_v5 = vrot.slane %v3414_v59, 1  ;;  %v3483_v56 = vld [vmem:[#allocation2 + $0xf0] sm:$0xff] }
  0xf6   : > { %v1992_v2 = vadd.f32 %v1960_v63, %v1924_v58  ;;  %v3429_v3 = vmul.f32 %v3153_v46, %v3273_v6  ;;  %v1474_v61 = vmul.f32 %v3216_v39, %v3293_v19  ;;  %v3435_v8 = vmul.f32 %v3216_v39, %v3308_v28 }
  0xf7   : > { %v1260_v7 = vrot.slane %v1161_v60, 2  ;;  %v1718_v9 = vmul.f32 %v3219_v35, %v3293_v19  ;;  %v1017_v10 = vsel %vm1009_vm3, %v1015_v37, %v1016_v5  ;;  %v3445_v14 = vmul.f32 %v3219_v35, %v3308_v28 }
  0xf8   : > { %v2236_v12 = vadd.f32 %v2127_v23, %v1992_v2  ;;  %v1261_v13 = vrot.slane %v3429_v3, 2  ;;  %v1124_v15 = vadd.f32 %v1017_v10, %v847_v33  ;;  %v1572_v16 = vrot.slane %v1474_v61, 1  ;;  %v3486_v23 = vld [vmem:[#allocation2 + $0xf8] sm:$0xff] }
  0xf9   : > { %v1573_v17 = vrot.slane %v3435_v8, 1  ;;  %v1816_v18 = vrot.slane %v1718_v9, 2  ;;  %v1405_v31 = vmul.f32 %v3231_v52, %v3293_v19  ;;  %v1817_v55 = vrot.slane %v3445_v14, 2 }
  0xfa   : > { %v2480_v20 = vadd.f32 %v2371_v4, %v2236_v12  ;;  %v1262_v30 = vsel %vm1254_vm4, %v1260_v7, %v1261_v13  ;;  %v1961_v36 = vmul.f32 %v3234_v53, %v3448_v25  ;;  %v2030_v40 = vmul.f32 %v3237_v54, %v3448_v25 }
  0xfb   : > { %v1369_v34 = vadd.f32 %v1262_v30, %v1124_v15  ;;  %v3464_v41 = vmul.f32 %v3237_v54, %v3450_v26  ;;  %v1574_v42 = vsel %vm1009_vm3, %v1572_v16, %v1573_v17  ;;  %v2274_v43 = vmul.f32 %v3313_v29, %v3448_v25  ;;  %v3508_v16 = vld [vmem:[#allocation2 + $0x108] sm:$0xff] }
  0xfc   : > { %v2519_v63 = vadd.f32 %v3375_v27, %v2480_v20  ;;  %v3476_v0 = vmul.f32 %v3313_v29, %v3450_v26  ;;  %v1818_v11 = vsel %vm1254_vm4, %v1816_v18, %v1817_v55  ;;  %v2128_v22 = vrot.slane %v2030_v40, 1  ;;  %v3510_v18 = vld [vmem:[#allocation2 + $0x110] sm:$0xff] }
  0xfd   : > { %v1437_v44 = vadd.f32 %v1405_v31, %v1369_v34  ;;  %v2129_v45 = vrot.slane %v3464_v41, 1  ;;  %v2372_v50 = vrot.slane %v2274_v43, 2  ;;  %v940_v57 = vmul.f32 %v3146_v38, %v812_v32 }
  0xfe   : > { %v2551_v49 = vmax.f32 %v2519_v63, 0.0  ;;  %v2373_v51 = vrot.slane %v3476_v0, 2  ;;  %v863_v33 = vmul.f32 %v3161_v48, %v812_v32  ;;  %v3491_v37 = vmul.f32 %v3146_v38, %v3466_v62 }
  0xff   : > { %v1681_v58 = vadd.f32 %v1574_v42, %v1437_v44  ;;  %v1185_v60 = vmul.f32 %v3153_v46, %v812_v32  ;;  %v2130_v2 = vsel %vm1009_vm3, %v2128_v22, %v2129_v45  ;;  %v1055_v7 = vrot.slane %v940_v57, 1 }
 0x100   : > { %2586 = vrot.lane.b32.xlu0 %v2551_v49, %s2962_s15  ;;  %v2374_v4 = vsel %vm1254_vm4, %v2372_v50, %v2373_v51  ;;  %v3503_v61 = vmul.f32 %v3153_v46, %v3466_v62  ;;  %v1056_v12 = vrot.slane %v3491_v37, 1  ;;  %v1498_v15 = vmul.f32 %v3216_v39, %v3483_v56 }
 0x101   : > { %v1925_v9 = vadd.f32 %v1818_v11, %v1681_v58  ;;  %v1300_v10 = vrot.slane %v1185_v60, 2  ;;  %v3515_v30 = vmul.f32 %v3216_v39, %v3486_v23  ;;  %v1742_v31 = vmul.f32 %v3219_v35, %v3483_v56 }
 0x102   : > { %v5232_v20 = vrot.slane %v3503_v61, 2  ;;  %v3521_v32 = vmul.f32 %v3219_v35, %v3486_v23  ;;  %v1057_v40 = vsel %vm1009_vm3, %v1055_v7, %v1056_v12  ;;  %v1421_v63 = vmul.f32 %v3231_v52, %v3483_v56 }
 0x103   : > { %v1993_v34 = vadd.f32 %v1961_v36, %v1925_v9  ;;  %v1612_v42 = vrot.slane %v1498_v15, 1  ;;  %v1140_v43 = vadd.f32 %v1057_v40, %v863_v33  ;;  %v1613_v11 = vrot.slane %v3515_v30, 1 }
 0x104   : > { %v1302_v44 = vsel %vm1254_vm4, %v1300_v10, %v5232_v20  ;;  %v1856_v22 = vrot.slane %v1742_v31, 2  ;;  %v1857_v50 = vrot.slane %v3521_v32, 2  ;;  %v2054_v36 = vmul.f32 %v3237_v54, %v3508_v16  ;;  %v2926_v31 = vpop.f32.mrf.mxu1 }
 0x105   : > { %v2237_v49 = vadd.f32 %v2130_v2, %v1993_v34  ;;  %v3537_v57 = vmul.f32 %v3237_v54, %v3510_v18  ;;  %v1385_v58 = vadd.f32 %v1302_v44, %v1140_v43  ;;  %v1977_v33 = vmul.f32 %v3234_v53, %v3508_v16 }
 0x106   : > { %v2298_v60 = vmul.f32 %v3313_v29, %v3508_v16  ;;  %v3545_v7 = vmul.f32 %v3313_v29, %v3510_v18  ;;  %v1614_v9 = vsel %vm1009_vm3, %v1612_v42, %v1613_v11  ;;  %v2168_v10 = vrot.slane %v2054_v36, 1 }
 0x107   : > { %v2481_v2 = vadd.f32 %v2374_v4, %v2237_v49  ;;  %v2169_v15 = vrot.slane %v3537_v57, 1  ;;  %v1453_v34 = vadd.f32 %v1421_v63, %v1385_v58  ;;  %v605_v44 = vadd.f32 %v2926_v31, %v3158_v47 }
 0x108   : > { %v2412_v40 = vrot.slane %v2298_v60, 2  ;;  %v2413_v43 = vrot.slane %v3545_v7, 2  ;;  %v1858_v4 = vsel %vm1254_vm4, %v1856_v22, %v1857_v50  ;;  %v1018_v49 = vrot.slane %v3263_v1, 1  ;;  %v599_v1 = vpop.f32.mrf.mxu1 }
 0x109   : > { %v2520_v20 = vadd.f32 %v3375_v27, %v2481_v2  ;;  %v2170_v42 = vsel %vm1009_vm3, %v2168_v10, %v2169_v15  ;;  %v1697_v36 = vadd.f32 %v1614_v9, %v1453_v34  ;;  %v647_v58 = vmax.f32 %v605_v44, 0.0  ;;  %v3575_v34 = vld [vmem:[#allocation2 + $0x58] sm:$0x3] }
 0x10a   : > { %v2414_v63 = vsel %vm1254_vm4, %v2412_v40, %v2413_v43  ;;  %v848_v60 = vmul.f32 %v3161_v48, %v3273_v6  ;;  %v1019_v22 = vsel %vm1009_vm3, %v1016_v5, %v1018_v49  ;;  %v1263_v31 = vrot.slane %v3369_v24, 2 }
 0x10b   : > { %v2552_v2 = vmax.f32 %v2520_v20, 0.0  ;;  %v1476_v10 = vmul.f32 %v3216_v39, %v3365_v21  ;;  %v1941_v9 = vadd.f32 %v1858_v4, %v1697_v36  ;;  %679 = vst.msk [vmem:[%s3176_s10 + $0xe8] sm:$0xff] %vm292_vm1, %v647_v58  ;;  %781 = vst.msk [vmem:[#allocation2 + $0x171] sm:$0xff] %vm292_vm1, %v647_v58  ;;  %v1406_v6 = vmul.f32 %v3231_v52, %v3308_v28 }
 0x10c   : > { %v1125_v40 = vadd.f32 %v1019_v22, %v848_v60  ;;  %v1720_v59 = vmul.f32 %v3219_v35, %v3365_v21  ;;  %v1264_v24 = vsel %vm1254_vm4, %v1261_v13, %v1263_v31  ;;  %v2032_v20 = vmul.f32 %v3237_v54, %v3575_v34 }
 0x10d   : > { %2595 = vrot.lane.b32.xlu1 %v2552_v2, %s2962_s15  ;;  %v1575_v5 = vrot.slane %v1476_v10, 1  ;;  %v2276_v44 = vmul.f32 %v3313_v29, %v3575_v34  ;;  %v2009_v4 = vadd.f32 %v1977_v33, %v1941_v9  ;;  %v600_v58 = vadd.f32 %v3158_v47, %v599_v1 }
 0x10e   : > { %v1370_v49 = vadd.f32 %v1264_v24, %v1125_v40  ;;  %v1819_v36 = vrot.slane %v1720_v59, 2  ;;  %v1962_v3 = vmul.f32 %v3234_v53, %v3450_v26  ;;  %v2131_v13 = vrot.slane %v2032_v20, 1 }
 0x10f   : > { %v1576_v60 = vsel %vm1009_vm3, %v1573_v17, %v1575_v5  ;;  %v2375_v2 = vrot.slane %v2276_v44, 2  ;;  %v2253_v22 = vadd.f32 %v2170_v42, %v2009_v4  ;;  %v646_v10 = vmax.f32 %v600_v58, 0.0 }
 0x110   : > { %v1438_v31 = vadd.f32 %v1406_v6, %v1370_v49  ;;  %v849_v33 = vmul.f32 %v3161_v48, %v3293_v19  ;;  %v1820_v9 = vsel %vm1254_vm4, %v1817_v55, %v1819_v36  ;;  %v2132_v8 = vsel %vm1009_vm3, %v2129_v45, %v2131_v13  ;;  %v3639_v13 = vld [vmem:[#allocation2 + $0x68] sm:$0xff] }
 0x111   : > { %v919_v17 = vmul.f32 %v3146_v38, %v3293_v19  ;;  %v3607_v1 = vmul.f32 %v3146_v38, %v3308_v28  ;;  %v2497_v42 = vadd.f32 %v2414_v63, %v2253_v22  ;;  %678 = vst.msk [vmem:[%s3176_s10 + $0xe0] sm:$0xff] %vm292_vm1, %v646_v10  ;;  %780 = vst.msk [vmem:[#allocation2 + $0x169] sm:$0xff] %vm292_vm1, %v646_v10 }
 0x112   : > { %v1682_v40 = vadd.f32 %v1576_v60, %v1438_v31  ;;  %v1164_v14 = vmul.f32 %v3153_v46, %v3293_v19  ;;  %v3616_v55 = vmul.f32 %v3153_v46, %v3308_v28  ;;  %v2376_v41 = vsel %vm1254_vm4, %v2373_v51, %v2375_v2  ;;  %v3637_v60 = vld [vmem:[#allocation2 + $0x60] sm:$0xff] }
 0x113   : > { %v1020_v45 = vrot.slane %v919_v17, 1  ;;  %v1021_v6 = vrot.slane %v3607_v1, 1  ;;  %v1477_v63 = vmul.f32 %v3216_v39, %v3448_v25  ;;  %v2536_v59 = vadd.f32 %v3375_v27, %v2497_v42 }
 0x114   : > { %v1926_v24 = vadd.f32 %v1820_v9, %v1682_v40  ;;  %v1265_v5 = vrot.slane %v1164_v14, 2  ;;  %v5237_v19 = vrot.slane %v3616_v55, 2  ;;  %v3631_v0 = vmul.f32 %v3216_v39, %v3450_v26 }
 0x115   : > { %v1022_v20 = vsel %vm1009_vm3, %v1020_v45, %v1021_v6  ;;  %v1577_v51 = vrot.slane %v1477_v63, 1  ;;  %v1721_v44 = vmul.f32 %v3219_v35, %v3448_v25  ;;  %v2568_v4 = vmax.f32 %v2536_v59, 0.0  ;;  %v814_v45 = vld [vmem:[#allocation2 + $0xe8] sm:$0x3] }
 0x116   : > { %v1994_v49 = vadd.f32 %v1962_v3, %v1926_v24  ;;  %v1126_v36 = vadd.f32 %v1022_v20, %v849_v33  ;;  %v1407_v58 = vmul.f32 %v3231_v52, %v3448_v25  ;;  %v1267_v2 = vsel %vm1254_vm4, %v1265_v5, %v5237_v19  ;;  %v3667_v20 = vld [vmem:[#allocation2 + $0x100] sm:$0x3] }
 0x117   : > { %v5234_v22 = vrot.slane %v3631_v0, 1  ;;  %v3647_v31 = vmul.f32 %v3219_v35, %v3450_v26  ;;  %v1821_v10 = vrot.slane %v1721_v44, 2  ;;  %2675 = vrot.lane.b32.xlu0 %v2568_v4, %s2962_s15  ;;  %v2033_v9 = vmul.f32 %v3237_v54, %v3637_v60 }
 0x118   : > { %v2238_v3 = vadd.f32 %v2132_v8, %v1994_v49  ;;  %v1371_v33 = vadd.f32 %v1267_v2, %v1126_v36  ;;  %v3654_v17 = vmul.f32 %v3237_v54, %v3639_v13  ;;  %v2277_v14 = vmul.f32 %v3313_v29, %v3637_v60 }
 0x119   : > { %v1579_v42 = vsel %vm1009_vm3, %v1577_v51, %v5234_v22  ;;  %v5233_v40 = vrot.slane %v3647_v31, 2  ;;  %v3664_v8 = vmul.f32 %v3313_v29, %v3639_v13  ;;  %v2133_v24 = vrot.slane %v2033_v9, 1 }
 0x11a   : > { %v2482_v63 = vadd.f32 %v2376_v41, %v2238_v3  ;;  %v1439_v59 = vadd.f32 %v1407_v58, %v1371_v33  ;;  %v5235_v5 = vrot.slane %v3654_v17, 1  ;;  %v1963_v44 = vmul.f32 %v3234_v53, %v3637_v60  ;;  %v3676_v41 = vld [vmem:[#allocation2 + $0x118] sm:$0x3] }
 0x11b   : > { %v1823_v51 = vsel %vm1254_vm4, %v1821_v10, %v5233_v40  ;;  %v2377_v4 = vrot.slane %v2277_v14, 2  ;;  %v5236_v49 = vrot.slane %v3664_v8, 2  ;;  %v864_v58 = vmul.f32 %v3161_v48, %v3466_v62 }
 0x11c   : > { %v2521_v36 = vadd.f32 %v3375_v27, %v2482_v63  ;;  %v1683_v2 = vadd.f32 %v1579_v42, %v1439_v59  ;;  %v942_v3 = vmul.f32 %v3146_v38, %v814_v45  ;;  %v2135_v10 = vsel %vm1009_vm3, %v2133_v24, %v5235_v5 }
 0x11d   : > { %v2379_v33 = vsel %vm1254_vm4, %v2377_v4, %v5236_v49  ;;  %v1187_v9 = vmul.f32 %v3153_v46, %v814_v45  ;;  %v1500_v42 = vmul.f32 %v3216_v39, %v3667_v20  ;;  %v1744_v62 = vmul.f32 %v3219_v35, %v3667_v20 }
 0x11e   : > { %v2553_v14 = vmax.f32 %v2521_v36, 0.0  ;;  %v1927_v63 = vadd.f32 %v1823_v51, %v1683_v2  ;;  %v1058_v59 = vrot.slane %v942_v3, 1  ;;  %v1422_v22 = vmul.f32 %v3231_v52, %v3486_v23 }
 0x11f   : > { %v1303_v40 = vrot.slane %v1187_v9, 2  ;;  %v1615_v24 = vrot.slane %v1500_v42, 1  ;;  %v2056_v5 = vmul.f32 %v3237_v54, %v3676_v41  ;;  %v1859_v51 = vrot.slane %v1744_v62, 2  ;;  %v3739_v62 = vld [vmem:[#allocation2 + $0x128] sm:$0xff] }
 0x120   : > { %2597 = vrot.lane.b32.xlu1 %v2553_v14, %s2962_s15  ;;  %v1995_v45 = vadd.f32 %v1963_v44, %v1927_v63  ;;  %v1059_v4 = vsel %vm1009_vm3, %v1056_v12, %v1058_v59  ;;  %v2300_v36 = vmul.f32 %v3313_v29, %v3676_v41  ;;  %v5269_v3 = vrot.slane %v3503_v61, 2 }
 0x121   : > { %v1141_v2 = vadd.f32 %v1059_v4, %v864_v58  ;;  %v1978_v42 = vmul.f32 %v3234_v53, %v3510_v18  ;;  %v2171_v49 = vrot.slane %v2056_v5, 1  ;;  %v1616_v37 = vsel %vm1009_vm3, %v1613_v11, %v1615_v24 }
 0x122   : > { %v1304_v9 = vsel %vm1254_vm4, %v5269_v3, %v1303_v40  ;;  %v2239_v19 = vadd.f32 %v2135_v10, %v1995_v45  ;;  %v1860_v12 = vsel %vm1254_vm4, %v1857_v50, %v1859_v51  ;;  %v2415_v44 = vrot.slane %v2300_v36, 2 }
 0x123   : > { %v1386_v14 = vadd.f32 %v1304_v9, %v1141_v2  ;;  %v865_v61 = vmul.f32 %v3161_v48, %v3483_v56  ;;  %v943_v40 = vmul.f32 %v3146_v38, %v3483_v56  ;;  %v3719_v5 = vmul.f32 %v3146_v38, %v3486_v23 }
 0x124   : > { %v2483_v58 = vadd.f32 %v2379_v33, %v2239_v19  ;;  %v2172_v30 = vsel %vm1009_vm3, %v2169_v15, %v2171_v49  ;;  %v1188_v32 = vmul.f32 %v3153_v46, %v3483_v56  ;;  %v3728_v11 = vmul.f32 %v3153_v46, %v3486_v23  ;;  %v3737_v49 = vld [vmem:[#allocation2 + $0x120] sm:$0xff] }
 0x125   : > { %v1454_v50 = vadd.f32 %v1422_v22, %v1386_v14  ;;  %v1060_v10 = vrot.slane %v943_v40, 1  ;;  %v1061_v63 = vrot.slane %v3719_v5, 1  ;;  %v1423_v59 = vmul.f32 %v3231_v52, %v3508_v16 }
 0x126   : > { %v2522_v19 = vadd.f32 %v3375_v27, %v2483_v58  ;;  %v1305_v33 = vrot.slane %v1188_v32, 2  ;;  %v1306_v57 = vrot.slane %v3728_v11, 2  ;;  %v1501_v15 = vmul.f32 %v3216_v39, %v3508_v16 }
 0x127   : > { %v1698_v56 = vadd.f32 %v1616_v37, %v1454_v50  ;;  %v1062_v22 = vsel %vm1009_vm3, %v1060_v10, %v1061_v63  ;;  %v3746_v24 = vmul.f32 %v3216_v39, %v3510_v18  ;;  %v1745_v45 = vmul.f32 %v3219_v35, %v3508_v16 }
 0x128   : > { %v2554_v4 = vmax.f32 %v2522_v19, 0.0  ;;  %v1142_v51 = vadd.f32 %v1062_v22, %v865_v61  ;;  %v1307_v36 = vsel %vm1254_vm4, %v1305_v33, %v1306_v57  ;;  %v1617_v2 = vrot.slane %v1501_v15, 1  ;;  %v2929_v15 = vpop.f32.mrf.mxu1 }
 0x129   : > { %v1942_v3 = vadd.f32 %v1860_v12, %v1698_v56  ;;  %v1618_v9 = vrot.slane %v3746_v24, 1  ;;  %v3756_v37 = vmul.f32 %v3219_v35, %v3510_v18  ;;  %v1861_v14 = vrot.slane %v1745_v45, 2 }
 0x12a   : > { %2605 = vrot.lane.b32.xlu0 %v2554_v4, %s2962_s15  ;;  %v2416_v40 = vsel %vm1254_vm4, %v2413_v43, %v2415_v44  ;;  %v1387_v61 = vadd.f32 %v1307_v36, %v1142_v51  ;;  %v2057_v58 = vmul.f32 %v3237_v54, %v3737_v49  ;;  %v3766_v12 = vmul.f32 %v3237_v54, %v3739_v62 }
 0x12b   : > { %v2010_v32 = vadd.f32 %v1978_v42, %v1942_v3  ;;  %v1619_v50 = vsel %vm1009_vm3, %v1617_v2, %v1618_v9  ;;  %v1862_v10 = vrot.slane %v3756_v37, 2  ;;  %v2301_v7 = vmul.f32 %v3313_v29, %v3737_v49 }
 0x12c   : > { %v1455_v19 = vadd.f32 %v1423_v59, %v1387_v61  ;;  %v2173_v43 = vrot.slane %v2057_v58, 1  ;;  %v2174_v44 = vrot.slane %v3766_v12, 1  ;;  %v3777_v33 = vmul.f32 %v3313_v29, %v3739_v62 }
 0x12d   : > { %v2254_v56 = vadd.f32 %v2172_v30, %v2010_v32  ;;  %v1863_v42 = vsel %vm1254_vm4, %v1861_v14, %v1862_v10  ;;  %v2417_v22 = vrot.slane %v2301_v7, 2  ;;  %v615_v45 = vadd.f32 %v2929_v15, %v3158_v47 }
 0x12e   : > { %v1699_v4 = vadd.f32 %v1619_v50, %v1455_v19  ;;  %v1979_v59 = vmul.f32 %v3234_v53, %v3737_v49  ;;  %v2175_v51 = vsel %vm1009_vm3, %v2173_v43, %v2174_v44  ;;  %v5239_v36 = vrot.slane %v3777_v33, 2  ;;  %v3804_v50 = vld [vmem:[#allocation2 + $0x70] sm:$0x3] }
 0x12f   : > { %v2498_v2 = vadd.f32 %v2416_v40, %v2254_v56  ;;  %v649_v30 = vmax.f32 %v615_v45, 0.0  ;;  %v921_v3 = vmul.f32 %v3146_v38, %v3365_v21  ;;  %v1166_v14 = vmul.f32 %v3153_v46, %v3365_v21 }
 0x130   : > { %v1943_v61 = vadd.f32 %v1863_v42, %v1699_v4  ;;  %v2419_v47 = vsel %vm1254_vm4, %v2417_v22, %v5239_v36  ;;  %v850_v58 = vmul.f32 %v3161_v48, %v3308_v28  ;;  %v1479_v32 = vmul.f32 %v3216_v39, %v3575_v34  ;;  %v609_v42 = vpop.f32.mrf.mxu1 }
 0x131   : > { %v2537_v40 = vadd.f32 %v3375_v27, %v2498_v2  ;;  %681 = vst.msk [vmem:[%s3176_s10 + $0xf8] sm:$0xff] %vm292_vm1, %v649_v30  ;;  %784 = vst.msk [vmem:[#allocation2 + $0x189] sm:$0xff] %vm292_vm1, %v649_v30  ;;  %v1023_v21 = vrot.slane %v921_v3, 1  ;;  %v1268_v7 = vrot.slane %v1166_v14, 2  ;;  %v1723_v19 = vmul.f32 %v3219_v35, %v3575_v34 }
 0x132   : > { %v2011_v43 = vadd.f32 %v1979_v59, %v1943_v61  ;;  %v1408_v28 = vmul.f32 %v3231_v52, %v3450_v26  ;;  %v1580_v15 = vrot.slane %v1479_v32, 1  ;;  %v2035_v56 = vmul.f32 %v3237_v54, %v3804_v50 }
 0x133   : > { %v2569_v22 = vmax.f32 %v2537_v40, 0.0  ;;  %v1024_v45 = vsel %vm1009_vm3, %v1021_v6, %v1023_v21  ;;  %v1824_v4 = vrot.slane %v1723_v19, 2  ;;  %v1964_v2 = vmul.f32 %v3234_v53, %v3639_v13 }
 0x134   : > { %v2255_v30 = vadd.f32 %v2175_v51, %v2011_v43  ;;  %v1127_v3 = vadd.f32 %v1024_v45, %v850_v58  ;;  %v5270_v59 = vrot.slane %v3616_v55, 2  ;;  %v2136_v61 = vrot.slane %v2035_v56, 1  ;;  %v2942_v55 = vld [vmem:[%s5227_s2] ss:$0 sm:$0xff] }
 0x135   : > { %2677 = vrot.lane.b32.xlu1 %v2569_v22, %s2962_s15  ;;  %v5271_v32 = vrot.slane %v3631_v0, 1  ;;  %v5272_v1 = vrot.slane %v3647_v31, 2  ;;  %v2279_v21 = vmul.f32 %v3313_v29, %v3804_v50  ;;  %v610_v51 = vadd.f32 %v2942_v55, %v609_v42 }
 0x136   : > { %v1269_v14 = vsel %vm1254_vm4, %v5270_v59, %v1268_v7  ;;  %v2499_v58 = vadd.f32 %v2419_v47, %v2255_v30  ;;  %v851_v0 = vmul.f32 %v3161_v48, %v3448_v25  ;;  %v922_v19 = vmul.f32 %v3146_v38, %v3448_v25 }
 0x137   : > { %v1581_v40 = vsel %vm1009_vm3, %v5271_v32, %v1580_v15  ;;  %v1825_v6 = vsel %vm1254_vm4, %v5272_v1, %v1824_v4  ;;  %v1372_v7 = vadd.f32 %v1269_v14, %v1127_v3  ;;  %v5273_v31 = vrot.slane %v3654_v17, 1  ;;  %v3859_v32 = vld [vmem:[#allocation2 + $0x78] sm:$0xff]  ;;  %v3861_v1 = vld [vmem:[#allocation2 + $0x80] sm:$0xff] }
 0x138   : > { %v648_v15 = vmax.f32 %v610_v51, 0.0  ;;  %v3841_v56 = vmul.f32 %v3146_v38, %v3450_v26  ;;  %v1167_v42 = vmul.f32 %v3153_v46, %v3448_v25  ;;  %v2538_v47 = vadd.f32 %v3375_v27, %v2499_v58 }
 0x139   : > { %v2137_v43 = vsel %vm1009_vm3, %v5273_v31, %v2136_v61  ;;  %v1440_v22 = vadd.f32 %v1408_v28, %v1372_v7  ;;  %v1025_v45 = vrot.slane %v922_v19, 1  ;;  %v3848_v4 = vmul.f32 %v3153_v46, %v3450_v26 }
 0x13a   : > { %v2380_v30 = vrot.slane %v2279_v21, 2  ;;  %680 = vst.msk [vmem:[%s3176_s10 + $0xf0] sm:$0xff] %vm292_vm1, %v648_v15  ;;  %783 = vst.msk [vmem:[#allocation2 + $0x181] sm:$0xff] %vm292_vm1, %v648_v15  ;;  %v5238_v17 = vrot.slane %v3841_v56, 1  ;;  %v1270_v3 = vrot.slane %v1167_v42, 2  ;;  %v1409_v59 = vmul.f32 %v3231_v52, %v3637_v60 }
 0x13b   : > { %v2570_v25 = vmax.f32 %v2538_v47, 0.0  ;;  %v1684_v14 = vadd.f32 %v1581_v40, %v1440_v22  ;;  %v1271_v28 = vrot.slane %v3848_v4, 2  ;;  %v1480_v61 = vmul.f32 %v3216_v39, %v3637_v60 }
 0x13c   : > { %v1027_v21 = vsel %vm1009_vm3, %v1025_v45, %v5238_v17  ;;  %v3868_v55 = vmul.f32 %v3216_v39, %v3639_v13  ;;  %v1724_v40 = vmul.f32 %v3219_v35, %v3637_v60  ;;  %v3874_v51 = vmul.f32 %v3219_v35, %v3639_v13 }
 0x13d   : > { %2685 = vrot.lane.b32.xlu0 %v2570_v25, %s2962_s15  ;;  %v1928_v58 = vadd.f32 %v1825_v6, %v1684_v14  ;;  %v1128_v7 = vadd.f32 %v1027_v21, %v851_v0  ;;  %v1272_v19 = vsel %vm1254_vm4, %v1270_v3, %v1271_v28  ;;  %v1582_v31 = vrot.slane %v1480_v61, 1 }
 0x13e   : > { %v5274_v15 = vrot.slane %v3664_v8, 2  ;;  %v5240_v47 = vrot.slane %v3868_v55, 1  ;;  %v1826_v22 = vrot.slane %v1724_v40, 2  ;;  %v1827_v45 = vrot.slane %v3874_v51, 2 }
 0x13f   : > { %v1996_v17 = vadd.f32 %v1964_v2, %v1928_v58  ;;  %v1373_v36 = vadd.f32 %v1272_v19, %v1128_v7  ;;  %v2036_v6 = vmul.f32 %v3237_v54, %v3859_v32  ;;  %v3889_v0 = vmul.f32 %v3237_v54, %v3861_v1 }
 0x140   : > { %v2381_v42 = vsel %vm1254_vm4, %v5274_v15, %v2380_v30  ;;  %v1584_v8 = vsel %vm1009_vm3, %v1582_v31, %v5240_v47  ;;  %v1965_v30 = vmul.f32 %v3234_v53, %v3859_v32  ;;  %v2280_v3 = vmul.f32 %v3313_v29, %v3859_v32  ;;  %v3909_v47 = vld [vmem:[#allocation2 + $0x130] sm:$0x3] }
 0x141   : > { %v3900_v2 = vmul.f32 %v3313_v29, %v3861_v1  ;;  %v2240_v25 = vadd.f32 %v2137_v43, %v1996_v17  ;;  %v1441_v14 = vadd.f32 %v1409_v59, %v1373_v36  ;;  %v2138_v61 = vrot.slane %v2036_v6, 1 }
 0x142   : > { %v2139_v21 = vrot.slane %v3889_v0, 1  ;;  %v1828_v40 = vsel %vm1254_vm4, %v1826_v22, %v1827_v45  ;;  %v2382_v58 = vrot.slane %v2280_v3, 2  ;;  %v945_v19 = vmul.f32 %v3146_v38, %v3667_v20 }
 0x143   : > { %v5241_v7 = vrot.slane %v3900_v2, 2  ;;  %v2484_v31 = vadd.f32 %v2381_v42, %v2240_v25  ;;  %v1685_v15 = vadd.f32 %v1584_v8, %v1441_v14  ;;  %v866_v36 = vmul.f32 %v3161_v48, %v3486_v23 }
 0x144   : > { %v1190_v43 = vmul.f32 %v3153_v46, %v3667_v20  ;;  %v2140_v17 = vsel %vm1009_vm3, %v2138_v61, %v2139_v21  ;;  %v1063_v22 = vrot.slane %v945_v19, 1  ;;  %v1503_v42 = vmul.f32 %v3216_v39, %v3676_v41 }
 0x145   : > { %v2384_v59 = vsel %vm1254_vm4, %v2382_v58, %v5241_v7  ;;  %v2523_v6 = vadd.f32 %v3375_v27, %v2484_v31  ;;  %v1929_v8 = vadd.f32 %v1828_v40, %v1685_v15  ;;  %v1747_v23 = vmul.f32 %v3219_v35, %v3676_v41 }
 0x146   : > { %v1308_v3 = vrot.slane %v1190_v43, 2  ;;  %v1064_v20 = vsel %vm1009_vm3, %v1061_v63, %v1063_v22  ;;  %v1424_v25 = vmul.f32 %v3231_v52, %v3510_v18  ;;  %v1620_v14 = vrot.slane %v1503_v42, 1 }
 0x147   : > { %v2059_v61 = vmul.f32 %v3237_v54, %v3909_v47  ;;  %v2555_v58 = vmax.f32 %v2523_v6, 0.0  ;;  %v1997_v19 = vadd.f32 %v1965_v30, %v1929_v8  ;;  %v1143_v7 = vadd.f32 %v1064_v20, %v866_v36  ;;  %v3970_v20 = vld [vmem:[#allocation2 + $0x138] sm:$0xff] }
 0x148   : > { %v1309_v40 = vsel %vm1254_vm4, %v1306_v57, %v1308_v3  ;;  %v1864_v31 = vrot.slane %v1747_v23, 2  ;;  %v1980_v5 = vmul.f32 %v3234_v53, %v3739_v62  ;;  %v2303_v63 = vmul.f32 %v3313_v29, %v3909_v47 }
 0x149   : > { %v2176_v15 = vrot.slane %v2059_v61, 1  ;;  %2607 = vrot.lane.b32.xlu1 %v2555_v58, %s2962_s15  ;;  %v2241_v43 = vadd.f32 %v2140_v17, %v1997_v19  ;;  %v1388_v22 = vadd.f32 %v1309_v40, %v1143_v7  ;;  %v1621_v30 = vsel %vm1009_vm3, %v1618_v9, %v1620_v14  ;;  %v3982_v40 = vld [vmem:[#allocation2 + $0x140] sm:$0xff] }
 0x14a   : > { %v946_v11 = vmul.f32 %v3146_v38, %v3508_v16  ;;  %v1865_v57 = vsel %vm1254_vm4, %v1862_v10, %v1864_v31  ;;  %v867_v42 = vmul.f32 %v3161_v48, %v3508_v16  ;;  %v3956_v7 = vmul.f32 %v3146_v38, %v3510_v18 }
 0x14b   : > { %v2177_v36 = vsel %vm1009_vm3, %v2174_v44, %v2176_v15  ;;  %v2485_v24 = vadd.f32 %v2384_v59, %v2241_v43  ;;  %v1456_v9 = vadd.f32 %v1424_v25, %v1388_v22  ;;  %v1191_v6 = vmul.f32 %v3153_v46, %v3508_v16 }
 0x14c   : > { %v1065_v17 = vrot.slane %v946_v11, 1  ;;  %v2420_v37 = vrot.slane %v2303_v63, 2  ;;  %v1066_v10 = vrot.slane %v3956_v7, 1  ;;  %v3963_v12 = vmul.f32 %v3153_v46, %v3510_v18 }
 0x14d   : > { %v1425_v44 = vmul.f32 %v3231_v52, %v3737_v49  ;;  %v2524_v8 = vadd.f32 %v3375_v27, %v2485_v24  ;;  %v1700_v3 = vadd.f32 %v1621_v30, %v1456_v9  ;;  %v1310_v23 = vrot.slane %v1191_v6, 2 }
 0x14e   : > { %v1504_v59 = vmul.f32 %v3216_v39, %v3737_v49  ;;  %v1067_v16 = vsel %vm1009_vm3, %v1065_v17, %v1066_v10  ;;  %v1311_v25 = vrot.slane %v3963_v12, 2  ;;  %v3978_v14 = vmul.f32 %v3216_v39, %v3739_v62 }
 0x14f   : > { %v1748_v61 = vmul.f32 %v3219_v35, %v3737_v49  ;;  %v2556_v58 = vmax.f32 %v2524_v8, 0.0  ;;  %v1944_v19 = vadd.f32 %v1865_v57, %v1700_v3  ;;  %v1144_v31 = vadd.f32 %v1067_v16, %v867_v42 }
 0x150   : > { %v1622_v15 = vrot.slane %v1504_v59, 1  ;;  %v1312_v63 = vsel %vm1254_vm4, %v1310_v23, %v1311_v25  ;;  %v1623_v43 = vrot.slane %v3978_v14, 1  ;;  %v3990_v22 = vmul.f32 %v3219_v35, %v3739_v62 }
 0x151   : > { %v1866_v30 = vrot.slane %v1748_v61, 2  ;;  %2615 = vrot.lane.b32.xlu0 %v2556_v58, %s2962_s15  ;;  %v2012_v11 = vadd.f32 %v1980_v5, %v1944_v19  ;;  %v5275_v57 = vrot.slane %v3777_v33, 2  ;;  %v1389_v42 = vadd.f32 %v1312_v63, %v1144_v31 }
 0x152   : > { %v2060_v9 = vmul.f32 %v3237_v54, %v3970_v20  ;;  %v1624_v17 = vsel %vm1009_vm3, %v1622_v15, %v1623_v43  ;;  %v1867_v6 = vrot.slane %v3990_v22, 2  ;;  %v4004_v8 = vmul.f32 %v3237_v54, %v3982_v40  ;;  %v4024_v15 = vld [vmem:[#allocation2 + $0x88] sm:$0x3] }
 0x153   : > { %v2421_v24 = vsel %vm1254_vm4, %v5275_v57, %v2420_v37  ;;  %v2304_v5 = vmul.f32 %v3313_v29, %v3970_v20  ;;  %v2256_v33 = vadd.f32 %v2177_v36, %v2012_v11  ;;  %v1457_v3 = vadd.f32 %v1425_v44, %v1389_v42 }
 0x154   : > { %v2178_v37 = vrot.slane %v2060_v9, 1  ;;  %v4010_v23 = vmul.f32 %v3313_v29, %v3982_v40  ;;  %v1868_v59 = vsel %vm1254_vm4, %v1866_v30, %v1867_v6  ;;  %v1981_v16 = vmul.f32 %v3234_v53, %v3970_v20 }
 0x155   : > { %v2179_v61 = vrot.slane %v4004_v8, 1  ;;  %v2422_v58 = vrot.slane %v2304_v5, 2  ;;  %v2500_v19 = vadd.f32 %v2421_v24, %v2256_v33  ;;  %v1701_v31 = vadd.f32 %v1624_v17, %v1457_v3 }
 0x156   : > { %v2423_v36 = vrot.slane %v4010_v23, 2  ;;  %v924_v44 = vmul.f32 %v3146_v38, %v3575_v34  ;;  %v852_v63 = vmul.f32 %v3161_v48, %v3450_v26  ;;  %v1169_v30 = vmul.f32 %v3153_v46, %v3575_v34 }
 0x157   : > { %v2180_v29 = vsel %vm1009_vm3, %v2178_v37, %v2179_v61  ;;  %v1482_v11 = vmul.f32 %v3216_v39, %v3804_v50  ;;  %v2539_v57 = vadd.f32 %v3375_v27, %v2500_v19  ;;  %v1945_v24 = vadd.f32 %v1868_v59, %v1701_v31 }
 0x158   : > { %v1028_v42 = vrot.slane %v924_v44, 1  ;;  %v1410_v9 = vmul.f32 %v3231_v52, %v3639_v13  ;;  %v2424_v17 = vsel %vm1254_vm4, %v2422_v58, %v2423_v36  ;;  %v1273_v5 = vrot.slane %v1169_v30, 2 }
 0x159   : > { %v1585_v33 = vrot.slane %v1482_v11, 1  ;;  %v1726_v26 = vmul.f32 %v3219_v35, %v3804_v50  ;;  %v2571_v34 = vmax.f32 %v2539_v57, 0.0  ;;  %v2013_v3 = vadd.f32 %v1981_v16, %v1945_v24 }
 0x15a   : > { %v5276_v37 = vrot.slane %v3841_v56, 1  ;;  %v2038_v59 = vmul.f32 %v3237_v54, %v4024_v15  ;;  %v1274_v44 = vsel %vm1254_vm4, %v1271_v28, %v1273_v5  ;;  %v1966_v30 = vmul.f32 %v3234_v53, %v3861_v1 }
 0x15b   : > { %v1829_v58 = vrot.slane %v1726_v26, 2  ;;  %2687 = vrot.lane.b32.xlu1 %v2571_v34, %s2962_s15  ;;  %v2257_v11 = vadd.f32 %v2180_v29, %v2013_v3  ;;  %v5277_v16 = vrot.slane %v3868_v55, 1  ;;  %v853_v24 = vmul.f32 %v3161_v48, %v3637_v60 }
 0x15c   : > { %v1029_v19 = vsel %vm1009_vm3, %v5276_v37, %v1028_v42  ;;  %v2141_v57 = vrot.slane %v2038_v59, 1  ;;  %v925_v29 = vmul.f32 %v3146_v38, %v3637_v60  ;;  %v4067_v55 = vmul.f32 %v3146_v38, %v3639_v13 }
 0x15d   : > { %v1129_v31 = vadd.f32 %v1029_v19, %v852_v63  ;;  %v1586_v56 = vsel %vm1009_vm3, %v5277_v16, %v1585_v33  ;;  %v4057_v63 = vld [vmem:[%s5229_s4 + $0x8] ss:$0 sm:$0xff]  ;;  %v2501_v42 = vadd.f32 %v2424_v17, %v2257_v11  ;;  %v1830_v5 = vsel %vm1254_vm4, %v1827_v45, %v1829_v58  ;;  %v4093_v58 = vld [vmem:[#allocation2 + $0x98] sm:$0xff] }
 0x15e   : > { %v2282_v4 = vmul.f32 %v4057_v63, %v4024_v15  ;;  %v2142_v33 = vsel %vm1009_vm3, %v2139_v21, %v2141_v57  ;;  %v1170_v26 = vmul.f32 %v3153_v46, %v3637_v60  ;;  %v1030_v3 = vrot.slane %v925_v29, 1 }
 0x15f   : > { %v1374_v28 = vadd.f32 %v1274_v44, %v1129_v31  ;;  %v1031_v37 = vrot.slane %v4067_v55, 1  ;;  %v4080_v19 = vmul.f32 %v3153_v46, %v3639_v13  ;;  %v2540_v17 = vadd.f32 %v3375_v27, %v2501_v42  ;;  %v4091_v44 = vld [vmem:[#allocation2 + $0x90] sm:$0xff] }
 0x160   : > { %v2385_v51 = vrot.slane %v2282_v4, 2  ;;  %v1275_v59 = vrot.slane %v1170_v26, 2  ;;  %v1411_v45 = vmul.f32 %v3231_v52, %v3859_v32  ;;  %v4097_v11 = vmul.f32 %v3216_v39, %v3861_v1 }
 0x161   : > { %v1442_v34 = vadd.f32 %v1410_v9, %v1374_v28  ;;  %v1032_v60 = vsel %vm1009_vm3, %v1030_v3, %v1031_v37  ;;  %v1276_v21 = vrot.slane %v4080_v19, 2  ;;  %v1483_v9 = vmul.f32 %v3216_v39, %v3859_v32 }
 0x162   : > { %v2572_v31 = vmax.f32 %v2540_v17, 0.0  ;;  %v1130_v27 = vadd.f32 %v1032_v60, %v853_v24  ;;  %v1727_v16 = vmul.f32 %v3219_v35, %v3859_v32  ;;  %v4106_v28 = vmul.f32 %v3219_v35, %v3861_v1 }
 0x163   : > { %v1686_v0 = vadd.f32 %v1586_v56, %v1442_v34  ;;  %v1277_v57 = vsel %vm1254_vm4, %v1275_v59, %v1276_v21  ;;  %v1587_v4 = vrot.slane %v1483_v9, 1  ;;  %v5278_v24 = vrot.slane %v3900_v2, 2 }
 0x164   : > { %2695 = vrot.lane.b32.xlu0 %v2572_v31, %s2962_s15  ;;  %v1375_v42 = vadd.f32 %v1277_v57, %v1130_v27  ;;  %v1588_v26 = vrot.slane %v4097_v11, 1  ;;  %v1831_v34 = vrot.slane %v1727_v16, 2  ;;  %v5244_v3 = vrot.slane %v4106_v28, 2 }
 0x165   : > { %v1930_v56 = vadd.f32 %v1830_v5, %v1686_v0  ;;  %v2386_v29 = vsel %vm1254_vm4, %v5278_v24, %v2385_v51  ;;  %v2039_v17 = vmul.f32 %v3237_v54, %v4091_v44  ;;  %v4118_v59 = vmul.f32 %v3237_v54, %v4093_v58  ;;  %v4136_v24 = vld [vmem:[#allocation2 + $0x148] sm:$0x3] }
 0x166   : > { %v1443_v0 = vadd.f32 %v1411_v45, %v1375_v42  ;;  %v1589_v2 = vsel %vm1009_vm3, %v1587_v4, %v1588_v26  ;;  %v2283_v51 = vmul.f32 %v4057_v63, %v4091_v44  ;;  %v1833_v9 = vsel %vm1254_vm4, %v1831_v34, %v5244_v3 }
 0x167   : > { %v1998_v5 = vadd.f32 %v1966_v30, %v1930_v56  ;;  %v4127_v30 = vmul.f32 %v4057_v63, %v4093_v58  ;;  %v2143_v31 = vrot.slane %v2039_v17, 1  ;;  %v5243_v27 = vrot.slane %v4118_v59, 1 }
 0x168   : > { %v1687_v45 = vadd.f32 %v1589_v2, %v1443_v0  ;;  %v1967_v16 = vmul.f32 %v3234_v53, %v4091_v44  ;;  %v2387_v56 = vrot.slane %v2283_v51, 2  ;;  %v948_v42 = vmul.f32 %v3146_v38, %v3676_v41 }
 0x169   : > { %v2242_v60 = vadd.f32 %v2142_v33, %v1998_v5  ;;  %v5242_v57 = vrot.slane %v4127_v30, 2  ;;  %v868_v33 = vmul.f32 %v3161_v48, %v3510_v18  ;;  %v1193_v34 = vmul.f32 %v3153_v46, %v3676_v41  ;;  %v4155_v18 = vld [vmem:[%s5230_s5] ss:$0 sm:$0xff] }
 0x16a   : > { %v1931_v5 = vadd.f32 %v1833_v9, %v1687_v45  ;;  %v2145_v17 = vsel %vm1009_vm3, %v2143_v31, %v5243_v27  ;;  %v1506_v0 = vmul.f32 %v3216_v39, %v3909_v47  ;;  %v1068_v41 = vrot.slane %v948_v42, 1 }
 0x16b   : > { %v2486_v4 = vadd.f32 %v2386_v29, %v2242_v60  ;;  %v2389_v29 = vsel %vm1254_vm4, %v2387_v56, %v5242_v57  ;;  %v1313_v51 = vrot.slane %v1193_v34, 2  ;;  %v1750_v60 = vmul.f32 %v3219_v35, %v3909_v47 }
 0x16c   : > { %v1999_v9 = vadd.f32 %v1967_v16, %v1931_v5  ;;  %v1426_v31 = vmul.f32 %v3231_v52, %v3739_v62  ;;  %v1625_v45 = vrot.slane %v1506_v0, 1  ;;  %v2062_v56 = vmul.f32 %v3237_v54, %v4136_v24 }
 0x16d   : > { %v2525_v2 = vadd.f32 %v4155_v18, %v2486_v4  ;;  %v1069_v27 = vsel %vm1009_vm3, %v1066_v10, %v1068_v41  ;;  %v1314_v4 = vsel %vm1254_vm4, %v1311_v25, %v1313_v51  ;;  %v1869_v42 = vrot.slane %v1750_v60, 2 }
 0x16e   : > { %v2243_v34 = vadd.f32 %v2145_v17, %v1999_v9  ;;  %v1145_v3 = vadd.f32 %v1069_v27, %v868_v33  ;;  %v1982_v16 = vmul.f32 %v3234_v53, %v3982_v40  ;;  %v2181_v5 = vrot.slane %v2062_v56, 1  ;;  %v4205_v9 = vld [vmem:[#allocation2 + $0x150] sm:$0xff] }
 0x16f   : > { %v2557_v57 = vmax.f32 %v2525_v2, 0.0  ;;  %v1626_v0 = vsel %vm1009_vm3, %v1623_v43, %v1625_v45  ;;  %v1870_v7 = vsel %vm1254_vm4, %v1867_v6, %v1869_v42  ;;  %v2306_v10 = vmul.f32 %v4057_v63, %v4136_v24  ;;  %v4207_v45 = vld [vmem:[#allocation2 + $0x158] sm:$0xff] }
 0x170   : > { %v949_v12 = vmul.f32 %v3146_v38, %v3737_v49  ;;  %v2487_v25 = vadd.f32 %v2389_v29, %v2243_v34  ;;  %v1390_v27 = vadd.f32 %v1314_v4, %v1145_v3  ;;  %v869_v33 = vmul.f32 %v3161_v48, %v3737_v49 }
 0x171   : > { %2617 = vrot.lane.b32.xlu1 %v2557_v57, %s2962_s15  ;;  %v4187_v14 = vmul.f32 %v3146_v38, %v3739_v62  ;;  %v2182_v43 = vsel %vm1009_vm3, %v2179_v61, %v2181_v5  ;;  %v1194_v6 = vmul.f32 %v3153_v46, %v3737_v49  ;;  %v4196_v57 = vmul.f32 %v3153_v46, %v3739_v62 }
 0x172   : > { %v1070_v22 = vrot.slane %v949_v12, 1  ;;  %v2526_v3 = vadd.f32 %v4155_v18, %v2487_v25  ;;  %v1458_v17 = vadd.f32 %v1426_v31, %v1390_v27  ;;  %v2425_v29 = vrot.slane %v2306_v10, 2 }
 0x173   : > { %v1071_v2 = vrot.slane %v4187_v14, 1  ;;  %v1315_v41 = vrot.slane %v1194_v6, 2  ;;  %v1316_v51 = vrot.slane %v4196_v57, 2  ;;  %v1427_v8 = vmul.f32 %v3231_v52, %v3970_v20 }
 0x174   : > { %v1507_v61 = vmul.f32 %v3216_v39, %v3970_v20  ;;  %v2558_v49 = vmax.f32 %v2526_v3, 0.0  ;;  %v1702_v60 = vadd.f32 %v1626_v0, %v1458_v17  ;;  %v4214_v56 = vmul.f32 %v3216_v39, %v3982_v40 }
 0x175   : > { %v1072_v31 = vsel %vm1009_vm3, %v1070_v22, %v1071_v2  ;;  %v1317_v42 = vsel %vm1254_vm4, %v1315_v41, %v1316_v51  ;;  %v1751_v5 = vmul.f32 %v3219_v35, %v3970_v20  ;;  %v2426_v10 = vsel %vm1254_vm4, %v2423_v36, %v2425_v29 }
 0x176   : > { %v1146_v4 = vadd.f32 %v1072_v31, %v869_v33  ;;  %v1627_v34 = vrot.slane %v1507_v61, 1  ;;  %2625 = vrot.lane.b32.xlu0 %v2558_v49, %s2962_s15  ;;  %v1946_v0 = vadd.f32 %v1870_v7, %v1702_v60  ;;  %v1628_v12 = vrot.slane %v4214_v56, 1 }
 0x177   : > { %v4228_v25 = vmul.f32 %v3219_v35, %v3982_v40  ;;  %v1871_v33 = vrot.slane %v1751_v5, 2  ;;  %v2063_v22 = vmul.f32 %v3237_v54, %v4205_v9  ;;  %v4234_v6 = vmul.f32 %v3237_v54, %v4207_v45 }
 0x178   : > { %v1391_v27 = vadd.f32 %v1317_v42, %v1146_v4  ;;  %v2014_v7 = vadd.f32 %v1982_v16, %v1946_v0  ;;  %v1629_v23 = vsel %vm1009_vm3, %v1627_v34, %v1628_v12  ;;  %v2307_v3 = vmul.f32 %v4057_v63, %v4205_v9  ;;  %v4260_v0 = vld [vmem:[#allocation2 + $0xa0] sm:$0x3] }
 0x179   : > { %v1872_v36 = vrot.slane %v4228_v25, 2  ;;  %v2183_v29 = vrot.slane %v2063_v22, 1  ;;  %v5245_v41 = vrot.slane %v4234_v6, 1  ;;  %v4245_v61 = vmul.f32 %v4057_v63, %v4207_v45 }
 0x17a   : > { %v1459_v17 = vadd.f32 %v1427_v8, %v1391_v27  ;;  %v2258_v49 = vadd.f32 %v2182_v43, %v2014_v7  ;;  %v1983_v60 = vmul.f32 %v3234_v53, %v4205_v9  ;;  %v2427_v31 = vrot.slane %v2307_v3, 2 }
 0x17b   : > { %v1873_v16 = vsel %vm1254_vm4, %v1871_v33, %v1872_v36  ;;  %v2428_v42 = vrot.slane %v4245_v61, 2  ;;  %v854_v8 = vmul.f32 %v3161_v48, %v3639_v13  ;;  %v927_v34 = vmul.f32 %v3146_v38, %v3804_v50 }
 0x17c   : > { %v1703_v4 = vadd.f32 %v1629_v23, %v1459_v17  ;;  %v2502_v5 = vadd.f32 %v2426_v10, %v2258_v49  ;;  %v2185_v43 = vsel %vm1009_vm3, %v2183_v29, %v5245_v41  ;;  %v1172_v27 = vmul.f32 %v3153_v46, %v3804_v50 }
 0x17d   : > { %v1485_v33 = vmul.f32 %v3216_v39, %v4024_v15  ;;  %v1033_v7 = vrot.slane %v927_v34, 1  ;;  %v1412_v13 = vmul.f32 %v3231_v52, %v3861_v1  ;;  %v1729_v10 = vmul.f32 %v3219_v35, %v4024_v15 }
 0x17e   : > { %v1947_v22 = vadd.f32 %v1873_v16, %v1703_v4  ;;  %v2541_v23 = vadd.f32 %v4155_v18, %v2502_v5  ;;  %v2429_v3 = vsel %vm1254_vm4, %v2427_v31, %v2428_v42  ;;  %v1278_v17 = vrot.slane %v1172_v27, 2 }
 0x17f   : > { %v1590_v29 = vrot.slane %v1485_v33, 1  ;;  %v1034_v49 = vsel %vm1009_vm3, %v1031_v37, %v1033_v7  ;;  %v1834_v16 = vrot.slane %v1729_v10, 2  ;;  %v2041_v4 = vmul.f32 %v3237_v54, %v4260_v0 }
 0x180   : > { %v2015_v50 = vadd.f32 %v1983_v60, %v1947_v22  ;;  %v2573_v34 = vmax.f32 %v2541_v23, 0.0  ;;  %v1131_v41 = vadd.f32 %v1034_v49, %v854_v8  ;;  %v1279_v5 = vsel %vm1254_vm4, %v1276_v21, %v1278_v17 }
 0x181   : > { %v1968_v31 = vmul.f32 %v3234_v53, %v4093_v58  ;;  %v1591_v55 = vsel %vm1009_vm3, %v1588_v26, %v1590_v29  ;;  %v2146_v60 = vrot.slane %v2041_v4, 1  ;;  %v2285_v37 = vmul.f32 %v4057_v63, %v4260_v0 }
 0x182   : > { %v2259_v27 = vadd.f32 %v2185_v43, %v2015_v50  ;;  %2697 = vrot.lane.b32.xlu1 %v2573_v34, %s2962_s15  ;;  %v1376_v33 = vadd.f32 %v1279_v5, %v1131_v41  ;;  %v5279_v8 = vrot.slane %v4106_v28, 2  ;;  %v928_v21 = vmul.f32 %v3146_v38, %v3859_v32 }
 0x183   : > { %v4297_v43 = vmul.f32 %v3146_v38, %v3861_v1  ;;  %v5280_v26 = vrot.slane %v4118_v59, 1  ;;  %v855_v7 = vmul.f32 %v3161_v48, %v3859_v32  ;;  %v1173_v28 = vmul.f32 %v3153_v46, %v3859_v32 }
 0x184   : > { %v1835_v19 = vsel %vm1254_vm4, %v5279_v8, %v1834_v16  ;;  %v2503_v11 = vadd.f32 %v2429_v3, %v2259_v27  ;;  %v1444_v41 = vadd.f32 %v1412_v13, %v1376_v33  ;;  %v1035_v10 = vrot.slane %v928_v21, 1 }
 0x185   : > { %v2147_v22 = vsel %vm1009_vm3, %v5280_v26, %v2146_v60  ;;  %v1036_v23 = vrot.slane %v4297_v43, 1  ;;  %v4309_v17 = vmul.f32 %v3153_v46, %v3861_v1  ;;  %v2390_v29 = vrot.slane %v2285_v37, 2  ;;  %v4339_v26 = vld [vmem:[#allocation2 + $0xb0] sm:$0xff] }
 0x186   : > { %v2542_v3 = vadd.f32 %v4155_v18, %v2503_v11  ;;  %v1280_v59 = vrot.slane %v1173_v28, 2  ;;  %v1413_v50 = vmul.f32 %v3231_v52, %v4091_v44  ;;  %v1688_v49 = vadd.f32 %v1591_v55, %v1444_v41  ;;  %v4337_v11 = vld [vmem:[#allocation2 + $0xa8] sm:$0xff] }
 0x187   : > { %v1037_v32 = vsel %vm1009_vm3, %v1035_v10, %v1036_v23  ;;  %v1281_v13 = vrot.slane %v4309_v17, 2  ;;  %v1486_v16 = vmul.f32 %v3216_v39, %v4091_v44  ;;  %v4322_v5 = vmul.f32 %v3216_v39, %v4093_v58 }
 0x188   : > { %v2574_v4 = vmax.f32 %v2542_v3, 0.0  ;;  %v1132_v34 = vadd.f32 %v1037_v32, %v855_v7  ;;  %v1730_v27 = vmul.f32 %v3219_v35, %v4091_v44  ;;  %v1932_v60 = vadd.f32 %v1835_v19, %v1688_v49 }
 0x189   : > { %v1282_v55 = vsel %vm1254_vm4, %v1280_v59, %v1281_v13  ;;  %v1592_v37 = vrot.slane %v1486_v16, 1  ;;  %v4331_v33 = vmul.f32 %v3219_v35, %v4093_v58  ;;  %v5281_v8 = vrot.slane %v4127_v30, 2 }
 0x18a   : > { %2705 = vrot.lane.b32.xlu0 %v2574_v4, %s2962_s15  ;;  %v1377_v19 = vadd.f32 %v1282_v55, %v1132_v34  ;;  %v1593_v7 = vrot.slane %v4322_v5, 1  ;;  %v1836_v28 = vrot.slane %v1730_v27, 2  ;;  %v2000_v41 = vadd.f32 %v1968_v31, %v1932_v60 }
 0x18b   : > { %v2391_v21 = vsel %vm1254_vm4, %v5281_v8, %v2390_v29  ;;  %v1837_v10 = vrot.slane %v4331_v33, 2  ;;  %v2042_v3 = vmul.f32 %v3237_v54, %v4337_v11  ;;  %v4347_v59 = vmul.f32 %v3237_v54, %v4339_v26  ;;  %v4365_v8 = vld [vmem:[#allocation2 + $0x160] sm:$0x3] }
 0x18c   : > { %v1445_v30 = vadd.f32 %v1413_v50, %v1377_v19  ;;  %v1594_v29 = vsel %vm1009_vm3, %v1592_v37, %v1593_v7  ;;  %v2286_v49 = vmul.f32 %v4057_v63, %v4337_v11  ;;  %v4356_v31 = vmul.f32 %v4057_v63, %v4339_v26 }
 0x18d   : > { %v2244_v32 = vadd.f32 %v2147_v22, %v2000_v41  ;;  %v1838_v16 = vsel %vm1254_vm4, %v1836_v28, %v1837_v10  ;;  %v2148_v4 = vrot.slane %v2042_v3, 1  ;;  %v5246_v34 = vrot.slane %v4347_v59, 1 }
 0x18e   : > { %v1689_v50 = vadd.f32 %v1594_v29, %v1445_v30  ;;  %v1969_v27 = vmul.f32 %v3234_v53, %v4337_v11  ;;  %v2392_v60 = vrot.slane %v2286_v49, 2  ;;  %v5247_v55 = vrot.slane %v4356_v31, 2 }
 0x18f   : > { %v2488_v37 = vadd.f32 %v2391_v21, %v2244_v32  ;;  %v870_v22 = vmul.f32 %v3161_v48, %v3739_v62  ;;  %v951_v19 = vmul.f32 %v3146_v38, %v3909_v47  ;;  %v1196_v28 = vmul.f32 %v3153_v46, %v3909_v47 }
 0x190   : > { %v1933_v41 = vadd.f32 %v1838_v16, %v1689_v50  ;;  %v2150_v3 = vsel %vm1009_vm3, %v2148_v4, %v5246_v34  ;;  %v2394_v21 = vsel %vm1254_vm4, %v2392_v60, %v5247_v55  ;;  %v1509_v30 = vmul.f32 %v3216_v39, %v4136_v24 }
 0x191   : > { %v2527_v62 = vadd.f32 %v4155_v18, %v2488_v37  ;;  %v1073_v29 = vrot.slane %v951_v19, 1  ;;  %v1318_v49 = vrot.slane %v1196_v28, 2  ;;  %v1753_v32 = vmul.f32 %v3219_v35, %v4136_v24 }
 0x192   : > { %v2001_v47 = vadd.f32 %v1969_v27, %v1933_v41  ;;  %v1428_v16 = vmul.f32 %v3231_v52, %v3982_v40  ;;  %v1630_v50 = vrot.slane %v1509_v30, 1  ;;  %v2065_v4 = vmul.f32 %v3237_v54, %v4365_v8 }
 0x193   : > { %v2559_v34 = vmax.f32 %v2527_v62, 0.0  ;;  %v1074_v60 = vsel %vm1009_vm3, %v1071_v2, %v1073_v29  ;;  %v1319_v37 = vsel %vm1254_vm4, %v1316_v51, %v1318_v49  ;;  %v1874_v19 = vrot.slane %v1753_v32, 2 }
 0x194   : > { %v2245_v28 = vadd.f32 %v2150_v3, %v2001_v47  ;;  %v1147_v55 = vadd.f32 %v1074_v60, %v870_v22  ;;  %v1984_v27 = vmul.f32 %v3234_v53, %v4207_v45  ;;  %v2186_v41 = vrot.slane %v2065_v4, 1  ;;  %v4429_v60 = vld [vmem:[#allocation2 + $0x168] sm:$0xff] }
 0x195   : > { %2627 = vrot.lane.b32.xlu1 %v2559_v34, %s2962_s15  ;;  %v1631_v30 = vsel %vm1009_vm3, %v1628_v12, %v1630_v50  ;;  %v1875_v14 = vsel %vm1254_vm4, %v1872_v36, %v1874_v19  ;;  %v2309_v57 = vmul.f32 %v4057_v63, %v4365_v8  ;;  %v952_v2 = vmul.f32 %v3146_v38, %v3970_v20 }
 0x196   : > { %v2489_v51 = vadd.f32 %v2394_v21, %v2245_v28  ;;  %v1392_v22 = vadd.f32 %v1319_v37, %v1147_v55  ;;  %v871_v3 = vmul.f32 %v3161_v48, %v3970_v20  ;;  %v4411_v56 = vmul.f32 %v3146_v38, %v3982_v40  ;;  %v4431_v37 = vld [vmem:[#allocation2 + $0x170] sm:$0xff] }
 0x197   : > { %v5282_v12 = vrot.slane %v4234_v6, 1  ;;  %v1075_v36 = vrot.slane %v952_v2, 1  ;;  %v1197_v34 = vmul.f32 %v3153_v46, %v3970_v20  ;;  %v4420_v62 = vmul.f32 %v3153_v46, %v3982_v40 }
 0x198   : > { %v2528_v55 = vadd.f32 %v4155_v18, %v2489_v51  ;;  %v1460_v21 = vadd.f32 %v1428_v16, %v1392_v22  ;;  %v2430_v29 = vrot.slane %v2309_v57, 2  ;;  %v1076_v49 = vrot.slane %v4411_v56, 1 }
 0x199   : > { %v2187_v25 = vsel %vm1009_vm3, %v5282_v12, %v2186_v41  ;;  %v1320_v32 = vrot.slane %v1197_v34, 2  ;;  %v1321_v47 = vrot.slane %v4420_v62, 2  ;;  %v1429_v6 = vmul.f32 %v3231_v52, %v4205_v9 }
 0x19a   : > { %v1510_v50 = vmul.f32 %v3216_v39, %v4205_v9  ;;  %v2560_v20 = vmax.f32 %v2528_v55, 0.0  ;;  %v1704_v4 = vadd.f32 %v1631_v30, %v1460_v21  ;;  %v1077_v16 = vsel %vm1009_vm3, %v1075_v36, %v1076_v49 }
 0x19b   : > { %v4438_v19 = vmul.f32 %v3216_v39, %v4207_v45  ;;  %v1148_v28 = vadd.f32 %v1077_v16, %v871_v3  ;;  %v1322_v41 = vsel %vm1254_vm4, %v1320_v32, %v1321_v47  ;;  %v1754_v30 = vmul.f32 %v3219_v35, %v4205_v9 }
 0x19c   : > { %v1632_v57 = vrot.slane %v1510_v50, 1  ;;  %2635 = vrot.lane.b32.xlu0 %v2560_v20, %s2962_s15  ;;  %v1948_v2 = vadd.f32 %v1875_v14, %v1704_v4  ;;  %v2431_v51 = vsel %vm1254_vm4, %v2428_v42, %v2430_v29  ;;  %v4452_v3 = vmul.f32 %v3219_v35, %v4207_v45 }
 0x19d   : > { %v1633_v22 = vrot.slane %v4438_v19, 1  ;;  %v1393_v12 = vadd.f32 %v1322_v41, %v1148_v28  ;;  %v1876_v36 = vrot.slane %v1754_v30, 2  ;;  %v2066_v34 = vmul.f32 %v3237_v54, %v4429_v60 }
 0x19e   : > { %v4458_v55 = vmul.f32 %v3237_v54, %v4431_v37  ;;  %v2016_v14 = vadd.f32 %v1984_v27, %v1948_v2  ;;  %v5249_v42 = vrot.slane %v4452_v3, 2  ;;  %v2310_v21 = vmul.f32 %v4057_v63, %v4429_v60 }
 0x19f   : > { %v1634_v61 = vsel %vm1009_vm3, %v1632_v57, %v1633_v22  ;;  %v1461_v29 = vadd.f32 %v1429_v6, %v1393_v12  ;;  %v2188_v32 = vrot.slane %v2066_v34, 1  ;;  %v4469_v20 = vmul.f32 %v4057_v63, %v4431_v37 }
 0x1a0   : > { %v5248_v50 = vrot.slane %v4458_v55, 1  ;;  %v2260_v4 = vadd.f32 %v2187_v25, %v2016_v14  ;;  %v1878_v27 = vsel %vm1254_vm4, %v1876_v36, %v5249_v42  ;;  %v1985_v16 = vmul.f32 %v3234_v53, %v4429_v60 }
 0x1a1   : > { %v2432_v28 = vrot.slane %v2310_v21, 2  ;;  %v1705_v41 = vadd.f32 %v1634_v61, %v1461_v29  ;;  %v2433_v57 = vrot.slane %v4469_v20, 2  ;;  %v856_v6 = vmul.f32 %v3161_v48, %v3861_v1  ;;  %v4496_v29 = vld [vmem:[#allocation2 + $0xb8] sm:$0x3] }
 0x1a2   : > { %v930_v30 = vmul.f32 %v3146_v38, %v4024_v15  ;;  %v2504_v2 = vadd.f32 %v2431_v51, %v2260_v4  ;;  %v2190_v25 = vsel %vm1009_vm3, %v2188_v32, %v5248_v50  ;;  %v1175_v12 = vmul.f32 %v3153_v46, %v4024_v15 }
 0x1a3   : > { %v1488_v36 = vmul.f32 %v3216_v39, %v4260_v0  ;;  %v1949_v34 = vadd.f32 %v1878_v27, %v1705_v41  ;;  %v1414_v61 = vmul.f32 %v3231_v52, %v4093_v58  ;;  %v1732_v1 = vmul.f32 %v3219_v35, %v4260_v0 }
 0x1a4   : > { %v1038_v14 = vrot.slane %v930_v30, 1  ;;  %v2543_v51 = vadd.f32 %v4155_v18, %v2504_v2  ;;  %v2434_v21 = vsel %vm1254_vm4, %v2432_v28, %v2433_v57  ;;  %v1283_v15 = vrot.slane %v1175_v12, 2 }
 0x1a5   : > { %v1595_v32 = vrot.slane %v1488_v36, 1  ;;  %v2017_v4 = vadd.f32 %v1985_v16, %v1949_v34  ;;  %v1839_v41 = vrot.slane %v1732_v1, 2  ;;  %v2044_v30 = vmul.f32 %v3237_v54, %v4496_v29 }
 0x1a6   : > { %v1039_v27 = vsel %vm1009_vm3, %v1036_v23, %v1038_v14  ;;  %v2575_v50 = vmax.f32 %v2543_v51, 0.0  ;;  %v1284_v2 = vsel %vm1254_vm4, %v1281_v13, %v1283_v15  ;;  %v1970_v28 = vmul.f32 %v3234_v53, %v4339_v26 }
 0x1a7   : > { %v1133_v42 = vadd.f32 %v1039_v27, %v856_v6  ;;  %v2261_v12 = vadd.f32 %v2190_v25, %v2017_v4  ;;  %v1596_v43 = vsel %vm1009_vm3, %v1593_v7, %v1595_v32  ;;  %v2151_v16 = vrot.slane %v2044_v30, 1 }
 0x1a8   : > { %v2288_v23 = vmul.f32 %v4057_v63, %v4496_v29  ;;  %2707 = vrot.lane.b32.xlu1 %v2575_v50, %s2962_s15  ;;  %v1840_v17 = vsel %vm1254_vm4, %v1837_v10, %v1839_v41  ;;  %v931_v13 = vmul.f32 %v3146_v38, %v4091_v44  ;;  %v4521_v6 = vmul.f32 %v3146_v38, %v4093_v58 }
 0x1a9   : > { %v1378_v36 = vadd.f32 %v1284_v2, %v1133_v42  ;;  %v2505_v5 = vadd.f32 %v2434_v21, %v2261_v12  ;;  %v5283_v7 = vrot.slane %v4347_v59, 1  ;;  %v857_v50 = vmul.f32 %v3161_v48, %v4091_v44 }
 0x1aa   : > { %v1176_v33 = vmul.f32 %v3153_v46, %v4091_v44  ;;  %v1040_v10 = vrot.slane %v931_v13, 1  ;;  %v1041_v34 = vrot.slane %v4521_v6, 1  ;;  %v4533_v14 = vmul.f32 %v3153_v46, %v4093_v58  ;;  %v4561_v13 = vld [vmem:[#allocation2 + $0xc0] sm:$0xff] }
 0x1ab   : > { %v2152_v25 = vsel %vm1009_vm3, %v5283_v7, %v2151_v16  ;;  %v1446_v42 = vadd.f32 %v1414_v61, %v1378_v36  ;;  %v2544_v1 = vadd.f32 %v4155_v18, %v2505_v5  ;;  %v2395_v51 = vrot.slane %v2288_v23, 2  ;;  %v4563_v5 = vld [vmem:[#allocation2 + $0xc8] sm:$0xff] }
 0x1ac   : > { %v1285_v59 = vrot.slane %v1176_v33, 2  ;;  %v1415_v21 = vmul.f32 %v3231_v52, %v4337_v11  ;;  %v1042_v44 = vsel %vm1009_vm3, %v1040_v10, %v1041_v34  ;;  %v1286_v61 = vrot.slane %v4533_v14, 2 }
 0x1ad   : > { %v1690_v15 = vadd.f32 %v1596_v43, %v1446_v42  ;;  %v1489_v32 = vmul.f32 %v3216_v39, %v4337_v11  ;;  %v2576_v4 = vmax.f32 %v2544_v1, 0.0  ;;  %v1134_v27 = vadd.f32 %v1042_v44, %v857_v50 }
 0x1ae   : > { %v4546_v41 = vmul.f32 %v3216_v39, %v4339_v26  ;;  %v1733_v30 = vmul.f32 %v3219_v35, %v4337_v11  ;;  %v1287_v12 = vsel %vm1254_vm4, %v1285_v59, %v1286_v61  ;;  %v4555_v16 = vmul.f32 %v3219_v35, %v4339_v26 }
 0x1af   : > { %v1934_v2 = vadd.f32 %v1840_v17, %v1690_v15  ;;  %v1597_v43 = vrot.slane %v1489_v32, 1  ;;  %2715 = vrot.lane.b32.xlu0 %v2576_v4, %s2962_s15  ;;  %v5284_v23 = vrot.slane %v4356_v31, 2  ;;  %v1379_v17 = vadd.f32 %v1287_v12, %v1134_v27 }
 0x1b0   : > { %v1598_v7 = vrot.slane %v4546_v41, 1  ;;  %v1841_v50 = vrot.slane %v1733_v30, 2  ;;  %v1842_v42 = vrot.slane %v4555_v16, 2  ;;  %v2045_v10 = vmul.f32 %v3237_v54, %v4561_v13 }
 0x1b1   : > { %v2396_v36 = vsel %vm1254_vm4, %v5284_v23, %v2395_v51  ;;  %v2002_v33 = vadd.f32 %v1970_v28, %v1934_v2  ;;  %v4571_v1 = vmul.f32 %v3237_v54, %v4563_v5  ;;  %v1447_v31 = vadd.f32 %v1415_v21, %v1379_v17 }
 0x1b2   : > { %v1599_v51 = vsel %vm1009_vm3, %v1597_v43, %v1598_v7  ;;  %v2289_v59 = vmul.f32 %v4057_v63, %v4561_v13  ;;  %v4580_v28 = vmul.f32 %v4057_v63, %v4563_v5  ;;  %v1843_v44 = vsel %vm1254_vm4, %v1841_v50, %v1842_v42  ;;  %v4589_v43 = vld [vmem:[#allocation2 + $0x178] sm:$0x3] }
 0x1b3   : > { %v2246_v15 = vadd.f32 %v2152_v25, %v2002_v33  ;;  %v2153_v32 = vrot.slane %v2045_v10, 1  ;;  %v2154_v4 = vrot.slane %v4571_v1, 1  ;;  %v1691_v21 = vadd.f32 %v1599_v51, %v1447_v31 }
 0x1b4   : > { %v1971_v27 = vmul.f32 %v3234_v53, %v4561_v13  ;;  %v2397_v30 = vrot.slane %v2289_v59, 2  ;;  %v5250_v2 = vrot.slane %v4580_v28, 2  ;;  %v872_v25 = vmul.f32 %v3161_v48, %v3982_v40 }
 0x1b5   : > { %v2490_v12 = vadd.f32 %v2396_v36, %v2246_v15  ;;  %v954_v23 = vmul.f32 %v3146_v38, %v4136_v24  ;;  %v1199_v17 = vmul.f32 %v3153_v46, %v4136_v24  ;;  %v1935_v50 = vadd.f32 %v1843_v44, %v1691_v21 }
 0x1b6   : > { %v2155_v33 = vsel %vm1009_vm3, %v2153_v32, %v2154_v4  ;;  %v2399_v36 = vsel %vm1254_vm4, %v2397_v30, %v5250_v2  ;;  %v1512_v10 = vmul.f32 %v3216_v39, %v4365_v8  ;;  %v1756_v59 = vmul.f32 %v3219_v35, %v4365_v8 }
 0x1b7   : > { %v2529_v40 = vadd.f32 %v4155_v18, %v2490_v12  ;;  %v1078_v31 = vrot.slane %v954_v23, 1  ;;  %v1323_v51 = vrot.slane %v1199_v17, 2  ;;  %v2003_v24 = vadd.f32 %v1971_v27, %v1935_v50 }
 0x1b8   : > { %v1430_v15 = vmul.f32 %v3231_v52, %v4207_v45  ;;  %v1635_v44 = vrot.slane %v1512_v10, 1  ;;  %v2068_v32 = vmul.f32 %v3237_v54, %v4589_v43  ;;  %v1879_v23 = vrot.slane %v1756_v59, 2 }
 0x1b9   : > { %v2561_v21 = vmax.f32 %v2529_v40, 0.0  ;;  %v1079_v30 = vsel %vm1009_vm3, %v1076_v49, %v1078_v31  ;;  %v1324_v12 = vsel %vm1254_vm4, %v1321_v47, %v1323_v51  ;;  %v2247_v17 = vadd.f32 %v2155_v33, %v2003_v24 }
 0x1ba   : > { %v1149_v2 = vadd.f32 %v1079_v30, %v872_v25  ;;  %v1986_v27 = vmul.f32 %v3234_v53, %v4431_v37  ;;  %v2191_v50 = vrot.slane %v2068_v32, 1  ;;  %v1636_v10 = vsel %vm1009_vm3, %v1633_v22, %v1635_v44 }
 0x1bb   : > { %2637 = vrot.lane.b32.xlu1 %v2561_v21, %s2962_s15  ;;  %v5285_v56 = vrot.slane %v4452_v3, 2  ;;  %v2312_v62 = vmul.f32 %v4057_v63, %v4589_v43  ;;  %v955_v47 = vmul.f32 %v3146_v38, %v4205_v9  ;;  %v2491_v25 = vadd.f32 %v2399_v36, %v2247_v17  ;;  %v4655_v17 = vld [vmem:[#allocation2 + $0x188] sm:$0xff] }
 0x1bc   : > { %v1394_v33 = vadd.f32 %v1324_v12, %v1149_v2  ;;  %v873_v40 = vmul.f32 %v3161_v48, %v4205_v9  ;;  %v4635_v19 = vmul.f32 %v3146_v38, %v4207_v45  ;;  %v5286_v22 = vrot.slane %v4458_v55, 1 }
 0x1bd   : > { %v1880_v49 = vsel %vm1254_vm4, %v5285_v56, %v1879_v23  ;;  %v1080_v31 = vrot.slane %v955_v47, 1  ;;  %v1200_v51 = vmul.f32 %v3153_v46, %v4205_v9  ;;  %v4644_v59 = vmul.f32 %v3153_v46, %v4207_v45  ;;  %v4653_v23 = vld [vmem:[#allocation2 + $0x180] sm:$0xff] }
 0x1be   : > { %v2192_v3 = vsel %vm1009_vm3, %v5286_v22, %v2191_v50  ;;  %v2530_v2 = vadd.f32 %v4155_v18, %v2491_v25  ;;  %v1462_v36 = vadd.f32 %v1430_v15, %v1394_v33  ;;  %v2435_v24 = vrot.slane %v2312_v62, 2 }
 0x1bf   : > { %v1081_v44 = vrot.slane %v4635_v19, 1  ;;  %v1325_v32 = vrot.slane %v1200_v51, 2  ;;  %v1326_v21 = vrot.slane %v4644_v59, 2  ;;  %v1431_v55 = vmul.f32 %v3231_v52, %v4429_v60 }
 0x1c0   : > { %v1513_v30 = vmul.f32 %v3216_v39, %v4429_v60  ;;  %v2562_v9 = vmax.f32 %v2530_v2, 0.0  ;;  %v1706_v12 = vadd.f32 %v1636_v10, %v1462_v36  ;;  %v4662_v50 = vmul.f32 %v3216_v39, %v4431_v37 }
 0x1c1   : > { %v1082_v15 = vsel %vm1009_vm3, %v1080_v31, %v1081_v44  ;;  %v1327_v62 = vsel %vm1254_vm4, %v1325_v32, %v1326_v21  ;;  %v1757_v10 = vmul.f32 %v3219_v35, %v4429_v60  ;;  %v2436_v33 = vsel %vm1254_vm4, %v2433_v57, %v2435_v24 }
 0x1c2   : > { %v1150_v56 = vadd.f32 %v1082_v15, %v873_v40  ;;  %v1637_v47 = vrot.slane %v1513_v30, 1  ;;  %2645 = vrot.lane.b32.xlu0 %v2562_v9, %s2962_s15  ;;  %v1950_v25 = vadd.f32 %v1880_v49, %v1706_v12  ;;  %v5253_v22 = vrot.slane %v4662_v50, 1 }
 0x1c3   : > { %v4676_v40 = vmul.f32 %v3219_v35, %v4431_v37  ;;  %v1881_v51 = vrot.slane %v1757_v10, 2  ;;  %v2069_v2 = vmul.f32 %v3237_v54, %v4653_v23  ;;  %v4682_v36 = vmul.f32 %v3237_v54, %v4655_v17 }
 0x1c4   : > { %v1395_v31 = vadd.f32 %v1327_v62, %v1150_v56  ;;  %v2018_v49 = vadd.f32 %v1986_v27, %v1950_v25  ;;  %v1639_v20 = vsel %vm1009_vm3, %v1637_v47, %v5253_v22  ;;  %v2313_v24 = vmul.f32 %v4057_v63, %v4653_v23 }
 0x1c5   : > { %v5252_v57 = vrot.slane %v4676_v40, 2  ;;  %v2193_v30 = vrot.slane %v2069_v2, 1  ;;  %v5251_v9 = vrot.slane %v4682_v36, 1  ;;  %v4693_v12 = vmul.f32 %v4057_v63, %v4655_v17 }
 0x1c6   : > { %v1463_v32 = vadd.f32 %v1431_v55, %v1395_v31  ;;  %v2262_v15 = vadd.f32 %v2192_v3, %v2018_v49  ;;  %v1987_v56 = vmul.f32 %v3234_v53, %v4653_v23  ;;  %v2437_v62 = vrot.slane %v2313_v24, 2 }
 0x1c7   : > { %v1883_v27 = vsel %vm1254_vm4, %v1881_v51, %v5252_v57  ;;  %v2438_v10 = vrot.slane %v4693_v12, 2  ;;  %v858_v55 = vmul.f32 %v3161_v48, %v4093_v58  ;;  %v933_v25 = vmul.f32 %v3146_v38, %v4260_v0 }
 0x1c8   : > { %v1707_v47 = vadd.f32 %v1639_v20, %v1463_v32  ;;  %v2506_v31 = vadd.f32 %v2436_v33, %v2262_v15  ;;  %v2195_v3 = vsel %vm1009_vm3, %v2193_v30, %v5251_v9  ;;  %v1178_v51 = vmul.f32 %v3153_v46, %v4260_v0  ;;  %v4720_v30 = vld [vmem:[#allocation2 + $0xd0] sm:$0x3] }
 0x1c9   : > { %v1491_v2 = vmul.f32 %v3216_v39, %v4496_v29  ;;  %v1043_v20 = vrot.slane %v933_v25, 1  ;;  %v1416_v24 = vmul.f32 %v3231_v52, %v4339_v26  ;;  %v1735_v58 = vmul.f32 %v3219_v35, %v4496_v29 }
 0x1ca   : > { %v1951_v49 = vadd.f32 %v1883_v27, %v1707_v47  ;;  %v2545_v33 = vadd.f32 %v4155_v18, %v2506_v31  ;;  %v2439_v32 = vsel %vm1254_vm4, %v2437_v62, %v2438_v10  ;;  %v1288_v0 = vrot.slane %v1178_v51, 2 }
 0x1cb   : > { %v1600_v15 = vrot.slane %v1491_v2, 1  ;;  %v1044_v27 = vsel %vm1009_vm3, %v1041_v34, %v1043_v20  ;;  %v1844_v47 = vrot.slane %v1735_v58, 2  ;;  %v2047_v25 = vmul.f32 %v3237_v54, %v4720_v30 }
 0x1cc   : > { %v2019_v9 = vadd.f32 %v1987_v56, %v1951_v49  ;;  %v2577_v57 = vmax.f32 %v2545_v33, 0.0  ;;  %v1135_v22 = vadd.f32 %v1044_v27, %v858_v55  ;;  %v1289_v31 = vsel %vm1254_vm4, %v1286_v61, %v1288_v0 }
 0x1cd   : > { %v1972_v62 = vmul.f32 %v3234_v53, %v4563_v5  ;;  %v1601_v6 = vsel %vm1009_vm3, %v1598_v7, %v1600_v15  ;;  %v2156_v56 = vrot.slane %v2047_v25, 1  ;;  %v2291_v34 = vmul.f32 %v4057_v63, %v4720_v30 }
 0x1ce   : > { %v2263_v51 = vadd.f32 %v2195_v3, %v2019_v9  ;;  %2717 = vrot.lane.b32.xlu1 %v2577_v57, %s2962_s15  ;;  %v1380_v2 = vadd.f32 %v1289_v31, %v1135_v22  ;;  %v1845_v14 = vsel %vm1254_vm4, %v1842_v42, %v1844_v47  ;;  %v934_v61 = vmul.f32 %v3146_v38, %v4337_v11 }
 0x1cf   : > { %v4745_v9 = vmul.f32 %v3146_v38, %v4339_v26  ;;  %v2157_v7 = vsel %vm1009_vm3, %v2154_v4, %v2156_v56  ;;  %v859_v63 = vmul.f32 %v3161_v48, %v4337_v11  ;;  %v1179_v16 = vmul.f32 %v3153_v46, %v4337_v11 }
 0x1d0   : > { %v2507_v41 = vadd.f32 %v2439_v32, %v2263_v51  ;;  %v1448_v22 = vadd.f32 %v1416_v24, %v1380_v2  ;;  %v1045_v42 = vrot.slane %v934_v61, 1  ;;  %v4757_v55 = vmul.f32 %v3153_v46, %v4339_v26 }
 0x1d1   : > { %v1046_v57 = vrot.slane %v4745_v9, 1  ;;  %v2400_v49 = vrot.slane %v2291_v34, 2  ;;  %v1290_v1 = vrot.slane %v1179_v16, 2  ;;  %v1417_v4 = vmul.f32 %v3231_v52, %v4561_v13  ;;  %v4791_v16 = vld [vmem:[#allocation2 + $0xe0] sm:$0xff] }
 0x1d2   : > { %v2546_v3 = vadd.f32 %v4155_v18, %v2507_v41  ;;  %v1692_v20 = vadd.f32 %v1601_v6, %v1448_v22  ;;  %v1291_v24 = vrot.slane %v4757_v55, 2  ;;  %v1492_v58 = vmul.f32 %v3216_v39, %v4561_v13  ;;  %v4787_v41 = vld [vmem:[#allocation2 + $0xd8] sm:$0xff] }
 0x1d3   : > { %v1047_v11 = vsel %vm1009_vm3, %v1045_v42, %v1046_v57  ;;  %v4770_v0 = vmul.f32 %v3216_v39, %v4563_v5  ;;  %v1736_v15 = vmul.f32 %v3219_v35, %v4561_v13  ;;  %v4779_v31 = vmul.f32 %v3219_v35, %v4563_v5 }
 0x1d4   : > { %v2578_v33 = vmax.f32 %v2546_v3, 0.0  ;;  %v1136_v32 = vadd.f32 %v1047_v11, %v859_v63  ;;  %v1936_v27 = vadd.f32 %v1845_v14, %v1692_v20  ;;  %v1292_v47 = vsel %vm1254_vm4, %v1290_v1, %v1291_v24 }
 0x1d5   : > { %v1602_v25 = vrot.slane %v1492_v58, 1  ;;  %v5287_v51 = vrot.slane %v4580_v28, 2  ;;  %v5262_v34 = vrot.slane %v4770_v0, 1  ;;  %v1846_v2 = vrot.slane %v1736_v15, 2 }
 0x1d6   : > { %2725 = vrot.lane.b32.xlu0 %v2578_v33, %s2962_s15  ;;  %v1381_v56 = vadd.f32 %v1292_v47, %v1136_v32  ;;  %v2004_v14 = vadd.f32 %v1972_v62, %v1936_v27  ;;  %v5261_v61 = vrot.slane %v4779_v31, 2  ;;  %v2048_v63 = vmul.f32 %v4787_v41, %v3237_v54  ;;  %v4803_v62 = vld [vmem:[%s5229_s4 + $0x8] ss:$0 sm:$0xff]  ;;  %v4818_v27 = vpop.permute.xlu0 %2584 }
 0x1d7   : > { %v2401_v6 = vsel %vm1254_vm4, %v5287_v51, %v2400_v49  ;;  %v4795_v22 = vmul.f32 %v4791_v16, %v3237_v54  ;;  %v1604_v42 = vsel %vm1009_vm3, %v1602_v25, %v5262_v34  ;;  %v2292_v3 = vmul.f32 %v4803_v62, %v4787_v41  ;;  %v4820_v25 = vld [vmem:[#allocation2 + $0x190] sm:$0x3]  ;;  %2591 = vst.msk [vmem:[%s3176_s10] sm:$0xff] %vm2590_vm5, %v4818_v27 }
 0x1d8   : > { %v1449_v28 = vadd.f32 %v1417_v4, %v1381_v56  ;;  %v4809_v49 = vmul.f32 %v4803_v62, %v4791_v16  ;;  %v2248_v1 = vadd.f32 %v2157_v7, %v2004_v14  ;;  %v1848_v4 = vsel %vm1254_vm4, %v1846_v2, %v5261_v61 }
 0x1d9   : > { %v2158_v20 = vrot.slane %v2048_v63, 1  ;;  %v5260_v11 = vrot.slane %v4795_v22, 1  ;;  %v1973_v33 = vmul.f32 %v4787_v41, %v3234_v53  ;;  %v2402_v32 = vrot.slane %v2292_v3, 2 }
 0x1da   : > { %v1693_v58 = vadd.f32 %v1604_v42, %v1449_v28  ;;  %v5254_v15 = vrot.slane %v4809_v49, 2  ;;  %v2492_v47 = vadd.f32 %v2401_v6, %v2248_v1  ;;  %v874_v7 = vmul.f32 %v3161_v48, %v4207_v45 }
 0x1db   : > { %v957_v51 = vmul.f32 %v3146_v38, %v4365_v8  ;;  %v1202_v56 = vmul.f32 %v3153_v46, %v4365_v8  ;;  %v2160_v14 = vsel %vm1009_vm3, %v2158_v20, %v5260_v11  ;;  %v1515_v63 = vmul.f32 %v3216_v39, %v4589_v43 }
 0x1dc   : > { %v1937_v2 = vadd.f32 %v1848_v4, %v1693_v58  ;;  %v2404_v6 = vsel %vm1254_vm4, %v2402_v32, %v5254_v15  ;;  %v2531_v45 = vadd.f32 %v4155_v18, %v2492_v47  ;;  %v1759_v3 = vmul.f32 %v3219_v35, %v4589_v43 }
 0x1dd   : > { %v1083_v28 = vrot.slane %v957_v51, 1  ;;  %v1328_v42 = vrot.slane %v1202_v56, 2  ;;  %v1432_v1 = vmul.f32 %v3231_v52, %v4431_v37  ;;  %v1640_v4 = vrot.slane %v1515_v63, 1  ;;  %v4851_v63 = vpop.permute.xlu0 %2586 }
 0x1de   : > { %v2005_v8 = vadd.f32 %v1973_v33, %v1937_v2  ;;  %v2071_v20 = vmul.f32 %v3237_v54, %v4820_v25  ;;  %v2563_v58 = vmax.f32 %v2531_v45, 0.0  ;;  %v1884_v51 = vrot.slane %v1759_v3, 2  ;;  %2592 = vst.msk [vmem:[%s3176_s10 + $0x8] sm:$0xff] %vm2590_vm5, %v4851_v63 }
 0x1df   : > { %v1084_v32 = vsel %vm1009_vm3, %v1081_v44, %v1083_v28  ;;  %v1329_v47 = vsel %vm1254_vm4, %v1326_v21, %v1328_v42  ;;  %v1988_v33 = vmul.f32 %v3234_v53, %v4655_v17  ;;  %v5288_v45 = vrot.slane %v4662_v50, 1 }
 0x1e0   : > { %v2249_v56 = vadd.f32 %v2160_v14, %v2005_v8  ;;  %v1151_v15 = vadd.f32 %v1084_v32, %v874_v7  ;;  %v2196_v2 = vrot.slane %v2071_v20, 1  ;;  %2647 = vrot.lane.b32.xlu1 %v2563_v58, %s2962_s15  ;;  %v5289_v44 = vrot.slane %v4676_v40, 2  ;;  %v4864_v14 = vpop.permute.xlu1 %2595 }
 0x1e1   : > { %v1641_v19 = vsel %vm1009_vm3, %v5288_v45, %v1640_v4  ;;  %v2315_v21 = vmul.f32 %v4803_v62, %v4820_v25  ;;  %v937_v7 = vmul.f32 %v3146_v38, %v4561_v13  ;;  %v861_v3 = vmul.f32 %v3161_v48, %v4561_v13  ;;  %2601 = vst.msk [vmem:[%s3176_s10 + $0x10] sm:$0xff] %vm2590_vm5, %v4864_v14 }
 0x1e2   : > { %v1885_v59 = vsel %vm1254_vm4, %v5289_v44, %v1884_v51  ;;  %v2493_v28 = vadd.f32 %v2404_v6, %v2249_v56  ;;  %v1396_v42 = vadd.f32 %v1329_v47, %v1151_v15  ;;  %v4870_v50 = vmul.f32 %v3146_v38, %v4563_v5 }
 0x1e3   : > { %v2440_v40 = vrot.slane %v2315_v21, 2  ;;  %v1050_v8 = vrot.slane %v937_v7, 1  ;;  %v1182_v4 = vmul.f32 %v3153_v46, %v4561_v13  ;;  %v4876_v20 = vmul.f32 %v3153_v46, %v4563_v5 }
 0x1e4   : > { %v2532_v58 = vadd.f32 %v4155_v18, %v2493_v28  ;;  %v1464_v6 = vadd.f32 %v1432_v1, %v1396_v42  ;;  %v5290_v15 = vrot.slane %v4682_v36, 1  ;;  %v5256_v47 = vrot.slane %v4870_v50, 1  ;;  %v4895_v1 = vpop.permute.xlu0 %2675  ;;  %v4905_v42 = vpop.permute.xlu1 %2597 }
 0x1e5   : > { %v1295_v51 = vrot.slane %v1182_v4, 2  ;;  %v5255_v56 = vrot.slane %v4876_v20, 2  ;;  %v1419_v45 = vmul.f32 %v4787_v41, %v3231_v52  ;;  %v1495_v13 = vmul.f32 %v4787_v41, %v3216_v39  ;;  %2681 = vst.msk [vmem:[%s3176_s10 + $0x90] sm:$0xff] %vm2590_vm5, %v4895_v1  ;;  %2602 = vst.msk [vmem:[%s3176_s10 + $0x18] sm:$0xff] %vm2590_vm5, %v4905_v42 }
 0x1e6   : > { %v2197_v32 = vsel %vm1009_vm3, %v5290_v15, %v2196_v2  ;;  %v2564_v44 = vmax.f32 %v2532_v58, 0.0  ;;  %v1708_v21 = vadd.f32 %v1641_v19, %v1464_v6  ;;  %v1052_v18 = vsel %vm1009_vm3, %v1050_v8, %v5256_v47  ;;  %v4914_v15 = vld [vmem:[#allocation2 + $0xf8] sm:$0xff] }
 0x1e7   : > { %v4893_v36 = vmul.f32 %v4791_v16, %v3216_v39  ;;  %v2441_v2 = vsel %vm1254_vm4, %v2438_v10, %v2440_v40  ;;  %v1138_v7 = vadd.f32 %v1052_v18, %v861_v3  ;;  %v1297_v28 = vsel %vm1254_vm4, %v1295_v51, %v5255_v56  ;;  %v2948_v40 = vld [vmem:[#allocation2 + $0xf0] sm:$0xff] }
 0x1e8   : > { %v1739_v19 = vmul.f32 %v4787_v41, %v3219_v35  ;;  %2655 = vrot.lane.b32.xlu0 %v2564_v44, %s2962_s15  ;;  %v1952_v8 = vadd.f32 %v1885_v59, %v1708_v21  ;;  %v1607_v4 = vrot.slane %v1495_v13, 1  ;;  %v4911_v12 = vmul.f32 %v4791_v16, %v3219_v35  ;;  %v4934_v47 = vpop.permute.xlu0 %2605 }
 0x1e9   : > { %v5259_v58 = vrot.slane %v4893_v36, 1  ;;  %v1383_v10 = vadd.f32 %v1297_v28, %v1138_v7  ;;  %v2051_v6 = vmul.f32 %v2948_v40, %v3237_v54  ;;  %v4918_v41 = vmul.f32 %v4914_v15, %v3237_v54  ;;  %2611 = vst.msk [vmem:[%s3176_s10 + $0x20] sm:$0xff] %vm2590_vm5, %v4934_v47 }
 0x1ea   : > { %v1851_v3 = vrot.slane %v1739_v19, 2  ;;  %v2020_v51 = vadd.f32 %v1988_v33, %v1952_v8  ;;  %v5257_v59 = vrot.slane %v4911_v12, 2  ;;  %v1975_v13 = vmul.f32 %v2948_v40, %v3234_v53 }
 0x1eb   : > { %v2295_v44 = vmul.f32 %v2948_v40, %v4803_v62  ;;  %v1451_v21 = vadd.f32 %v1419_v45, %v1383_v10  ;;  %v2163_v18 = vrot.slane %v2051_v6, 1  ;;  %v5258_v7 = vrot.slane %v4918_v41, 1  ;;  %v4941_v6 = vpop.permute.xlu1 %2677 }
 0x1ec   : > { %v4926_v28 = vmul.f32 %v4914_v15, %v4803_v62  ;;  %v2264_v19 = vadd.f32 %v2197_v32, %v2020_v51  ;;  %v1609_v56 = vsel %vm1009_vm3, %v1607_v4, %v5259_v58  ;;  %v1853_v33 = vsel %vm1254_vm4, %v1851_v3, %v5257_v59  ;;  %v4966_v58 = vld [vmem:[#allocation2 + $0xe8] sm:$0x3]  ;;  %2682 = vst.msk [vmem:[%s3176_s10 + $0x98] sm:$0xff] %vm2590_vm5, %v4941_v6 }
 0x1ed   : > { %v2407_v8 = vrot.slane %v2295_v44, 2  ;;  %v1695_v45 = vadd.f32 %v1609_v56, %v1451_v21  ;;  %v860_v40 = vmul.f32 %v3161_v48, %v4339_v26  ;;  %v936_v32 = vmul.f32 %v3146_v38, %v4496_v29 }
 0x1ee   : > { %v5263_v10 = vrot.slane %v4926_v28, 2  ;;  %v2508_v51 = vadd.f32 %v2441_v2, %v2264_v19  ;;  %v2165_v4 = vsel %vm1009_vm3, %v2163_v18, %v5258_v7  ;;  %v1181_v3 = vmul.f32 %v3153_v46, %v4496_v29  ;;  %v4957_v2 = vld [vmem:[%s5230_s5] ss:$0 sm:$0xff] }
 0x1ef   : > { %v1494_v56 = vmul.f32 %v3216_v39, %v4720_v30  ;;  %v1939_v44 = vadd.f32 %v1853_v33, %v1695_v45  ;;  %v1048_v21 = vrot.slane %v936_v32, 1  ;;  %v1418_v26 = vmul.f32 %v3231_v52, %v4563_v5 }
 0x1f0   : > { %v1738_v59 = vmul.f32 %v3219_v35, %v4720_v30  ;;  %v2547_v18 = vadd.f32 %v4957_v2, %v2508_v51  ;;  %v2409_v29 = vsel %vm1254_vm4, %v2407_v8, %v5263_v10  ;;  %v1293_v19 = vrot.slane %v1181_v3, 2 }
 0x1f1   : > { %v1605_v33 = vrot.slane %v1494_v56, 1  ;;  %v2007_v45 = vadd.f32 %v1975_v13, %v1939_v44  ;;  %v1049_v32 = vsel %vm1009_vm3, %v1046_v57, %v1048_v21  ;;  %v2050_v11 = vmul.f32 %v4966_v58, %v3237_v54  ;;  %v4975_v13 = vpop.permute.xlu0 %2685  ;;  %v4982_v44 = vpop.permute.xlu1 %2607 }
 0x1f2   : > { %v1849_v7 = vrot.slane %v1738_v59, 2  ;;  %v2579_v61 = vmax.f32 %v2547_v18, 0.0  ;;  %v1137_v34 = vadd.f32 %v1049_v32, %v860_v40  ;;  %v1294_v51 = vsel %vm1254_vm4, %v1291_v24, %v1293_v19  ;;  %2691 = vst.msk [vmem:[%s3176_s10 + $0xa0] sm:$0xff] %vm2590_vm5, %v4975_v13  ;;  %2612 = vst.msk [vmem:[%s3176_s10 + $0x28] sm:$0xff] %vm2590_vm5, %v4982_v44 }
 0x1f3   : > { %v1974_v8 = vmul.f32 %v4791_v16, %v3234_v53  ;;  %v2251_v9 = vadd.f32 %v2165_v4, %v2007_v45  ;;  %v5291_v57 = vrot.slane %v4770_v0, 1  ;;  %v2161_v3 = vrot.slane %v2050_v11, 1 }
 0x1f4   : > { %v2294_v56 = vmul.f32 %v4966_v58, %v4803_v62  ;;  %2727 = vrot.lane.b32.xlu1 %v2579_v61, %s2962_s15  ;;  %v1382_v55 = vadd.f32 %v1294_v51, %v1137_v34  ;;  %v5292_v24 = vrot.slane %v4779_v31, 2  ;;  %v958_v4 = vmul.f32 %v3146_v38, %v4429_v60 }
 0x1f5   : > { %v1606_v59 = vsel %vm1009_vm3, %v5291_v57, %v1605_v33  ;;  %v4992_v0 = vmul.f32 %v3146_v38, %v4431_v37  ;;  %v2495_v11 = vadd.f32 %v2409_v29, %v2251_v9  ;;  %v5293_v21 = vrot.slane %v4795_v22, 1  ;;  %v5015_v57 = vpop.permute.xlu0 %2615 }
 0x1f6   : > { %v1850_v40 = vsel %vm1254_vm4, %v5292_v24, %v1849_v7  ;;  %v875_v61 = vmul.f32 %v3161_v48, %v4429_v60  ;;  %v1203_v31 = vmul.f32 %v3153_v46, %v4429_v60  ;;  %v1450_v34 = vadd.f32 %v1418_v26, %v1382_v55  ;;  %v836_v55 = vld [vmem:[#allocation2 + $0x198] sm:$0xff]  ;;  %v5017_v24 = vld [vmem:[#allocation2 + $0x1a0] sm:$0xff]  ;;  %2621 = vst.msk [vmem:[%s3176_s10 + $0x30] sm:$0xff] %vm2590_vm5, %v5015_v57 }
 0x1f7   : > { %v2162_v18 = vsel %vm1009_vm3, %v5293_v21, %v2161_v3  ;;  %v1085_v7 = vrot.slane %v958_v4, 1  ;;  %v5266_v19 = vrot.slane %v4992_v0, 1  ;;  %v5004_v33 = vmul.f32 %v3153_v46, %v4431_v37 }
 0x1f8   : > { %v2534_v29 = vadd.f32 %v4957_v2, %v2495_v11  ;;  %v2405_v45 = vrot.slane %v2294_v56, 2  ;;  %v1330_v22 = vrot.slane %v1203_v31, 2  ;;  %v1433_v32 = vmul.f32 %v3231_v52, %v4653_v23  ;;  %v5025_v11 = vpop.permute.xlu1 %2687 }
 0x1f9   : > { %v1694_v51 = vadd.f32 %v1606_v59, %v1450_v34  ;;  %v1087_v60 = vsel %vm1009_vm3, %v1085_v7, %v5266_v19  ;;  %v5264_v26 = vrot.slane %v5004_v33, 2  ;;  %v1516_v9 = vmul.f32 %v3216_v39, %v4653_v23  ;;  %2692 = vst.msk [vmem:[%s3176_s10 + $0xa8] sm:$0xff] %vm2590_vm5, %v5025_v11 }
 0x1fa   : > { %v2566_v3 = vmax.f32 %v2534_v29, 0.0  ;;  %v1152_v56 = vadd.f32 %v1087_v60, %v875_v61  ;;  %v5021_v4 = vmul.f32 %v3216_v39, %v4655_v17  ;;  %v1760_v59 = vmul.f32 %v3219_v35, %v4653_v23 }
 0x1fb   : > { %v1938_v21 = vadd.f32 %v1850_v40, %v1694_v51  ;;  %v1332_v31 = vsel %vm1254_vm4, %v1330_v22, %v5264_v26  ;;  %v1642_v34 = vrot.slane %v1516_v9, 1  ;;  %v5032_v7 = vmul.f32 %v3219_v35, %v4655_v17 }
 0x1fc   : > { %2665 = vrot.lane.b32.xlu0 %v2566_v3, %s2962_s15  ;;  %v5294_v61 = vrot.slane %v4809_v49, 2  ;;  %v1397_v60 = vadd.f32 %v1332_v31, %v1152_v56  ;;  %v5265_v23 = vrot.slane %v5021_v4, 1  ;;  %v1886_v10 = vrot.slane %v1760_v59, 2  ;;  %v5057_v31 = vpop.permute.xlu0 %2695 }
 0x1fd   : > { %v2006_v40 = vadd.f32 %v1974_v8, %v1938_v21  ;;  %v5267_v51 = vrot.slane %v5032_v7, 2  ;;  %v2072_v22 = vmul.f32 %v3237_v54, %v836_v55  ;;  %v5043_v9 = vmul.f32 %v3237_v54, %v5017_v24  ;;  %2701 = vst.msk [vmem:[%s3176_s10 + $0xb0] sm:$0xff] %vm2590_vm5, %v5057_v31 }
 0x1fe   : > { %v2406_v29 = vsel %vm1254_vm4, %v5294_v61, %v2405_v45  ;;  %v1465_v26 = vadd.f32 %v1433_v32, %v1397_v60  ;;  %v1644_v49 = vsel %vm1009_vm3, %v1642_v34, %v5265_v23  ;;  %v2316_v45 = vmul.f32 %v4803_v62, %v836_v55  ;;  %v5061_v23 = vpop.permute.xlu1 %2617 }
 0x1ff   : > { %5295 = vst [vmem:[#allocation3_spill] sm:$0xff] %v5043_v9  ;;  %v5051_v3 = vmul.f32 %v4803_v62, %v5017_v24  ;;  %v2250_v8 = vadd.f32 %v2162_v18, %v2006_v40  ;;  %v1888_v56 = vsel %vm1254_vm4, %v1886_v10, %v5267_v51  ;;  %v2198_v59 = vrot.slane %v2072_v22, 1  ;;  %2622 = vst.msk [vmem:[%s3176_s10 + $0x38] sm:$0xff] %vm2590_vm5, %v5061_v23 }
 0x200   : > { %v2199_v21 = vrot.slane %v5043_v9, 1  ;;  %v1709_v32 = vadd.f32 %v1644_v49, %v1465_v26  ;;  %v1989_v61 = vmul.f32 %v3234_v53, %v836_v55  ;;  %v2442_v34 = vrot.slane %v2316_v45, 2 }
 0x201   : > { %v2443_v60 = vrot.slane %v5051_v3, 2  ;;  %v2494_v19 = vadd.f32 %v2406_v29, %v2250_v8  ;;  %v939_v18 = vmul.f32 %v3146_v38, %v4720_v30  ;;  %v1184_v10 = vmul.f32 %v3153_v46, %v4720_v30 }
 0x202   : > { %v1953_v40 = vadd.f32 %v1888_v56, %v1709_v32  ;;  %v862_v22 = vmul.f32 %v3161_v48, %v4563_v5  ;;  %v1497_v26 = vmul.f32 %v4966_v58, %v3216_v39  ;;  %v2200_v49 = vsel %vm1009_vm3, %v2198_v59, %v2199_v21 }
 0x203   : > { %v2533_v55 = vadd.f32 %v4957_v2, %v2494_v19  ;;  %v1053_v29 = vrot.slane %v939_v18, 1  ;;  %v1298_v45 = vrot.slane %v1184_v10, 2  ;;  %v2444_v30 = vsel %vm1254_vm4, %v2442_v34, %v2443_v60  ;;  %v2626_v18 = vpop.permute.xlu0 %2625 }
 0x204   : > { %v2021_v8 = vadd.f32 %v1989_v61, %v1953_v40  ;;  %v1741_v56 = vmul.f32 %v4966_v58, %v3219_v35  ;;  %v5296_v32 = vrot.slane %v4870_v50, 1  ;;  %v5297_v19 = vrot.slane %v4876_v20, 2  ;;  %v2698_v40 = vpop.permute.xlu1 %2697  ;;  %v2952_v58 = vld [vmem:[#allocation2 + $0x100] sm:$0x3]  ;;  %2631 = vst.msk [vmem:[%s3176_s10 + $0x40] sm:$0xff] %vm2590_vm5, %v2626_v18 }
 0x205   : > { %v2565_v5 = vmax.f32 %v2533_v55, 0.0  ;;  %v1610_v59 = vrot.slane %v1497_v26, 1  ;;  %v1420_v34 = vmul.f32 %v4791_v16, %v3231_v52  ;;  %v2053_v55 = vmul.f32 %v2952_v58, %v3237_v54  ;;  %2702 = vst.msk [vmem:[%s3176_s10 + $0xb8] sm:$0xff] %vm2590_vm5, %v2698_v40 }
 0x206   : > { %v1054_v51 = vsel %vm1009_vm3, %v5296_v32, %v1053_v29  ;;  %v1299_v9 = vsel %vm1254_vm4, %v5297_v19, %v1298_v45  ;;  %v2265_v10 = vadd.f32 %v2200_v49, %v2021_v8  ;;  %v960_v50 = vmul.f32 %v3146_v38, %v4589_v43 }
 0x207   : > { %v1139_v61 = vadd.f32 %v1054_v51, %v862_v22  ;;  %2657 = vrot.lane.b32.xlu1 %v2565_v5, %s2962_s15  ;;  %v876_v26 = vmul.f32 %v3161_v48, %v4431_v37  ;;  %v1205_v51 = vmul.f32 %v3153_v46, %v4589_v43  ;;  %v5298_v22 = vrot.slane %v4893_v36, 1  ;;  %v2706_v32 = vpop.permute.xlu0 %2705 }
 0x208   : > { %v2509_v29 = vadd.f32 %v2444_v30, %v2265_v10  ;;  %v1854_v45 = vrot.slane %v1741_v56, 2  ;;  %v1088_v16 = vrot.slane %v960_v50, 1  ;;  %v1518_v8 = vmul.f32 %v3216_v39, %v4820_v25  ;;  %v838_v30 = vld [vmem:[#allocation2 + $0x1a8] sm:$0x3]  ;;  %2711 = vst.msk [vmem:[%s3176_s10 + $0xc0] sm:$0xff] %vm2590_vm5, %v2706_v32 }
 0x209   : > { %v1384_v20 = vadd.f32 %v1299_v9, %v1139_v61  ;;  %v1611_v49 = vsel %vm1009_vm3, %v5298_v22, %v1610_v59  ;;  %v1333_v9 = vrot.slane %v1205_v51, 2  ;;  %v1762_v48 = vmul.f32 %v3219_v35, %v4820_v25  ;;  %v2628_v25 = vpop.permute.xlu1 %2627 }
 0x20a   : > { %v2548_v5 = vadd.f32 %v4957_v2, %v2509_v29  ;;  %v2297_v37 = vmul.f32 %v2952_v58, %v4803_v62  ;;  %v5299_v46 = vrot.slane %v4992_v0, 1  ;;  %v1434_v36 = vmul.f32 %v3231_v52, %v4655_v17  ;;  %2632 = vst.msk [vmem:[%s3176_s10 + $0x48] sm:$0xff] %vm2590_vm5, %v2628_v25 }
 0x20b   : > { %v1452_v38 = vadd.f32 %v1420_v34, %v1384_v20  ;;  %v1645_v56 = vrot.slane %v1518_v8, 1  ;;  %v5300_v10 = vrot.slane %v5004_v33, 2  ;;  %v5301_v0 = vrot.slane %v4911_v12, 2 }
 0x20c   : > { %v1089_v43 = vsel %vm1009_vm3, %v5299_v46, %v1088_v16  ;;  %v2580_v39 = vmax.f32 %v2548_v5, 0.0  ;;  %v2166_v52 = vrot.slane %v2053_v55, 1  ;;  %v1889_v17 = vrot.slane %v1762_v48, 2 }
 0x20d   : > { %v1696_v19 = vadd.f32 %v1611_v49, %v1452_v38  ;;  %v1153_v59 = vadd.f32 %v1089_v43, %v876_v26  ;;  %v1334_v35 = vsel %vm1254_vm4, %v5300_v10, %v1333_v9  ;;  %v1855_v61 = vsel %vm1254_vm4, %v5301_v0, %v1854_v45 }
 0x20e   : > { %v2074_v34 = vmul.f32 %v3237_v54, %v838_v30  ;;  %2735 = vrot.lane.b32.xlu0 %v2580_v39, %s2962_s15  ;;  %v1976_v58 = vmul.f32 %v4914_v15, %v3234_v53  ;;  %v2410_v55 = vrot.slane %v2297_v37, 2  ;;  %v5302_v50 = vrot.slane %v5021_v4, 1  ;;  %v2636_v15 = vpop.permute.xlu0 %2635 }
 0x20f   : > { %v1940_v33 = vadd.f32 %v1855_v61, %v1696_v19  ;;  %v1398_v12 = vadd.f32 %v1334_v35, %v1153_v59  ;;  %v2318_v29 = vmul.f32 %v4803_v62, %v838_v30  ;;  %v5303_v63 = vrot.slane %v4918_v41, 1  ;;  %2641 = vst.msk [vmem:[%s3176_s10 + $0x50] sm:$0xff] %vm2590_vm5, %v2636_v15 }
 0x210   : > { %v1646_v54 = vsel %vm1009_vm3, %v5302_v50, %v1645_v56  ;;  %v5304_v47 = vrot.slane %v5032_v7, 2  ;;  %v2201_v42 = vrot.slane %v2074_v34, 1  ;;  %v1990_v44 = vmul.f32 %v3234_v53, %v5017_v24 }
 0x211   : > { %v2008_v62 = vadd.f32 %v1976_v58, %v1940_v33  ;;  %v1466_v27 = vadd.f32 %v1434_v36, %v1398_v12  ;;  %v2167_v14 = vsel %vm1009_vm3, %v5303_v63, %v2166_v52  ;;  %v5305_v57 = vrot.slane %v4926_v28, 2 }
 0x212   : > { %v1890_v1 = vsel %vm1254_vm4, %v5304_v47, %v1889_v17  ;;  %v2445_v4 = vrot.slane %v2318_v29, 2  ;;  %v2202_v31 = vsel %vm1009_vm3, %v2199_v21, %v2201_v42 }
 0x213   : > { %v2252_v6 = vadd.f32 %v2167_v14, %v2008_v62  ;;  %v1710_v13 = vadd.f32 %v1646_v54, %v1466_v27  ;;  %v2411_v41 = vsel %vm1254_vm4, %v5305_v57, %v2410_v55 }
 0x214   : > { %v2446_v53 = vsel %vm1254_vm4, %v2443_v60, %v2445_v4 }
 0x215   : > { %v2496_v11 = vadd.f32 %v2411_v41, %v2252_v6  ;;  %v1954_v7 = vadd.f32 %v1890_v1, %v1710_v13 }
 0x217   : > { %v2535_v18 = vadd.f32 %v4957_v2, %v2496_v11  ;;  %v2022_v40 = vadd.f32 %v1990_v44, %v1954_v7 }
 0x219   : > { %v2567_v28 = vmax.f32 %v2535_v18, 0.0  ;;  %v2266_v24 = vadd.f32 %v2202_v31, %v2022_v40 }
 0x21a   : > { %v2708_v21 = vpop.permute.xlu1 %2707 }
 0x21b   : > { %2667 = vrot.lane.b32.xlu1 %v2567_v28, %s2962_s15  ;;  %v2510_v20 = vadd.f32 %v2446_v53, %v2266_v24  ;;  %2712 = vst.msk [vmem:[%s3176_s10 + $0xc8] sm:$0xff] %vm2590_vm5, %v2708_v21 }
 0x21d   : > { %v2549_v26 = vadd.f32 %v4957_v2, %v2510_v20 }
 0x21f   : > { %v2581_v51 = vmax.f32 %v2549_v26, 0.0 }
 0x221   : > { %2737 = vrot.lane.b32.xlu1 %v2581_v51, %s2962_s15  ;;  %v2716_v3 = vpop.permute.xlu0 %2715 }
 0x222   : > { %2721 = vst.msk [vmem:[%s3176_s10 + $0xd0] sm:$0xff] %vm2590_vm5, %v2716_v3 }
 0x22d   : > { %v2638_v60 = vpop.permute.xlu1 %2637 }
 0x22e   : > { %2642 = vst.msk [vmem:[%s3176_s10 + $0x58] sm:$0xff] %vm2590_vm5, %v2638_v60 }
 0x234   : > { %v2646_v22 = vpop.permute.xlu0 %2645 }
 0x235   : > { %2651 = vst.msk [vmem:[%s3176_s10 + $0x60] sm:$0xff] %vm2590_vm5, %v2646_v22 }
 0x240   : > { %v2718_v2 = vpop.permute.xlu1 %2717 }
 0x241   : > { %2722 = vst.msk [vmem:[%s3176_s10 + $0xd8] sm:$0xff] %vm2590_vm5, %v2718_v2 }
 0x248   : > { %v2726_v49 = vpop.permute.xlu0 %2725 }
 0x249   : > { %2731 = vst.msk [vmem:[%s3176_s10 + $0xe0] sm:$0xff] %vm2590_vm5, %v2726_v49 }
 0x252   : > { %v2648_v45 = vpop.permute.xlu1 %2647 }
 0x253   : > { %2652 = vst.msk [vmem:[%s3176_s10 + $0x68] sm:$0xff] %vm2590_vm5, %v2648_v45 }
 0x25a   : > { %v2656_v16 = vpop.permute.xlu0 %2655 }
 0x25b   : > { %2661 = vst.msk [vmem:[%s3176_s10 + $0x70] sm:$0xff] %vm2590_vm5, %v2656_v16 }
 0x266   : > { %v2728_v8 = vpop.permute.xlu1 %2727 }
 0x267   : > { %2732 = vst.msk [vmem:[%s3176_s10 + $0xe8] sm:$0xff] %vm2590_vm5, %v2728_v8 }
 0x26e   : > { %v2666_v5 = vpop.permute.xlu0 %2665 }
 0x26f   : > { %2671 = vst.msk [vmem:[%s3176_s10 + $0x80] sm:$0xff] %vm2590_vm5, %v2666_v5 }
 0x279   : > { %v2658_v38 = vpop.permute.xlu1 %2657 }
 0x27a   : > { %2662 = vst.msk [vmem:[%s3176_s10 + $0x78] sm:$0xff] %vm2590_vm5, %v2658_v38 }
 0x280   : > { %v2736_v30 = vpop.permute.xlu0 %2735 }
 0x281   : > { %2741 = vst.msk [vmem:[%s3176_s10 + $0xf0] sm:$0xff] %vm2590_vm5, %v2736_v30 }
 0x28d   : > { %v2668_v9 = vpop.permute.xlu1 %2667 }
 0x28e   : > { %2672 = vst.msk [vmem:[%s3176_s10 + $0x88] sm:$0xff] %vm2590_vm5, %v2668_v9 }
 0x293   : > { %v2738_v48 = vpop.permute.xlu1 %2737 }
 0x294   : > { %2742 = vst.msk [vmem:[%s3176_s10 + $0xf8] sm:$0xff] %vm2590_vm5, %v2738_v48 }
 0x295 PF: > { %s16_s21 = sadd.s32 1, %s2959_s21  }
 0x296   : > { %p13_p4 = scmp.ge.s32.totalorder %s16_s21, 4  }
 0x298   :  { %15 = sbr.rel (!%p13_p4) target bundleno = 1 (0x1), region = 90 }

</bundles_post_ra>
